<compile_context>
chip_gen: v7x
topology: tpu7x:2x2x1
jax: 0.10.0
libtpu: 0.0.40
codegen_flags: <defaults>
</compile_context>

<pallas_src>
import jax
import jax.numpy as jnp
import numpy as np
from jax.experimental import pallas as pl
from jax.experimental.pallas import tpu as pltpu

DATALEN = 300
KERNEL_SIZE = 3
LAYER1_NODE = 64
LAYER2_NODE = 64
LAYER3_NODE = 64
OUTPUT_SIZE = 6
WAVEFORMS_INPUT = 7

H = LAYER3_NODE
T_SEQ = LAYER2_NODE          # LSTM sequence length = conv2 output channels (64)
UNROLL = 8                   # inner unroll of the recurrence (T_SEQ % UNROLL == 0)


# ----------------------------------------------------------------------------
# Fused kernel: conv1 + conv2 + hoisted LSTM input projection + 2-layer LSTM + FC
# ----------------------------------------------------------------------------
def _fused_kernel(B):
    L = DATALEN
    NBLK = T_SEQ // UNROLL

    def kernel(x1e_ref, w1_ref, b1p_ref, w2k_ref, b2_ref,
               wih0_ref, whh0_ref, b0_ref, wih1_ref, whh1_ref, b1l_ref,
               fcw_ref, fcb_ref, out_ref, gx_ref):
        # -------- convs + hoisted LSTM layer-0 input projection (per sample) ----
        wih0 = wih0_ref[...]                        # (300, 256)
        b0 = b0_ref[...]                            # (1, 256)
        for b in range(B):
            # conv1 as one im2col matmul + ReLU.  Output is already zero-padded
            # (columns 0 and 301 are exactly 0) so it can feed conv2 directly.
            y1p = jnp.maximum(
                jnp.dot(w1_ref[...], x1e_ref[b],
                        preferred_element_type=jnp.float32) + b1p_ref[...],
                0.0)                                # (64, 302)
            # conv2 (k=3, pad=1) + ReLU
            acc = jnp.dot(w2k_ref[0], y1p[:, 0:L],
                          preferred_element_type=jnp.float32)
            acc = acc + jnp.dot(w2k_ref[1], y1p[:, 1:L + 1],
                                preferred_element_type=jnp.float32)
            acc = acc + jnp.dot(w2k_ref[2], y1p[:, 2:L + 2],
                                preferred_element_type=jnp.float32)
            y2 = jnp.maximum(acc + b2_ref[...], 0.0)            # (T_SEQ, 300)
            # hoisted layer-0 input projection: one well-shaped MXU matmul
            gx = jnp.dot(y2, wih0, preferred_element_type=jnp.float32) + b0
            for m in range(NBLK):                               # (64, 256) -> scratch
                gx_ref[b * NBLK + m] = gx[m * UNROLL:(m + 1) * UNROLL, :]

        # ---------------- 2-layer LSTM recurrence + final FC --------------------
        whh0 = whh0_ref[...]                        # (64, 256)
        wih1 = wih1_ref[...]                        # (64, 256)
        whh1 = whh1_ref[...]                        # (64, 256)
        b1l = b1l_ref[...]                          # (1, 256)

        def sigm(v):                                # EUP tanh instead of VPU divide
            return 0.5 * jnp.tanh(0.5 * v) + 0.5

        def gate_math(gates, c):
            # gate columns permuted offline to [i, f, o, g]
            sg = sigm(gates[:, 0:3 * H])
            g = jnp.tanh(gates[:, 3 * H:4 * H])
            i = sg[:, 0:H]
            f = sg[:, H:2 * H]
            o = sg[:, 2 * H:3 * H]
            c_new = f * c + i * g
            h_new = o * jnp.tanh(c_new)
            return h_new, c_new

        def outer(blk, carry):
            h0, c0, h1, c1 = carry
            # (UNROLL, 4H) chunk of pre-projected gates for each batch element;
            # independent of h/c, so these loads sit off the serial critical path.
            chunks = [gx_ref[b * NBLK + blk] for b in range(B)]
            for j in range(UNROLL):                 # static -> unrolled 8x
                xg = jnp.concatenate([c[j:j + 1, :] for c in chunks], axis=0)
                g0 = xg + jnp.dot(h0, whh0, preferred_element_type=jnp.float32)
                h0, c0 = gate_math(g0, c0)
                g1 = (jnp.dot(h0, wih1, preferred_element_type=jnp.float32)
                      + jnp.dot(h1, whh1, preferred_element_type=jnp.float32)
                      + b1l)
                h1, c1 = gate_math(g1, c1)
            return (h0, c0, h1, c1)

        z = jnp.zeros((B, H), jnp.float32)
        _, _, h1, _ = jax.lax.fori_loop(0, NBLK, outer, (z, z, z, z))

        out_ref[...] = (jnp.dot(h1, fcw_ref[...],
                                preferred_element_type=jnp.float32)
                        + fcb_ref[...])

    return kernel


# ----------------------------------------------------------------------------
# Offline parameter preprocessing (done once, outside the hot path)
# ----------------------------------------------------------------------------
def prepare_params(p):
    def perm(w):  # reorder gate blocks [i, f, g, o] -> [i, f, o, g] along axis 0
        return jnp.concatenate(
            [w[0:H], w[H:2 * H], w[3 * H:4 * H], w[2 * H:3 * H]], axis=0)

    zc = jnp.zeros((LAYER1_NODE, 1), jnp.float32)
    b1_full = jnp.broadcast_to(p["conv1_b"][:, None], (LAYER1_NODE, DATALEN))
    return {
        "w1": p["conv1_w"].reshape(LAYER1_NODE, WAVEFORMS_INPUT * KERNEL_SIZE),
        "b1p": jnp.concatenate([zc, b1_full, zc], axis=1),          # (64, 302)
        "w2k": jnp.transpose(p["conv2_w"], (2, 0, 1)),              # (3, 64, 64)
        "b2": p["conv2_b"].reshape(LAYER2_NODE, 1),                 # (64, 1)
        "wih0_t": perm(p["wih0"]).T,                                # (300, 256)
        "whh0_t": perm(p["whh0"]).T,                                # (64, 256)
        "b0": (perm(p["bih0"]) + perm(p["bhh0"])).reshape(1, 4 * H),
        "wih1_t": perm(p["wih1"]).T,                                # (64, 256)
        "whh1_t": perm(p["whh1"]).T,                                # (64, 256)
        "b1l": (perm(p["bih1"]) + perm(p["bhh1"])).reshape(1, 4 * H),
        "fcw_t": p["fc_w"].T,                                       # (64, 6)
        "fcb": p["fc_b"].reshape(1, OUTPUT_SIZE),                   # (1, 6)
    }


@jax.jit
def mrm3pnet_forward(x, q):
    B = x.shape[0]
    L = DATALEN
    # im2col for conv1 (k=3, pad=1); explicit zero columns at both ends make the
    # in-kernel conv1 output already padded for conv2.
    xp = jnp.pad(x, ((0, 0), (0, 0), (1, 1)))                       # (B, 7, 302)
    im2 = jnp.stack([xp[:, :, k:k + L] for k in range(KERNEL_SIZE)], axis=2)
    im2 = im2.reshape(B, WAVEFORMS_INPUT * KERNEL_SIZE, L)          # row = c*3 + k
    zc = jnp.zeros((B, WAVEFORMS_INPUT * KERNEL_SIZE, 1), x.dtype)
    x1e = jnp.concatenate([zc, im2, zc], axis=2)                    # (B, 21, 302)

    vmem = pl.BlockSpec(memory_space=pltpu.MemorySpace.VMEM)
    return pl.pallas_call(
        _fused_kernel(B),
        out_shape=jax.ShapeDtypeStruct((B, OUTPUT_SIZE), jnp.float32),
        in_specs=[vmem] * 13,
        out_specs=vmem,
        scratch_shapes=[pltpu.VMEM((B * (T_SEQ // UNROLL), UNROLL, 4 * H),
                                   jnp.float32)],
    )(x1e, q["w1"], q["b1p"], q["w2k"], q["b2"],
      q["wih0_t"], q["whh0_t"], q["b0"], q["wih1_t"], q["whh1_t"], q["b1l"],
      q["fcw_t"], q["fcb"])


# ----------------------------------------------------------------------------
# Deterministic parameter init (shapes from MRM3PNet.__init__)
# ----------------------------------------------------------------------------
def init_params(key):
    ks = jax.random.split(key, 14)

    def u(k, shape, fan_in):
        bound = 1.0 / np.sqrt(fan_in)
        return jax.random.uniform(k, shape, jnp.float32, -bound, bound)

    p = {}
    p["conv1_w"] = u(ks[0], (LAYER1_NODE, WAVEFORMS_INPUT, KERNEL_SIZE),
                     WAVEFORMS_INPUT * KERNEL_SIZE)
    p["conv1_b"] = u(ks[1], (LAYER1_NODE,), WAVEFORMS_INPUT * KERNEL_SIZE)
    p["conv2_w"] = u(ks[2], (LAYER2_NODE, LAYER1_NODE, KERNEL_SIZE),
                     LAYER1_NODE * KERNEL_SIZE)
    p["conv2_b"] = u(ks[3], (LAYER2_NODE,), LAYER1_NODE * KERNEL_SIZE)
    p["wih0"] = u(ks[4], (4 * H, DATALEN), H)
    p["whh0"] = u(ks[5], (4 * H, H), H)
    p["bih0"] = u(ks[6], (4 * H,), H)
    p["bhh0"] = u(ks[7], (4 * H,), H)
    p["wih1"] = u(ks[8], (4 * H, H), H)
    p["whh1"] = u(ks[9], (4 * H, H), H)
    p["bih1"] = u(ks[10], (4 * H,), H)
    p["bhh1"] = u(ks[11], (4 * H,), H)
    p["fc_w"] = u(ks[12], (OUTPUT_SIZE, H), H)
    p["fc_b"] = u(ks[13], (OUTPUT_SIZE,), H)
    return p


# ----------------------------------------------------------------------------
# Pure-numpy reference (mirrors the PyTorch forward)
# ----------------------------------------------------------------------------
def ref_forward(x, p):
    def np_sig(v):
        return 1.0 / (1.0 + np.exp(-v))

    def np_conv_relu(xi, w, b):
        B, Cin, L = xi.shape
        Cout, _, K = w.shape
        xp = np.pad(xi, ((0, 0), (0, 0), (1, 1)))
        y = np.zeros((B, Cout, L), np.float32)
        for k in range(K):
            y += np.einsum("oc,bcl->bol", w[:, :, k], xp[:, :, k:k + L])
        return np.maximum(y + b[None, :, None], 0.0)

    def np_lstm_layer(seq, wih, whh, bih, bhh):
        B, T, _ = seq.shape
        Hh = whh.shape[1]
        h = np.zeros((B, Hh), np.float32)
        c = np.zeros((B, Hh), np.float32)
        outs = []
        for t in range(T):
            g = seq[:, t, :] @ wih.T + h @ whh.T + bih + bhh
            i = np_sig(g[:, 0:Hh])
            f = np_sig(g[:, Hh:2 * Hh])
            gg = np.tanh(g[:, 2 * Hh:3 * Hh])
            o = np_sig(g[:, 3 * Hh:4 * Hh])
            c = f * c + i * gg
            h = o * np.tanh(c)
            outs.append(h)
        return np.stack(outs, axis=1)

    h = np_conv_relu(x, p["conv1_w"], p["conv1_b"])
    h = np_conv_relu(h, p["conv2_w"], p["conv2_b"])
    o1 = np_lstm_layer(h, p["wih0"], p["whh0"], p["bih0"], p["bhh0"])
    o2 = np_lstm_layer(o1, p["wih1"], p["whh1"], p["bih1"], p["bhh1"])
    last = o2[:, -1, :]
    return last @ p["fc_w"].T + p["fc_b"]


if __name__ == "__main__":
    B = 2
    x = jax.random.normal(jax.random.PRNGKey(0),
                          (B, WAVEFORMS_INPUT, DATALEN), jnp.float32)
    params = init_params(jax.random.PRNGKey(42))
    prepped = prepare_params(params)

    out = mrm3pnet_forward(x, prepped)
    out = jax.block_until_ready(out)
    assert out.shape == (B, OUTPUT_SIZE)

    ref = ref_forward(np.asarray(x),
                      {k: np.asarray(v) for k, v in params.items()})
    np.testing.assert_allclose(np.asarray(out), ref, rtol=1e-2, atol=1e-2)
    print("KERNEL_OK")
</pallas_src>

<mosaic_0001>
module attributes {stable_mosaic.version = 11 : i64} {
  func.func @kernel(%arg0: memref<2x21x302xf32, #tpu.memory_space<vmem>>, %arg1: memref<64x21xf32, #tpu.memory_space<vmem>>, %arg2: memref<64x302xf32, #tpu.memory_space<vmem>>, %arg3: memref<3x64x64xf32, #tpu.memory_space<vmem>>, %arg4: memref<64x1xf32, #tpu.memory_space<vmem>>, %arg5: memref<300x256xf32, #tpu.memory_space<vmem>>, %arg6: memref<64x256xf32, #tpu.memory_space<vmem>>, %arg7: memref<1x256xf32, #tpu.memory_space<vmem>>, %arg8: memref<64x256xf32, #tpu.memory_space<vmem>>, %arg9: memref<64x256xf32, #tpu.memory_space<vmem>>, %arg10: memref<1x256xf32, #tpu.memory_space<vmem>>, %arg11: memref<64x6xf32, #tpu.memory_space<vmem>>, %arg12: memref<1x6xf32, #tpu.memory_space<vmem>>, %arg13: memref<2x6xf32, #tpu.memory_space<vmem>>, %arg14: memref<16x8x256xf32, #tpu.memory_space<vmem>>) attributes {dimension_semantics = [], scalar_prefetch = 0 : i64, scratch_operands = 1 : i64, tpu.core_type = #tpu.core_type<tc>} {
    %c0 = arith.constant 0 : index
    %c0_0 = arith.constant 0 : index
    %0 = vector.load %arg5[%c0, %c0_0] : memref<300x256xf32, #tpu.memory_space<vmem>>, vector<300x256xf32>
    %c0_1 = arith.constant 0 : index
    %c0_2 = arith.constant 0 : index
    %1 = vector.load %arg7[%c0_1, %c0_2] : memref<1x256xf32, #tpu.memory_space<vmem>>, vector<1x256xf32>
    %c0_3 = arith.constant 0 : index
    %c0_4 = arith.constant 0 : index
    %2 = vector.load %arg1[%c0_3, %c0_4] : memref<64x21xf32, #tpu.memory_space<vmem>>, vector<64x21xf32>
    %c0_5 = arith.constant 0 : index
    %c0_6 = arith.constant 0 : index
    %c0_7 = arith.constant 0 : index
    %3 = vector.load %arg0[%c0_5, %c0_6, %c0_7] : memref<2x21x302xf32, #tpu.memory_space<vmem>>, vector<1x21x302xf32>
    %4 = vector.shape_cast %3 : vector<1x21x302xf32> to vector<21x302xf32>
    %cst = arith.constant dense<0.000000e+00> : vector<64x302xf32>
    %5 = tpu.matmul %2, %4, %cst {dimension_numbers = #tpu.dot_dimension_numbers<[1], [0], [0], [1], [0, 0, 1, 1], [], []>} : vector<64x21xf32>, vector<21x302xf32>, vector<64x302xf32> -> vector<64x302xf32>
    %c0_8 = arith.constant 0 : index
    %c0_9 = arith.constant 0 : index
    %6 = vector.load %arg2[%c0_8, %c0_9] : memref<64x302xf32, #tpu.memory_space<vmem>>, vector<64x302xf32>
    %7 = arith.addf %5, %6 : vector<64x302xf32>
    %cst_10 = arith.constant 0.000000e+00 : f32
    %8 = vector.broadcast %cst_10 : f32 to vector<64x302xf32>
    %9 = arith.maximumf %7, %8 : vector<64x302xf32>
    %c0_11 = arith.constant 0 : index
    %c0_12 = arith.constant 0 : index
    %c0_13 = arith.constant 0 : index
    %10 = vector.load %arg3[%c0_11, %c0_12, %c0_13] : memref<3x64x64xf32, #tpu.memory_space<vmem>>, vector<1x64x64xf32>
    %11 = vector.shape_cast %10 : vector<1x64x64xf32> to vector<64x64xf32>
    %12 = vector.extract_strided_slice %9 {offsets = [0, 0], sizes = [64, 300], strides = [1, 1]} : vector<64x302xf32> to vector<64x300xf32>
    %cst_14 = arith.constant dense<0.000000e+00> : vector<64x300xf32>
    %13 = tpu.matmul %11, %12, %cst_14 {dimension_numbers = #tpu.dot_dimension_numbers<[1], [0], [0], [1], [0, 0, 1, 1], [], []>} : vector<64x64xf32>, vector<64x300xf32>, vector<64x300xf32> -> vector<64x300xf32>
    %c1 = arith.constant 1 : index
    %c0_15 = arith.constant 0 : index
    %c0_16 = arith.constant 0 : index
    %14 = vector.load %arg3[%c1, %c0_15, %c0_16] : memref<3x64x64xf32, #tpu.memory_space<vmem>>, vector<1x64x64xf32>
    %15 = vector.shape_cast %14 : vector<1x64x64xf32> to vector<64x64xf32>
    %16 = vector.extract_strided_slice %9 {offsets = [0, 1], sizes = [64, 300], strides = [1, 1]} : vector<64x302xf32> to vector<64x300xf32>
    %cst_17 = arith.constant dense<0.000000e+00> : vector<64x300xf32>
    %17 = tpu.matmul %15, %16, %cst_17 {dimension_numbers = #tpu.dot_dimension_numbers<[1], [0], [0], [1], [0, 0, 1, 1], [], []>} : vector<64x64xf32>, vector<64x300xf32>, vector<64x300xf32> -> vector<64x300xf32>
    %18 = arith.addf %13, %17 : vector<64x300xf32>
    %c2 = arith.constant 2 : index
    %c0_18 = arith.constant 0 : index
    %c0_19 = arith.constant 0 : index
    %19 = vector.load %arg3[%c2, %c0_18, %c0_19] : memref<3x64x64xf32, #tpu.memory_space<vmem>>, vector<1x64x64xf32>
    %20 = vector.shape_cast %19 : vector<1x64x64xf32> to vector<64x64xf32>
    %21 = vector.extract_strided_slice %9 {offsets = [0, 2], sizes = [64, 300], strides = [1, 1]} : vector<64x302xf32> to vector<64x300xf32>
    %cst_20 = arith.constant dense<0.000000e+00> : vector<64x300xf32>
    %22 = tpu.matmul %20, %21, %cst_20 {dimension_numbers = #tpu.dot_dimension_numbers<[1], [0], [0], [1], [0, 0, 1, 1], [], []>} : vector<64x64xf32>, vector<64x300xf32>, vector<64x300xf32> -> vector<64x300xf32>
    %23 = arith.addf %18, %22 : vector<64x300xf32>
    %c0_21 = arith.constant 0 : index
    %c0_22 = arith.constant 0 : index
    %24 = vector.load %arg4[%c0_21, %c0_22] : memref<64x1xf32, #tpu.memory_space<vmem>>, vector<64x1xf32>
    %25 = vector.broadcast %24 : vector<64x1xf32> to vector<64x300xf32>
    %26 = arith.addf %23, %25 : vector<64x300xf32>
    %cst_23 = arith.constant 0.000000e+00 : f32
    %27 = vector.broadcast %cst_23 : f32 to vector<64x300xf32>
    %28 = arith.maximumf %26, %27 : vector<64x300xf32>
    %cst_24 = arith.constant dense<0.000000e+00> : vector<64x256xf32>
    %29 = tpu.matmul %28, %0, %cst_24 {dimension_numbers = #tpu.dot_dimension_numbers<[1], [0], [0], [1], [0, 0, 1, 1], [], []>} : vector<64x300xf32>, vector<300x256xf32>, vector<64x256xf32> -> vector<64x256xf32>
    %30 = vector.broadcast %1 : vector<1x256xf32> to vector<64x256xf32>
    %31 = arith.addf %29, %30 : vector<64x256xf32>
    %32 = vector.extract_strided_slice %31 {offsets = [0, 0], sizes = [8, 256], strides = [1, 1]} : vector<64x256xf32> to vector<8x256xf32>
    %c0_25 = arith.constant 0 : index
    %c0_26 = arith.constant 0 : index
    %c0_27 = arith.constant 0 : index
    %33 = vector.load %arg14[%c0_25, %c0_26, %c0_27] : memref<16x8x256xf32, #tpu.memory_space<vmem>>, vector<1x8x256xf32>
    %34 = vector.shape_cast %33 : vector<1x8x256xf32> to vector<8x256xf32>
    %35 = vector.shape_cast %32 : vector<8x256xf32> to vector<1x8x256xf32>
    tpu.vector_store %arg14[%c0_25, %c0_26, %c0_27], %35 {strides = array<i32>} : memref<16x8x256xf32, #tpu.memory_space<vmem>>, vector<1x8x256xf32>,
    %36 = vector.extract_strided_slice %31 {offsets = [8, 0], sizes = [8, 256], strides = [1, 1]} : vector<64x256xf32> to vector<8x256xf32>
    %c1_28 = arith.constant 1 : index
    %c0_29 = arith.constant 0 : index
    %c0_30 = arith.constant 0 : index
    %37 = vector.load %arg14[%c1_28, %c0_29, %c0_30] : memref<16x8x256xf32, #tpu.memory_space<vmem>>, vector<1x8x256xf32>
    %38 = vector.shape_cast %37 : vector<1x8x256xf32> to vector<8x256xf32>
    %39 = vector.shape_cast %36 : vector<8x256xf32> to vector<1x8x256xf32>
    tpu.vector_store %arg14[%c1_28, %c0_29, %c0_30], %39 {strides = array<i32>} : memref<16x8x256xf32, #tpu.memory_space<vmem>>, vector<1x8x256xf32>,
    %40 = vector.extract_strided_slice %31 {offsets = [16, 0], sizes = [8, 256], strides = [1, 1]} : vector<64x256xf32> to vector<8x256xf32>
    %c2_31 = arith.constant 2 : index
    %c0_32 = arith.constant 0 : index
    %c0_33 = arith.constant 0 : index
    %41 = vector.load %arg14[%c2_31, %c0_32, %c0_33] : memref<16x8x256xf32, #tpu.memory_space<vmem>>, vector<1x8x256xf32>
    %42 = vector.shape_cast %41 : vector<1x8x256xf32> to vector<8x256xf32>
    %43 = vector.shape_cast %40 : vector<8x256xf32> to vector<1x8x256xf32>
    tpu.vector_store %arg14[%c2_31, %c0_32, %c0_33], %43 {strides = array<i32>} : memref<16x8x256xf32, #tpu.memory_space<vmem>>, vector<1x8x256xf32>,
    %44 = vector.extract_strided_slice %31 {offsets = [24, 0], sizes = [8, 256], strides = [1, 1]} : vector<64x256xf32> to vector<8x256xf32>
    %c3 = arith.constant 3 : index
    %c0_34 = arith.constant 0 : index
    %c0_35 = arith.constant 0 : index
    %45 = vector.load %arg14[%c3, %c0_34, %c0_35] : memref<16x8x256xf32, #tpu.memory_space<vmem>>, vector<1x8x256xf32>
    %46 = vector.shape_cast %45 : vector<1x8x256xf32> to vector<8x256xf32>
    %47 = vector.shape_cast %44 : vector<8x256xf32> to vector<1x8x256xf32>
    tpu.vector_store %arg14[%c3, %c0_34, %c0_35], %47 {strides = array<i32>} : memref<16x8x256xf32, #tpu.memory_space<vmem>>, vector<1x8x256xf32>,
    %48 = vector.extract_strided_slice %31 {offsets = [32, 0], sizes = [8, 256], strides = [1, 1]} : vector<64x256xf32> to vector<8x256xf32>
    %c4 = arith.constant 4 : index
    %c0_36 = arith.constant 0 : index
    %c0_37 = arith.constant 0 : index
    %49 = vector.load %arg14[%c4, %c0_36, %c0_37] : memref<16x8x256xf32, #tpu.memory_space<vmem>>, vector<1x8x256xf32>
    %50 = vector.shape_cast %49 : vector<1x8x256xf32> to vector<8x256xf32>
    %51 = vector.shape_cast %48 : vector<8x256xf32> to vector<1x8x256xf32>
    tpu.vector_store %arg14[%c4, %c0_36, %c0_37], %51 {strides = array<i32>} : memref<16x8x256xf32, #tpu.memory_space<vmem>>, vector<1x8x256xf32>,
    %52 = vector.extract_strided_slice %31 {offsets = [40, 0], sizes = [8, 256], strides = [1, 1]} : vector<64x256xf32> to vector<8x256xf32>
    %c5 = arith.constant 5 : index
    %c0_38 = arith.constant 0 : index
    %c0_39 = arith.constant 0 : index
    %53 = vector.load %arg14[%c5, %c0_38, %c0_39] : memref<16x8x256xf32, #tpu.memory_space<vmem>>, vector<1x8x256xf32>
    %54 = vector.shape_cast %53 : vector<1x8x256xf32> to vector<8x256xf32>
    %55 = vector.shape_cast %52 : vector<8x256xf32> to vector<1x8x256xf32>
    tpu.vector_store %arg14[%c5, %c0_38, %c0_39], %55 {strides = array<i32>} : memref<16x8x256xf32, #tpu.memory_space<vmem>>, vector<1x8x256xf32>,
    %56 = vector.extract_strided_slice %31 {offsets = [48, 0], sizes = [8, 256], strides = [1, 1]} : vector<64x256xf32> to vector<8x256xf32>
    %c6 = arith.constant 6 : index
    %c0_40 = arith.constant 0 : index
    %c0_41 = arith.constant 0 : index
    %57 = vector.load %arg14[%c6, %c0_40, %c0_41] : memref<16x8x256xf32, #tpu.memory_space<vmem>>, vector<1x8x256xf32>
    %58 = vector.shape_cast %57 : vector<1x8x256xf32> to vector<8x256xf32>
    %59 = vector.shape_cast %56 : vector<8x256xf32> to vector<1x8x256xf32>
    tpu.vector_store %arg14[%c6, %c0_40, %c0_41], %59 {strides = array<i32>} : memref<16x8x256xf32, #tpu.memory_space<vmem>>, vector<1x8x256xf32>,
    %60 = vector.extract_strided_slice %31 {offsets = [56, 0], sizes = [8, 256], strides = [1, 1]} : vector<64x256xf32> to vector<8x256xf32>
    %c7 = arith.constant 7 : index
    %c0_42 = arith.constant 0 : index
    %c0_43 = arith.constant 0 : index
    %61 = vector.load %arg14[%c7, %c0_42, %c0_43] : memref<16x8x256xf32, #tpu.memory_space<vmem>>, vector<1x8x256xf32>
    %62 = vector.shape_cast %61 : vector<1x8x256xf32> to vector<8x256xf32>
    %63 = vector.shape_cast %60 : vector<8x256xf32> to vector<1x8x256xf32>
    tpu.vector_store %arg14[%c7, %c0_42, %c0_43], %63 {strides = array<i32>} : memref<16x8x256xf32, #tpu.memory_space<vmem>>, vector<1x8x256xf32>,
    %c0_44 = arith.constant 0 : index
    %c0_45 = arith.constant 0 : index
    %64 = vector.load %arg1[%c0_44, %c0_45] : memref<64x21xf32, #tpu.memory_space<vmem>>, vector<64x21xf32>
    %c1_46 = arith.constant 1 : index
    %c0_47 = arith.constant 0 : index
    %c0_48 = arith.constant 0 : index
    %65 = vector.load %arg0[%c1_46, %c0_47, %c0_48] : memref<2x21x302xf32, #tpu.memory_space<vmem>>, vector<1x21x302xf32>
    %66 = vector.shape_cast %65 : vector<1x21x302xf32> to vector<21x302xf32>
    %cst_49 = arith.constant dense<0.000000e+00> : vector<64x302xf32>
    %67 = tpu.matmul %64, %66, %cst_49 {dimension_numbers = #tpu.dot_dimension_numbers<[1], [0], [0], [1], [0, 0, 1, 1], [], []>} : vector<64x21xf32>, vector<21x302xf32>, vector<64x302xf32> -> vector<64x302xf32>
    %c0_50 = arith.constant 0 : index
    %c0_51 = arith.constant 0 : index
    %68 = vector.load %arg2[%c0_50, %c0_51] : memref<64x302xf32, #tpu.memory_space<vmem>>, vector<64x302xf32>
    %69 = arith.addf %67, %68 : vector<64x302xf32>
    %cst_52 = arith.constant 0.000000e+00 : f32
    %70 = vector.broadcast %cst_52 : f32 to vector<64x302xf32>
    %71 = arith.maximumf %69, %70 : vector<64x302xf32>
    %c0_53 = arith.constant 0 : index
    %c0_54 = arith.constant 0 : index
    %c0_55 = arith.constant 0 : index
    %72 = vector.load %arg3[%c0_53, %c0_54, %c0_55] : memref<3x64x64xf32, #tpu.memory_space<vmem>>, vector<1x64x64xf32>
    %73 = vector.shape_cast %72 : vector<1x64x64xf32> to vector<64x64xf32>
    %74 = vector.extract_strided_slice %71 {offsets = [0, 0], sizes = [64, 300], strides = [1, 1]} : vector<64x302xf32> to vector<64x300xf32>
    %cst_56 = arith.constant dense<0.000000e+00> : vector<64x300xf32>
    %75 = tpu.matmul %73, %74, %cst_56 {dimension_numbers = #tpu.dot_dimension_numbers<[1], [0], [0], [1], [0, 0, 1, 1], [], []>} : vector<64x64xf32>, vector<64x300xf32>, vector<64x300xf32> -> vector<64x300xf32>
    %c1_57 = arith.constant 1 : index
    %c0_58 = arith.constant 0 : index
    %c0_59 = arith.constant 0 : index
    %76 = vector.load %arg3[%c1_57, %c0_58, %c0_59] : memref<3x64x64xf32, #tpu.memory_space<vmem>>, vector<1x64x64xf32>
    %77 = vector.shape_cast %76 : vector<1x64x64xf32> to vector<64x64xf32>
    %78 = vector.extract_strided_slice %71 {offsets = [0, 1], sizes = [64, 300], strides = [1, 1]} : vector<64x302xf32> to vector<64x300xf32>
    %cst_60 = arith.constant dense<0.000000e+00> : vector<64x300xf32>
    %79 = tpu.matmul %77, %78, %cst_60 {dimension_numbers = #tpu.dot_dimension_numbers<[1], [0], [0], [1], [0, 0, 1, 1], [], []>} : vector<64x64xf32>, vector<64x300xf32>, vector<64x300xf32> -> vector<64x300xf32>
    %80 = arith.addf %75, %79 : vector<64x300xf32>
    %c2_61 = arith.constant 2 : index
    %c0_62 = arith.constant 0 : index
    %c0_63 = arith.constant 0 : index
    %81 = vector.load %arg3[%c2_61, %c0_62, %c0_63] : memref<3x64x64xf32, #tpu.memory_space<vmem>>, vector<1x64x64xf32>
    %82 = vector.shape_cast %81 : vector<1x64x64xf32> to vector<64x64xf32>
    %83 = vector.extract_strided_slice %71 {offsets = [0, 2], sizes = [64, 300], strides = [1, 1]} : vector<64x302xf32> to vector<64x300xf32>
    %cst_64 = arith.constant dense<0.000000e+00> : vector<64x300xf32>
    %84 = tpu.matmul %82, %83, %cst_64 {dimension_numbers = #tpu.dot_dimension_numbers<[1], [0], [0], [1], [0, 0, 1, 1], [], []>} : vector<64x64xf32>, vector<64x300xf32>, vector<64x300xf32> -> vector<64x300xf32>
    %85 = arith.addf %80, %84 : vector<64x300xf32>
    %c0_65 = arith.constant 0 : index
    %c0_66 = arith.constant 0 : index
    %86 = vector.load %arg4[%c0_65, %c0_66] : memref<64x1xf32, #tpu.memory_space<vmem>>, vector<64x1xf32>
    %87 = vector.broadcast %86 : vector<64x1xf32> to vector<64x300xf32>
    %88 = arith.addf %85, %87 : vector<64x300xf32>
    %cst_67 = arith.constant 0.000000e+00 : f32
    %89 = vector.broadcast %cst_67 : f32 to vector<64x300xf32>
    %90 = arith.maximumf %88, %89 : vector<64x300xf32>
    %cst_68 = arith.constant dense<0.000000e+00> : vector<64x256xf32>
    %91 = tpu.matmul %90, %0, %cst_68 {dimension_numbers = #tpu.dot_dimension_numbers<[1], [0], [0], [1], [0, 0, 1, 1], [], []>} : vector<64x300xf32>, vector<300x256xf32>, vector<64x256xf32> -> vector<64x256xf32>
    %92 = vector.broadcast %1 : vector<1x256xf32> to vector<64x256xf32>
    %93 = arith.addf %91, %92 : vector<64x256xf32>
    %94 = vector.extract_strided_slice %93 {offsets = [0, 0], sizes = [8, 256], strides = [1, 1]} : vector<64x256xf32> to vector<8x256xf32>
    %c8 = arith.constant 8 : index
    %c0_69 = arith.constant 0 : index
    %c0_70 = arith.constant 0 : index
    %95 = vector.load %arg14[%c8, %c0_69, %c0_70] : memref<16x8x256xf32, #tpu.memory_space<vmem>>, vector<1x8x256xf32>
    %96 = vector.shape_cast %95 : vector<1x8x256xf32> to vector<8x256xf32>
    %97 = vector.shape_cast %94 : vector<8x256xf32> to vector<1x8x256xf32>
    tpu.vector_store %arg14[%c8, %c0_69, %c0_70], %97 {strides = array<i32>} : memref<16x8x256xf32, #tpu.memory_space<vmem>>, vector<1x8x256xf32>,
    %98 = vector.extract_strided_slice %93 {offsets = [8, 0], sizes = [8, 256], strides = [1, 1]} : vector<64x256xf32> to vector<8x256xf32>
    %c9 = arith.constant 9 : index
    %c0_71 = arith.constant 0 : index
    %c0_72 = arith.constant 0 : index
    %99 = vector.load %arg14[%c9, %c0_71, %c0_72] : memref<16x8x256xf32, #tpu.memory_space<vmem>>, vector<1x8x256xf32>
    %100 = vector.shape_cast %99 : vector<1x8x256xf32> to vector<8x256xf32>
    %101 = vector.shape_cast %98 : vector<8x256xf32> to vector<1x8x256xf32>
    tpu.vector_store %arg14[%c9, %c0_71, %c0_72], %101 {strides = array<i32>} : memref<16x8x256xf32, #tpu.memory_space<vmem>>, vector<1x8x256xf32>,
    %102 = vector.extract_strided_slice %93 {offsets = [16, 0], sizes = [8, 256], strides = [1, 1]} : vector<64x256xf32> to vector<8x256xf32>
    %c10 = arith.constant 10 : index
    %c0_73 = arith.constant 0 : index
    %c0_74 = arith.constant 0 : index
    %103 = vector.load %arg14[%c10, %c0_73, %c0_74] : memref<16x8x256xf32, #tpu.memory_space<vmem>>, vector<1x8x256xf32>
    %104 = vector.shape_cast %103 : vector<1x8x256xf32> to vector<8x256xf32>
    %105 = vector.shape_cast %102 : vector<8x256xf32> to vector<1x8x256xf32>
    tpu.vector_store %arg14[%c10, %c0_73, %c0_74], %105 {strides = array<i32>} : memref<16x8x256xf32, #tpu.memory_space<vmem>>, vector<1x8x256xf32>,
    %106 = vector.extract_strided_slice %93 {offsets = [24, 0], sizes = [8, 256], strides = [1, 1]} : vector<64x256xf32> to vector<8x256xf32>
    %c11 = arith.constant 11 : index
    %c0_75 = arith.constant 0 : index
    %c0_76 = arith.constant 0 : index
    %107 = vector.load %arg14[%c11, %c0_75, %c0_76] : memref<16x8x256xf32, #tpu.memory_space<vmem>>, vector<1x8x256xf32>
    %108 = vector.shape_cast %107 : vector<1x8x256xf32> to vector<8x256xf32>
    %109 = vector.shape_cast %106 : vector<8x256xf32> to vector<1x8x256xf32>
    tpu.vector_store %arg14[%c11, %c0_75, %c0_76], %109 {strides = array<i32>} : memref<16x8x256xf32, #tpu.memory_space<vmem>>, vector<1x8x256xf32>,
    %110 = vector.extract_strided_slice %93 {offsets = [32, 0], sizes = [8, 256], strides = [1, 1]} : vector<64x256xf32> to vector<8x256xf32>
    %c12 = arith.constant 12 : index
    %c0_77 = arith.constant 0 : index
    %c0_78 = arith.constant 0 : index
    %111 = vector.load %arg14[%c12, %c0_77, %c0_78] : memref<16x8x256xf32, #tpu.memory_space<vmem>>, vector<1x8x256xf32>
    %112 = vector.shape_cast %111 : vector<1x8x256xf32> to vector<8x256xf32>
    %113 = vector.shape_cast %110 : vector<8x256xf32> to vector<1x8x256xf32>
    tpu.vector_store %arg14[%c12, %c0_77, %c0_78], %113 {strides = array<i32>} : memref<16x8x256xf32, #tpu.memory_space<vmem>>, vector<1x8x256xf32>,
    %114 = vector.extract_strided_slice %93 {offsets = [40, 0], sizes = [8, 256], strides = [1, 1]} : vector<64x256xf32> to vector<8x256xf32>
    %c13 = arith.constant 13 : index
    %c0_79 = arith.constant 0 : index
    %c0_80 = arith.constant 0 : index
    %115 = vector.load %arg14[%c13, %c0_79, %c0_80] : memref<16x8x256xf32, #tpu.memory_space<vmem>>, vector<1x8x256xf32>
    %116 = vector.shape_cast %115 : vector<1x8x256xf32> to vector<8x256xf32>
    %117 = vector.shape_cast %114 : vector<8x256xf32> to vector<1x8x256xf32>
    tpu.vector_store %arg14[%c13, %c0_79, %c0_80], %117 {strides = array<i32>} : memref<16x8x256xf32, #tpu.memory_space<vmem>>, vector<1x8x256xf32>,
    %118 = vector.extract_strided_slice %93 {offsets = [48, 0], sizes = [8, 256], strides = [1, 1]} : vector<64x256xf32> to vector<8x256xf32>
    %c14 = arith.constant 14 : index
    %c0_81 = arith.constant 0 : index
    %c0_82 = arith.constant 0 : index
    %119 = vector.load %arg14[%c14, %c0_81, %c0_82] : memref<16x8x256xf32, #tpu.memory_space<vmem>>, vector<1x8x256xf32>
    %120 = vector.shape_cast %119 : vector<1x8x256xf32> to vector<8x256xf32>
    %121 = vector.shape_cast %118 : vector<8x256xf32> to vector<1x8x256xf32>
    tpu.vector_store %arg14[%c14, %c0_81, %c0_82], %121 {strides = array<i32>} : memref<16x8x256xf32, #tpu.memory_space<vmem>>, vector<1x8x256xf32>,
    %122 = vector.extract_strided_slice %93 {offsets = [56, 0], sizes = [8, 256], strides = [1, 1]} : vector<64x256xf32> to vector<8x256xf32>
    %c15 = arith.constant 15 : index
    %c0_83 = arith.constant 0 : index
    %c0_84 = arith.constant 0 : index
    %123 = vector.load %arg14[%c15, %c0_83, %c0_84] : memref<16x8x256xf32, #tpu.memory_space<vmem>>, vector<1x8x256xf32>
    %124 = vector.shape_cast %123 : vector<1x8x256xf32> to vector<8x256xf32>
    %125 = vector.shape_cast %122 : vector<8x256xf32> to vector<1x8x256xf32>
    tpu.vector_store %arg14[%c15, %c0_83, %c0_84], %125 {strides = array<i32>} : memref<16x8x256xf32, #tpu.memory_space<vmem>>, vector<1x8x256xf32>,
    %c0_85 = arith.constant 0 : index
    %c0_86 = arith.constant 0 : index
    %126 = vector.load %arg6[%c0_85, %c0_86] : memref<64x256xf32, #tpu.memory_space<vmem>>, vector<64x256xf32>
    %c0_87 = arith.constant 0 : index
    %c0_88 = arith.constant 0 : index
    %127 = vector.load %arg8[%c0_87, %c0_88] : memref<64x256xf32, #tpu.memory_space<vmem>>, vector<64x256xf32>
    %c0_89 = arith.constant 0 : index
    %c0_90 = arith.constant 0 : index
    %128 = vector.load %arg9[%c0_89, %c0_90] : memref<64x256xf32, #tpu.memory_space<vmem>>, vector<64x256xf32>
    %c0_91 = arith.constant 0 : index
    %c0_92 = arith.constant 0 : index
    %129 = vector.load %arg10[%c0_91, %c0_92] : memref<1x256xf32, #tpu.memory_space<vmem>>, vector<1x256xf32>
    %cst_93 = arith.constant 0.000000e+00 : f32
    %130 = vector.broadcast %cst_93 : f32 to vector<2x64xf32>
    %c0_i32 = arith.constant 0 : i32
    %c8_i32 = arith.constant 8 : i32
    %131 = arith.addi %c0_i32, %c8_i32 : i32
    %c1_i32 = arith.constant 1 : i32
    %132:4 = scf.for %arg15 = %c0_i32 to %131 step %c1_i32 iter_args(%arg16 = %130, %arg17 = %130, %arg18 = %130, %arg19 = %130) -> (vector<2x64xf32>, vector<2x64xf32>, vector<2x64xf32>, vector<2x64xf32>)  : i32 {
      %c0_i32_102 = arith.constant 0 : i32
      %139 = arith.addi %c0_i32_102, %arg15 : i32
      %140 = arith.index_cast %139 : i32 to index
      %c0_103 = arith.constant 0 : index
      %c0_104 = arith.constant 0 : index
      %141 = vector.load %arg14[%140, %c0_103, %c0_104] : memref<16x8x256xf32, #tpu.memory_space<vmem>>, vector<1x8x256xf32>
      %142 = vector.shape_cast %141 : vector<1x8x256xf32> to vector<8x256xf32>
      %c8_i32_105 = arith.constant 8 : i32
      %143 = arith.addi %c8_i32_105, %arg15 : i32
      %144 = arith.index_cast %143 : i32 to index
      %c0_106 = arith.constant 0 : index
      %c0_107 = arith.constant 0 : index
      %145 = vector.load %arg14[%144, %c0_106, %c0_107] : memref<16x8x256xf32, #tpu.memory_space<vmem>>, vector<1x8x256xf32>
      %146 = vector.shape_cast %145 : vector<1x8x256xf32> to vector<8x256xf32>
      %147 = vector.extract_strided_slice %142 {offsets = [0, 0], sizes = [1, 256], strides = [1, 1]} : vector<8x256xf32> to vector<1x256xf32>
      %148 = vector.extract_strided_slice %146 {offsets = [0, 0], sizes = [1, 256], strides = [1, 1]} : vector<8x256xf32> to vector<1x256xf32>
      %149 = tpu.concatenate %147, %148 in 0 : vector<1x256xf32>, vector<1x256xf32> -> vector<2x256xf32>
      %cst_108 = arith.constant dense<0.000000e+00> : vector<2x256xf32>
      %150 = tpu.matmul %arg16, %126, %cst_108 {dimension_numbers = #tpu.dot_dimension_numbers<[1], [0], [0], [1], [0, 0, 1, 1], [], []>} : vector<2x64xf32>, vector<64x256xf32>, vector<2x256xf32> -> vector<2x256xf32>
      %151 = arith.addf %149, %150 : vector<2x256xf32>
      %152 = vector.extract_strided_slice %151 {offsets = [0, 0], sizes = [2, 192], strides = [1, 1]} : vector<2x256xf32> to vector<2x192xf32>
      %cst_109 = arith.constant 5.000000e-01 : f32
      %153 = vector.broadcast %cst_109 : f32 to vector<2x192xf32>
      %154 = arith.mulf %153, %152 : vector<2x192xf32>
      %155 = math.tanh %154 : vector<2x192xf32>
      %cst_110 = arith.constant 5.000000e-01 : f32
      %156 = vector.broadcast %cst_110 : f32 to vector<2x192xf32>
      %157 = arith.mulf %156, %155 : vector<2x192xf32>
      %cst_111 = arith.constant 5.000000e-01 : f32
      %158 = vector.broadcast %cst_111 : f32 to vector<2x192xf32>
      %159 = arith.addf %157, %158 : vector<2x192xf32>
      %160 = vector.extract_strided_slice %151 {offsets = [0, 192], sizes = [2, 64], strides = [1, 1]} : vector<2x256xf32> to vector<2x64xf32>
      %161 = math.tanh %160 : vector<2x64xf32>
      %162 = vector.extract_strided_slice %159 {offsets = [0, 0], sizes = [2, 64], strides = [1, 1]} : vector<2x192xf32> to vector<2x64xf32>
      %163 = vector.extract_strided_slice %159 {offsets = [0, 64], sizes = [2, 64], strides = [1, 1]} : vector<2x192xf32> to vector<2x64xf32>
      %164 = vector.extract_strided_slice %159 {offsets = [0, 128], sizes = [2, 64], strides = [1, 1]} : vector<2x192xf32> to vector<2x64xf32>
      %165 = arith.mulf %163, %arg17 : vector<2x64xf32>
      %166 = arith.mulf %162, %161 : vector<2x64xf32>
      %167 = arith.addf %165, %166 : vector<2x64xf32>
      %168 = math.tanh %167 : vector<2x64xf32>
      %169 = arith.mulf %164, %168 : vector<2x64xf32>
      %cst_112 = arith.constant dense<0.000000e+00> : vector<2x256xf32>
      %170 = tpu.matmul %169, %127, %cst_112 {dimension_numbers = #tpu.dot_dimension_numbers<[1], [0], [0], [1], [0, 0, 1, 1], [], []>} : vector<2x64xf32>, vector<64x256xf32>, vector<2x256xf32> -> vector<2x256xf32>
      %cst_113 = arith.constant dense<0.000000e+00> : vector<2x256xf32>
      %171 = tpu.matmul %arg18, %128, %cst_113 {dimension_numbers = #tpu.dot_dimension_numbers<[1], [0], [0], [1], [0, 0, 1, 1], [], []>} : vector<2x64xf32>, vector<64x256xf32>, vector<2x256xf32> -> vector<2x256xf32>
      %172 = arith.addf %170, %171 : vector<2x256xf32>
      %173 = vector.broadcast %129 : vector<1x256xf32> to vector<2x256xf32>
      %174 = arith.addf %172, %173 : vector<2x256xf32>
      %175 = vector.extract_strided_slice %174 {offsets = [0, 0], sizes = [2, 192], strides = [1, 1]} : vector<2x256xf32> to vector<2x192xf32>
      %cst_114 = arith.constant 5.000000e-01 : f32
      %176 = vector.broadcast %cst_114 : f32 to vector<2x192xf32>
      %177 = arith.mulf %176, %175 : vector<2x192xf32>
      %178 = math.tanh %177 : vector<2x192xf32>
      %cst_115 = arith.constant 5.000000e-01 : f32
      %179 = vector.broadcast %cst_115 : f32 to vector<2x192xf32>
      %180 = arith.mulf %179, %178 : vector<2x192xf32>
      %cst_116 = arith.constant 5.000000e-01 : f32
      %181 = vector.broadcast %cst_116 : f32 to vector<2x192xf32>
      %182 = arith.addf %180, %181 : vector<2x192xf32>
      %183 = vector.extract_strided_slice %174 {offsets = [0, 192], sizes = [2, 64], strides = [1, 1]} : vector<2x256xf32> to vector<2x64xf32>
      %184 = math.tanh %183 : vector<2x64xf32>
      %185 = vector.extract_strided_slice %182 {offsets = [0, 0], sizes = [2, 64], strides = [1, 1]} : vector<2x192xf32> to vector<2x64xf32>
      %186 = vector.extract_strided_slice %182 {offsets = [0, 64], sizes = [2, 64], strides = [1, 1]} : vector<2x192xf32> to vector<2x64xf32>
      %187 = vector.extract_strided_slice %182 {offsets = [0, 128], sizes = [2, 64], strides = [1, 1]} : vector<2x192xf32> to vector<2x64xf32>
      %188 = arith.mulf %186, %arg19 : vector<2x64xf32>
      %189 = arith.mulf %185, %184 : vector<2x64xf32>
      %190 = arith.addf %188, %189 : vector<2x64xf32>
      %191 = math.tanh %190 : vector<2x64xf32>
      %192 = arith.mulf %187, %191 : vector<2x64xf32>
      %193 = vector.extract_strided_slice %142 {offsets = [1, 0], sizes = [1, 256], strides = [1, 1]} : vector<8x256xf32> to vector<1x256xf32>
      %194 = vector.extract_strided_slice %146 {offsets = [1, 0], sizes = [1, 256], strides = [1, 1]} : vector<8x256xf32> to vector<1x256xf32>
      %195 = tpu.concatenate %193, %194 in 0 : vector<1x256xf32>, vector<1x256xf32> -> vector<2x256xf32>
      %cst_117 = arith.constant dense<0.000000e+00> : vector<2x256xf32>
      %196 = tpu.matmul %169, %126, %cst_117 {dimension_numbers = #tpu.dot_dimension_numbers<[1], [0], [0], [1], [0, 0, 1, 1], [], []>} : vector<2x64xf32>, vector<64x256xf32>, vector<2x256xf32> -> vector<2x256xf32>
      %197 = arith.addf %195, %196 : vector<2x256xf32>
      %198 = vector.extract_strided_slice %197 {offsets = [0, 0], sizes = [2, 192], strides = [1, 1]} : vector<2x256xf32> to vector<2x192xf32>
      %cst_118 = arith.constant 5.000000e-01 : f32
      %199 = vector.broadcast %cst_118 : f32 to vector<2x192xf32>
      %200 = arith.mulf %199, %198 : vector<2x192xf32>
      %201 = math.tanh %200 : vector<2x192xf32>
      %cst_119 = arith.constant 5.000000e-01 : f32
      %202 = vector.broadcast %cst_119 : f32 to vector<2x192xf32>
      %203 = arith.mulf %202, %201 : vector<2x192xf32>
      %cst_120 = arith.constant 5.000000e-01 : f32
      %204 = vector.broadcast %cst_120 : f32 to vector<2x192xf32>
      %205 = arith.addf %203, %204 : vector<2x192xf32>
      %206 = vector.extract_strided_slice %197 {offsets = [0, 192], sizes = [2, 64], strides = [1, 1]} : vector<2x256xf32> to vector<2x64xf32>
      %207 = math.tanh %206 : vector<2x64xf32>
      %208 = vector.extract_strided_slice %205 {offsets = [0, 0], sizes = [2, 64], strides = [1, 1]} : vector<2x192xf32> to vector<2x64xf32>
      %209 = vector.extract_strided_slice %205 {offsets = [0, 64], sizes = [2, 64], strides = [1, 1]} : vector<2x192xf32> to vector<2x64xf32>
      %210 = vector.extract_strided_slice %205 {offsets = [0, 128], sizes = [2, 64], strides = [1, 1]} : vector<2x192xf32> to vector<2x64xf32>
      %211 = arith.mulf %209, %167 : vector<2x64xf32>
      %212 = arith.mulf %208, %207 : vector<2x64xf32>
      %213 = arith.addf %211, %212 : vector<2x64xf32>
      %214 = math.tanh %213 : vector<2x64xf32>
      %215 = arith.mulf %210, %214 : vector<2x64xf32>
      %cst_121 = arith.constant dense<0.000000e+00> : vector<2x256xf32>
      %216 = tpu.matmul %215, %127, %cst_121 {dimension_numbers = #tpu.dot_dimension_numbers<[1], [0], [0], [1], [0, 0, 1, 1], [], []>} : vector<2x64xf32>, vector<64x256xf32>, vector<2x256xf32> -> vector<2x256xf32>
      %cst_122 = arith.constant dense<0.000000e+00> : vector<2x256xf32>
      %217 = tpu.matmul %192, %128, %cst_122 {dimension_numbers = #tpu.dot_dimension_numbers<[1], [0], [0], [1], [0, 0, 1, 1], [], []>} : vector<2x64xf32>, vector<64x256xf32>, vector<2x256xf32> -> vector<2x256xf32>
      %218 = arith.addf %216, %217 : vector<2x256xf32>
      %219 = vector.broadcast %129 : vector<1x256xf32> to vector<2x256xf32>
      %220 = arith.addf %218, %219 : vector<2x256xf32>
      %221 = vector.extract_strided_slice %220 {offsets = [0, 0], sizes = [2, 192], strides = [1, 1]} : vector<2x256xf32> to vector<2x192xf32>
      %cst_123 = arith.constant 5.000000e-01 : f32
      %222 = vector.broadcast %cst_123 : f32 to vector<2x192xf32>
      %223 = arith.mulf %222, %221 : vector<2x192xf32>
      %224 = math.tanh %223 : vector<2x192xf32>
      %cst_124 = arith.constant 5.000000e-01 : f32
      %225 = vector.broadcast %cst_124 : f32 to vector<2x192xf32>
      %226 = arith.mulf %225, %224 : vector<2x192xf32>
      %cst_125 = arith.constant 5.000000e-01 : f32
      %227 = vector.broadcast %cst_125 : f32 to vector<2x192xf32>
      %228 = arith.addf %226, %227 : vector<2x192xf32>
      %229 = vector.extract_strided_slice %220 {offsets = [0, 192], sizes = [2, 64], strides = [1, 1]} : vector<2x256xf32> to vector<2x64xf32>
      %230 = math.tanh %229 : vector<2x64xf32>
      %231 = vector.extract_strided_slice %228 {offsets = [0, 0], sizes = [2, 64], strides = [1, 1]} : vector<2x192xf32> to vector<2x64xf32>
      %232 = vector.extract_strided_slice %228 {offsets = [0, 64], sizes = [2, 64], strides = [1, 1]} : vector<2x192xf32> to vector<2x64xf32>
      %233 = vector.extract_strided_slice %228 {offsets = [0, 128], sizes = [2, 64], strides = [1, 1]} : vector<2x192xf32> to vector<2x64xf32>
      %234 = arith.mulf %232, %190 : vector<2x64xf32>
      %235 = arith.mulf %231, %230 : vector<2x64xf32>
      %236 = arith.addf %234, %235 : vector<2x64xf32>
      %237 = math.tanh %236 : vector<2x64xf32>
      %238 = arith.mulf %233, %237 : vector<2x64xf32>
      %239 = vector.extract_strided_slice %142 {offsets = [2, 0], sizes = [1, 256], strides = [1, 1]} : vector<8x256xf32> to vector<1x256xf32>
      %240 = vector.extract_strided_slice %146 {offsets = [2, 0], sizes = [1, 256], strides = [1, 1]} : vector<8x256xf32> to vector<1x256xf32>
      %241 = tpu.concatenate %239, %240 in 0 : vector<1x256xf32>, vector<1x256xf32> -> vector<2x256xf32>
      %cst_126 = arith.constant dense<0.000000e+00> : vector<2x256xf32>
      %242 = tpu.matmul %215, %126, %cst_126 {dimension_numbers = #tpu.dot_dimension_numbers<[1], [0], [0], [1], [0, 0, 1, 1], [], []>} : vector<2x64xf32>, vector<64x256xf32>, vector<2x256xf32> -> vector<2x256xf32>
      %243 = arith.addf %241, %242 : vector<2x256xf32>
      %244 = vector.extract_strided_slice %243 {offsets = [0, 0], sizes = [2, 192], strides = [1, 1]} : vector<2x256xf32> to vector<2x192xf32>
      %cst_127 = arith.constant 5.000000e-01 : f32
      %245 = vector.broadcast %cst_127 : f32 to vector<2x192xf32>
      %246 = arith.mulf %245, %244 : vector<2x192xf32>
      %247 = math.tanh %246 : vector<2x192xf32>
      %cst_128 = arith.constant 5.000000e-01 : f32
      %248 = vector.broadcast %cst_128 : f32 to vector<2x192xf32>
      %249 = arith.mulf %248, %247 : vector<2x192xf32>
      %cst_129 = arith.constant 5.000000e-01 : f32
      %250 = vector.broadcast %cst_129 : f32 to vector<2x192xf32>
      %251 = arith.addf %249, %250 : vector<2x192xf32>
      %252 = vector.extract_strided_slice %243 {offsets = [0, 192], sizes = [2, 64], strides = [1, 1]} : vector<2x256xf32> to vector<2x64xf32>
      %253 = math.tanh %252 : vector<2x64xf32>
      %254 = vector.extract_strided_slice %251 {offsets = [0, 0], sizes = [2, 64], strides = [1, 1]} : vector<2x192xf32> to vector<2x64xf32>
      %255 = vector.extract_strided_slice %251 {offsets = [0, 64], sizes = [2, 64], strides = [1, 1]} : vector<2x192xf32> to vector<2x64xf32>
      %256 = vector.extract_strided_slice %251 {offsets = [0, 128], sizes = [2, 64], strides = [1, 1]} : vector<2x192xf32> to vector<2x64xf32>
      %257 = arith.mulf %255, %213 : vector<2x64xf32>
      %258 = arith.mulf %254, %253 : vector<2x64xf32>
      %259 = arith.addf %257, %258 : vector<2x64xf32>
      %260 = math.tanh %259 : vector<2x64xf32>
      %261 = arith.mulf %256, %260 : vector<2x64xf32>
      %cst_130 = arith.constant dense<0.000000e+00> : vector<2x256xf32>
      %262 = tpu.matmul %261, %127, %cst_130 {dimension_numbers = #tpu.dot_dimension_numbers<[1], [0], [0], [1], [0, 0, 1, 1], [], []>} : vector<2x64xf32>, vector<64x256xf32>, vector<2x256xf32> -> vector<2x256xf32>
      %cst_131 = arith.constant dense<0.000000e+00> : vector<2x256xf32>
      %263 = tpu.matmul %238, %128, %cst_131 {dimension_numbers = #tpu.dot_dimension_numbers<[1], [0], [0], [1], [0, 0, 1, 1], [], []>} : vector<2x64xf32>, vector<64x256xf32>, vector<2x256xf32> -> vector<2x256xf32>
      %264 = arith.addf %262, %263 : vector<2x256xf32>
      %265 = vector.broadcast %129 : vector<1x256xf32> to vector<2x256xf32>
      %266 = arith.addf %264, %265 : vector<2x256xf32>
      %267 = vector.extract_strided_slice %266 {offsets = [0, 0], sizes = [2, 192], strides = [1, 1]} : vector<2x256xf32> to vector<2x192xf32>
      %cst_132 = arith.constant 5.000000e-01 : f32
      %268 = vector.broadcast %cst_132 : f32 to vector<2x192xf32>
      %269 = arith.mulf %268, %267 : vector<2x192xf32>
      %270 = math.tanh %269 : vector<2x192xf32>
      %cst_133 = arith.constant 5.000000e-01 : f32
      %271 = vector.broadcast %cst_133 : f32 to vector<2x192xf32>
      %272 = arith.mulf %271, %270 : vector<2x192xf32>
      %cst_134 = arith.constant 5.000000e-01 : f32
      %273 = vector.broadcast %cst_134 : f32 to vector<2x192xf32>
      %274 = arith.addf %272, %273 : vector<2x192xf32>
      %275 = vector.extract_strided_slice %266 {offsets = [0, 192], sizes = [2, 64], strides = [1, 1]} : vector<2x256xf32> to vector<2x64xf32>
      %276 = math.tanh %275 : vector<2x64xf32>
      %277 = vector.extract_strided_slice %274 {offsets = [0, 0], sizes = [2, 64], strides = [1, 1]} : vector<2x192xf32> to vector<2x64xf32>
      %278 = vector.extract_strided_slice %274 {offsets = [0, 64], sizes = [2, 64], strides = [1, 1]} : vector<2x192xf32> to vector<2x64xf32>
      %279 = vector.extract_strided_slice %274 {offsets = [0, 128], sizes = [2, 64], strides = [1, 1]} : vector<2x192xf32> to vector<2x64xf32>
      %280 = arith.mulf %278, %236 : vector<2x64xf32>
      %281 = arith.mulf %277, %276 : vector<2x64xf32>
      %282 = arith.addf %280, %281 : vector<2x64xf32>
      %283 = math.tanh %282 : vector<2x64xf32>
      %284 = arith.mulf %279, %283 : vector<2x64xf32>
      %285 = vector.extract_strided_slice %142 {offsets = [3, 0], sizes = [1, 256], strides = [1, 1]} : vector<8x256xf32> to vector<1x256xf32>
      %286 = vector.extract_strided_slice %146 {offsets = [3, 0], sizes = [1, 256], strides = [1, 1]} : vector<8x256xf32> to vector<1x256xf32>
      %287 = tpu.concatenate %285, %286 in 0 : vector<1x256xf32>, vector<1x256xf32> -> vector<2x256xf32>
      %cst_135 = arith.constant dense<0.000000e+00> : vector<2x256xf32>
      %288 = tpu.matmul %261, %126, %cst_135 {dimension_numbers = #tpu.dot_dimension_numbers<[1], [0], [0], [1], [0, 0, 1, 1], [], []>} : vector<2x64xf32>, vector<64x256xf32>, vector<2x256xf32> -> vector<2x256xf32>
      %289 = arith.addf %287, %288 : vector<2x256xf32>
      %290 = vector.extract_strided_slice %289 {offsets = [0, 0], sizes = [2, 192], strides = [1, 1]} : vector<2x256xf32> to vector<2x192xf32>
      %cst_136 = arith.constant 5.000000e-01 : f32
      %291 = vector.broadcast %cst_136 : f32 to vector<2x192xf32>
      %292 = arith.mulf %291, %290 : vector<2x192xf32>
      %293 = math.tanh %292 : vector<2x192xf32>
      %cst_137 = arith.constant 5.000000e-01 : f32
      %294 = vector.broadcast %cst_137 : f32 to vector<2x192xf32>
      %295 = arith.mulf %294, %293 : vector<2x192xf32>
      %cst_138 = arith.constant 5.000000e-01 : f32
      %296 = vector.broadcast %cst_138 : f32 to vector<2x192xf32>
      %297 = arith.addf %295, %296 : vector<2x192xf32>
      %298 = vector.extract_strided_slice %289 {offsets = [0, 192], sizes = [2, 64], strides = [1, 1]} : vector<2x256xf32> to vector<2x64xf32>
      %299 = math.tanh %298 : vector<2x64xf32>
      %300 = vector.extract_strided_slice %297 {offsets = [0, 0], sizes = [2, 64], strides = [1, 1]} : vector<2x192xf32> to vector<2x64xf32>
      %301 = vector.extract_strided_slice %297 {offsets = [0, 64], sizes = [2, 64], strides = [1, 1]} : vector<2x192xf32> to vector<2x64xf32>
      %302 = vector.extract_strided_slice %297 {offsets = [0, 128], sizes = [2, 64], strides = [1, 1]} : vector<2x192xf32> to vector<2x64xf32>
      %303 = arith.mulf %301, %259 : vector<2x64xf32>
      %304 = arith.mulf %300, %299 : vector<2x64xf32>
      %305 = arith.addf %303, %304 : vector<2x64xf32>
      %306 = math.tanh %305 : vector<2x64xf32>
      %307 = arith.mulf %302, %306 : vector<2x64xf32>
      %cst_139 = arith.constant dense<0.000000e+00> : vector<2x256xf32>
      %308 = tpu.matmul %307, %127, %cst_139 {dimension_numbers = #tpu.dot_dimension_numbers<[1], [0], [0], [1], [0, 0, 1, 1], [], []>} : vector<2x64xf32>, vector<64x256xf32>, vector<2x256xf32> -> vector<2x256xf32>
      %cst_140 = arith.constant dense<0.000000e+00> : vector<2x256xf32>
      %309 = tpu.matmul %284, %128, %cst_140 {dimension_numbers = #tpu.dot_dimension_numbers<[1], [0], [0], [1], [0, 0, 1, 1], [], []>} : vector<2x64xf32>, vector<64x256xf32>, vector<2x256xf32> -> vector<2x256xf32>
      %310 = arith.addf %308, %309 : vector<2x256xf32>
      %311 = vector.broadcast %129 : vector<1x256xf32> to vector<2x256xf32>
      %312 = arith.addf %310, %311 : vector<2x256xf32>
      %313 = vector.extract_strided_slice %312 {offsets = [0, 0], sizes = [2, 192], strides = [1, 1]} : vector<2x256xf32> to vector<2x192xf32>
      %cst_141 = arith.constant 5.000000e-01 : f32
      %314 = vector.broadcast %cst_141 : f32 to vector<2x192xf32>
      %315 = arith.mulf %314, %313 : vector<2x192xf32>
      %316 = math.tanh %315 : vector<2x192xf32>
      %cst_142 = arith.constant 5.000000e-01 : f32
      %317 = vector.broadcast %cst_142 : f32 to vector<2x192xf32>
      %318 = arith.mulf %317, %316 : vector<2x192xf32>
      %cst_143 = arith.constant 5.000000e-01 : f32
      %319 = vector.broadcast %cst_143 : f32 to vector<2x192xf32>
      %320 = arith.addf %318, %319 : vector<2x192xf32>
      %321 = vector.extract_strided_slice %312 {offsets = [0, 192], sizes = [2, 64], strides = [1, 1]} : vector<2x256xf32> to vector<2x64xf32>
      %322 = math.tanh %321 : vector<2x64xf32>
      %323 = vector.extract_strided_slice %320 {offsets = [0, 0], sizes = [2, 64], strides = [1, 1]} : vector<2x192xf32> to vector<2x64xf32>
      %324 = vector.extract_strided_slice %320 {offsets = [0, 64], sizes = [2, 64], strides = [1, 1]} : vector<2x192xf32> to vector<2x64xf32>
      %325 = vector.extract_strided_slice %320 {offsets = [0, 128], sizes = [2, 64], strides = [1, 1]} : vector<2x192xf32> to vector<2x64xf32>
      %326 = arith.mulf %324, %282 : vector<2x64xf32>
      %327 = arith.mulf %323, %322 : vector<2x64xf32>
      %328 = arith.addf %326, %327 : vector<2x64xf32>
      %329 = math.tanh %328 : vector<2x64xf32>
      %330 = arith.mulf %325, %329 : vector<2x64xf32>
      %331 = vector.extract_strided_slice %142 {offsets = [4, 0], sizes = [1, 256], strides = [1, 1]} : vector<8x256xf32> to vector<1x256xf32>
      %332 = vector.extract_strided_slice %146 {offsets = [4, 0], sizes = [1, 256], strides = [1, 1]} : vector<8x256xf32> to vector<1x256xf32>
      %333 = tpu.concatenate %331, %332 in 0 : vector<1x256xf32>, vector<1x256xf32> -> vector<2x256xf32>
      %cst_144 = arith.constant dense<0.000000e+00> : vector<2x256xf32>
      %334 = tpu.matmul %307, %126, %cst_144 {dimension_numbers = #tpu.dot_dimension_numbers<[1], [0], [0], [1], [0, 0, 1, 1], [], []>} : vector<2x64xf32>, vector<64x256xf32>, vector<2x256xf32> -> vector<2x256xf32>
      %335 = arith.addf %333, %334 : vector<2x256xf32>
      %336 = vector.extract_strided_slice %335 {offsets = [0, 0], sizes = [2, 192], strides = [1, 1]} : vector<2x256xf32> to vector<2x192xf32>
      %cst_145 = arith.constant 5.000000e-01 : f32
      %337 = vector.broadcast %cst_145 : f32 to vector<2x192xf32>
      %338 = arith.mulf %337, %336 : vector<2x192xf32>
      %339 = math.tanh %338 : vector<2x192xf32>
      %cst_146 = arith.constant 5.000000e-01 : f32
      %340 = vector.broadcast %cst_146 : f32 to vector<2x192xf32>
      %341 = arith.mulf %340, %339 : vector<2x192xf32>
      %cst_147 = arith.constant 5.000000e-01 : f32
      %342 = vector.broadcast %cst_147 : f32 to vector<2x192xf32>
      %343 = arith.addf %341, %342 : vector<2x192xf32>
      %344 = vector.extract_strided_slice %335 {offsets = [0, 192], sizes = [2, 64], strides = [1, 1]} : vector<2x256xf32> to vector<2x64xf32>
      %345 = math.tanh %344 : vector<2x64xf32>
      %346 = vector.extract_strided_slice %343 {offsets = [0, 0], sizes = [2, 64], strides = [1, 1]} : vector<2x192xf32> to vector<2x64xf32>
      %347 = vector.extract_strided_slice %343 {offsets = [0, 64], sizes = [2, 64], strides = [1, 1]} : vector<2x192xf32> to vector<2x64xf32>
      %348 = vector.extract_strided_slice %343 {offsets = [0, 128], sizes = [2, 64], strides = [1, 1]} : vector<2x192xf32> to vector<2x64xf32>
      %349 = arith.mulf %347, %305 : vector<2x64xf32>
      %350 = arith.mulf %346, %345 : vector<2x64xf32>
      %351 = arith.addf %349, %350 : vector<2x64xf32>
      %352 = math.tanh %351 : vector<2x64xf32>
      %353 = arith.mulf %348, %352 : vector<2x64xf32>
      %cst_148 = arith.constant dense<0.000000e+00> : vector<2x256xf32>
      %354 = tpu.matmul %353, %127, %cst_148 {dimension_numbers = #tpu.dot_dimension_numbers<[1], [0], [0], [1], [0, 0, 1, 1], [], []>} : vector<2x64xf32>, vector<64x256xf32>, vector<2x256xf32> -> vector<2x256xf32>
      %cst_149 = arith.constant dense<0.000000e+00> : vector<2x256xf32>
      %355 = tpu.matmul %330, %128, %cst_149 {dimension_numbers = #tpu.dot_dimension_numbers<[1], [0], [0], [1], [0, 0, 1, 1], [], []>} : vector<2x64xf32>, vector<64x256xf32>, vector<2x256xf32> -> vector<2x256xf32>
      %356 = arith.addf %354, %355 : vector<2x256xf32>
      %357 = vector.broadcast %129 : vector<1x256xf32> to vector<2x256xf32>
      %358 = arith.addf %356, %357 : vector<2x256xf32>
      %359 = vector.extract_strided_slice %358 {offsets = [0, 0], sizes = [2, 192], strides = [1, 1]} : vector<2x256xf32> to vector<2x192xf32>
      %cst_150 = arith.constant 5.000000e-01 : f32
      %360 = vector.broadcast %cst_150 : f32 to vector<2x192xf32>
      %361 = arith.mulf %360, %359 : vector<2x192xf32>
      %362 = math.tanh %361 : vector<2x192xf32>
      %cst_151 = arith.constant 5.000000e-01 : f32
      %363 = vector.broadcast %cst_151 : f32 to vector<2x192xf32>
      %364 = arith.mulf %363, %362 : vector<2x192xf32>
      %cst_152 = arith.constant 5.000000e-01 : f32
      %365 = vector.broadcast %cst_152 : f32 to vector<2x192xf32>
      %366 = arith.addf %364, %365 : vector<2x192xf32>
      %367 = vector.extract_strided_slice %358 {offsets = [0, 192], sizes = [2, 64], strides = [1, 1]} : vector<2x256xf32> to vector<2x64xf32>
      %368 = math.tanh %367 : vector<2x64xf32>
      %369 = vector.extract_strided_slice %366 {offsets = [0, 0], sizes = [2, 64], strides = [1, 1]} : vector<2x192xf32> to vector<2x64xf32>
      %370 = vector.extract_strided_slice %366 {offsets = [0, 64], sizes = [2, 64], strides = [1, 1]} : vector<2x192xf32> to vector<2x64xf32>
      %371 = vector.extract_strided_slice %366 {offsets = [0, 128], sizes = [2, 64], strides = [1, 1]} : vector<2x192xf32> to vector<2x64xf32>
      %372 = arith.mulf %370, %328 : vector<2x64xf32>
      %373 = arith.mulf %369, %368 : vector<2x64xf32>
      %374 = arith.addf %372, %373 : vector<2x64xf32>
      %375 = math.tanh %374 : vector<2x64xf32>
      %376 = arith.mulf %371, %375 : vector<2x64xf32>
      %377 = vector.extract_strided_slice %142 {offsets = [5, 0], sizes = [1, 256], strides = [1, 1]} : vector<8x256xf32> to vector<1x256xf32>
      %378 = vector.extract_strided_slice %146 {offsets = [5, 0], sizes = [1, 256], strides = [1, 1]} : vector<8x256xf32> to vector<1x256xf32>
      %379 = tpu.concatenate %377, %378 in 0 : vector<1x256xf32>, vector<1x256xf32> -> vector<2x256xf32>
      %cst_153 = arith.constant dense<0.000000e+00> : vector<2x256xf32>
      %380 = tpu.matmul %353, %126, %cst_153 {dimension_numbers = #tpu.dot_dimension_numbers<[1], [0], [0], [1], [0, 0, 1, 1], [], []>} : vector<2x64xf32>, vector<64x256xf32>, vector<2x256xf32> -> vector<2x256xf32>
      %381 = arith.addf %379, %380 : vector<2x256xf32>
      %382 = vector.extract_strided_slice %381 {offsets = [0, 0], sizes = [2, 192], strides = [1, 1]} : vector<2x256xf32> to vector<2x192xf32>
      %cst_154 = arith.constant 5.000000e-01 : f32
      %383 = vector.broadcast %cst_154 : f32 to vector<2x192xf32>
      %384 = arith.mulf %383, %382 : vector<2x192xf32>
      %385 = math.tanh %384 : vector<2x192xf32>
      %cst_155 = arith.constant 5.000000e-01 : f32
      %386 = vector.broadcast %cst_155 : f32 to vector<2x192xf32>
      %387 = arith.mulf %386, %385 : vector<2x192xf32>
      %cst_156 = arith.constant 5.000000e-01 : f32
      %388 = vector.broadcast %cst_156 : f32 to vector<2x192xf32>
      %389 = arith.addf %387, %388 : vector<2x192xf32>
      %390 = vector.extract_strided_slice %381 {offsets = [0, 192], sizes = [2, 64], strides = [1, 1]} : vector<2x256xf32> to vector<2x64xf32>
      %391 = math.tanh %390 : vector<2x64xf32>
      %392 = vector.extract_strided_slice %389 {offsets = [0, 0], sizes = [2, 64], strides = [1, 1]} : vector<2x192xf32> to vector<2x64xf32>
      %393 = vector.extract_strided_slice %389 {offsets = [0, 64], sizes = [2, 64], strides = [1, 1]} : vector<2x192xf32> to vector<2x64xf32>
      %394 = vector.extract_strided_slice %389 {offsets = [0, 128], sizes = [2, 64], strides = [1, 1]} : vector<2x192xf32> to vector<2x64xf32>
      %395 = arith.mulf %393, %351 : vector<2x64xf32>
      %396 = arith.mulf %392, %391 : vector<2x64xf32>
      %397 = arith.addf %395, %396 : vector<2x64xf32>
      %398 = math.tanh %397 : vector<2x64xf32>
      %399 = arith.mulf %394, %398 : vector<2x64xf32>
      %cst_157 = arith.constant dense<0.000000e+00> : vector<2x256xf32>
      %400 = tpu.matmul %399, %127, %cst_157 {dimension_numbers = #tpu.dot_dimension_numbers<[1], [0], [0], [1], [0, 0, 1, 1], [], []>} : vector<2x64xf32>, vector<64x256xf32>, vector<2x256xf32> -> vector<2x256xf32>
      %cst_158 = arith.constant dense<0.000000e+00> : vector<2x256xf32>
      %401 = tpu.matmul %376, %128, %cst_158 {dimension_numbers = #tpu.dot_dimension_numbers<[1], [0], [0], [1], [0, 0, 1, 1], [], []>} : vector<2x64xf32>, vector<64x256xf32>, vector<2x256xf32> -> vector<2x256xf32>
      %402 = arith.addf %400, %401 : vector<2x256xf32>
      %403 = vector.broadcast %129 : vector<1x256xf32> to vector<2x256xf32>
      %404 = arith.addf %402, %403 : vector<2x256xf32>
      %405 = vector.extract_strided_slice %404 {offsets = [0, 0], sizes = [2, 192], strides = [1, 1]} : vector<2x256xf32> to vector<2x192xf32>
      %cst_159 = arith.constant 5.000000e-01 : f32
      %406 = vector.broadcast %cst_159 : f32 to vector<2x192xf32>
      %407 = arith.mulf %406, %405 : vector<2x192xf32>
      %408 = math.tanh %407 : vector<2x192xf32>
      %cst_160 = arith.constant 5.000000e-01 : f32
      %409 = vector.broadcast %cst_160 : f32 to vector<2x192xf32>
      %410 = arith.mulf %409, %408 : vector<2x192xf32>
      %cst_161 = arith.constant 5.000000e-01 : f32
      %411 = vector.broadcast %cst_161 : f32 to vector<2x192xf32>
      %412 = arith.addf %410, %411 : vector<2x192xf32>
      %413 = vector.extract_strided_slice %404 {offsets = [0, 192], sizes = [2, 64], strides = [1, 1]} : vector<2x256xf32> to vector<2x64xf32>
      %414 = math.tanh %413 : vector<2x64xf32>
      %415 = vector.extract_strided_slice %412 {offsets = [0, 0], sizes = [2, 64], strides = [1, 1]} : vector<2x192xf32> to vector<2x64xf32>
      %416 = vector.extract_strided_slice %412 {offsets = [0, 64], sizes = [2, 64], strides = [1, 1]} : vector<2x192xf32> to vector<2x64xf32>
      %417 = vector.extract_strided_slice %412 {offsets = [0, 128], sizes = [2, 64], strides = [1, 1]} : vector<2x192xf32> to vector<2x64xf32>
      %418 = arith.mulf %416, %374 : vector<2x64xf32>
      %419 = arith.mulf %415, %414 : vector<2x64xf32>
      %420 = arith.addf %418, %419 : vector<2x64xf32>
      %421 = math.tanh %420 : vector<2x64xf32>
      %422 = arith.mulf %417, %421 : vector<2x64xf32>
      %423 = vector.extract_strided_slice %142 {offsets = [6, 0], sizes = [1, 256], strides = [1, 1]} : vector<8x256xf32> to vector<1x256xf32>
      %424 = vector.extract_strided_slice %146 {offsets = [6, 0], sizes = [1, 256], strides = [1, 1]} : vector<8x256xf32> to vector<1x256xf32>
      %425 = tpu.concatenate %423, %424 in 0 : vector<1x256xf32>, vector<1x256xf32> -> vector<2x256xf32>
      %cst_162 = arith.constant dense<0.000000e+00> : vector<2x256xf32>
      %426 = tpu.matmul %399, %126, %cst_162 {dimension_numbers = #tpu.dot_dimension_numbers<[1], [0], [0], [1], [0, 0, 1, 1], [], []>} : vector<2x64xf32>, vector<64x256xf32>, vector<2x256xf32> -> vector<2x256xf32>
      %427 = arith.addf %425, %426 : vector<2x256xf32>
      %428 = vector.extract_strided_slice %427 {offsets = [0, 0], sizes = [2, 192], strides = [1, 1]} : vector<2x256xf32> to vector<2x192xf32>
      %cst_163 = arith.constant 5.000000e-01 : f32
      %429 = vector.broadcast %cst_163 : f32 to vector<2x192xf32>
      %430 = arith.mulf %429, %428 : vector<2x192xf32>
      %431 = math.tanh %430 : vector<2x192xf32>
      %cst_164 = arith.constant 5.000000e-01 : f32
      %432 = vector.broadcast %cst_164 : f32 to vector<2x192xf32>
      %433 = arith.mulf %432, %431 : vector<2x192xf32>
      %cst_165 = arith.constant 5.000000e-01 : f32
      %434 = vector.broadcast %cst_165 : f32 to vector<2x192xf32>
      %435 = arith.addf %433, %434 : vector<2x192xf32>
      %436 = vector.extract_strided_slice %427 {offsets = [0, 192], sizes = [2, 64], strides = [1, 1]} : vector<2x256xf32> to vector<2x64xf32>
      %437 = math.tanh %436 : vector<2x64xf32>
      %438 = vector.extract_strided_slice %435 {offsets = [0, 0], sizes = [2, 64], strides = [1, 1]} : vector<2x192xf32> to vector<2x64xf32>
      %439 = vector.extract_strided_slice %435 {offsets = [0, 64], sizes = [2, 64], strides = [1, 1]} : vector<2x192xf32> to vector<2x64xf32>
      %440 = vector.extract_strided_slice %435 {offsets = [0, 128], sizes = [2, 64], strides = [1, 1]} : vector<2x192xf32> to vector<2x64xf32>
      %441 = arith.mulf %439, %397 : vector<2x64xf32>
      %442 = arith.mulf %438, %437 : vector<2x64xf32>
      %443 = arith.addf %441, %442 : vector<2x64xf32>
      %444 = math.tanh %443 : vector<2x64xf32>
      %445 = arith.mulf %440, %444 : vector<2x64xf32>
      %cst_166 = arith.constant dense<0.000000e+00> : vector<2x256xf32>
      %446 = tpu.matmul %445, %127, %cst_166 {dimension_numbers = #tpu.dot_dimension_numbers<[1], [0], [0], [1], [0, 0, 1, 1], [], []>} : vector<2x64xf32>, vector<64x256xf32>, vector<2x256xf32> -> vector<2x256xf32>
      %cst_167 = arith.constant dense<0.000000e+00> : vector<2x256xf32>
      %447 = tpu.matmul %422, %128, %cst_167 {dimension_numbers = #tpu.dot_dimension_numbers<[1], [0], [0], [1], [0, 0, 1, 1], [], []>} : vector<2x64xf32>, vector<64x256xf32>, vector<2x256xf32> -> vector<2x256xf32>
      %448 = arith.addf %446, %447 : vector<2x256xf32>
      %449 = vector.broadcast %129 : vector<1x256xf32> to vector<2x256xf32>
      %450 = arith.addf %448, %449 : vector<2x256xf32>
      %451 = vector.extract_strided_slice %450 {offsets = [0, 0], sizes = [2, 192], strides = [1, 1]} : vector<2x256xf32> to vector<2x192xf32>
      %cst_168 = arith.constant 5.000000e-01 : f32
      %452 = vector.broadcast %cst_168 : f32 to vector<2x192xf32>
      %453 = arith.mulf %452, %451 : vector<2x192xf32>
      %454 = math.tanh %453 : vector<2x192xf32>
      %cst_169 = arith.constant 5.000000e-01 : f32
      %455 = vector.broadcast %cst_169 : f32 to vector<2x192xf32>
      %456 = arith.mulf %455, %454 : vector<2x192xf32>
      %cst_170 = arith.constant 5.000000e-01 : f32
      %457 = vector.broadcast %cst_170 : f32 to vector<2x192xf32>
      %458 = arith.addf %456, %457 : vector<2x192xf32>
      %459 = vector.extract_strided_slice %450 {offsets = [0, 192], sizes = [2, 64], strides = [1, 1]} : vector<2x256xf32> to vector<2x64xf32>
      %460 = math.tanh %459 : vector<2x64xf32>
      %461 = vector.extract_strided_slice %458 {offsets = [0, 0], sizes = [2, 64], strides = [1, 1]} : vector<2x192xf32> to vector<2x64xf32>
      %462 = vector.extract_strided_slice %458 {offsets = [0, 64], sizes = [2, 64], strides = [1, 1]} : vector<2x192xf32> to vector<2x64xf32>
      %463 = vector.extract_strided_slice %458 {offsets = [0, 128], sizes = [2, 64], strides = [1, 1]} : vector<2x192xf32> to vector<2x64xf32>
      %464 = arith.mulf %462, %420 : vector<2x64xf32>
      %465 = arith.mulf %461, %460 : vector<2x64xf32>
      %466 = arith.addf %464, %465 : vector<2x64xf32>
      %467 = math.tanh %466 : vector<2x64xf32>
      %468 = arith.mulf %463, %467 : vector<2x64xf32>
      %469 = vector.extract_strided_slice %142 {offsets = [7, 0], sizes = [1, 256], strides = [1, 1]} : vector<8x256xf32> to vector<1x256xf32>
      %470 = vector.extract_strided_slice %146 {offsets = [7, 0], sizes = [1, 256], strides = [1, 1]} : vector<8x256xf32> to vector<1x256xf32>
      %471 = tpu.concatenate %469, %470 in 0 : vector<1x256xf32>, vector<1x256xf32> -> vector<2x256xf32>
      %cst_171 = arith.constant dense<0.000000e+00> : vector<2x256xf32>
      %472 = tpu.matmul %445, %126, %cst_171 {dimension_numbers = #tpu.dot_dimension_numbers<[1], [0], [0], [1], [0, 0, 1, 1], [], []>} : vector<2x64xf32>, vector<64x256xf32>, vector<2x256xf32> -> vector<2x256xf32>
      %473 = arith.addf %471, %472 : vector<2x256xf32>
      %474 = vector.extract_strided_slice %473 {offsets = [0, 0], sizes = [2, 192], strides = [1, 1]} : vector<2x256xf32> to vector<2x192xf32>
      %cst_172 = arith.constant 5.000000e-01 : f32
      %475 = vector.broadcast %cst_172 : f32 to vector<2x192xf32>
      %476 = arith.mulf %475, %474 : vector<2x192xf32>
      %477 = math.tanh %476 : vector<2x192xf32>
      %cst_173 = arith.constant 5.000000e-01 : f32
      %478 = vector.broadcast %cst_173 : f32 to vector<2x192xf32>
      %479 = arith.mulf %478, %477 : vector<2x192xf32>
      %cst_174 = arith.constant 5.000000e-01 : f32
      %480 = vector.broadcast %cst_174 : f32 to vector<2x192xf32>
      %481 = arith.addf %479, %480 : vector<2x192xf32>
      %482 = vector.extract_strided_slice %473 {offsets = [0, 192], sizes = [2, 64], strides = [1, 1]} : vector<2x256xf32> to vector<2x64xf32>
      %483 = math.tanh %482 : vector<2x64xf32>
      %484 = vector.extract_strided_slice %481 {offsets = [0, 0], sizes = [2, 64], strides = [1, 1]} : vector<2x192xf32> to vector<2x64xf32>
      %485 = vector.extract_strided_slice %481 {offsets = [0, 64], sizes = [2, 64], strides = [1, 1]} : vector<2x192xf32> to vector<2x64xf32>
      %486 = vector.extract_strided_slice %481 {offsets = [0, 128], sizes = [2, 64], strides = [1, 1]} : vector<2x192xf32> to vector<2x64xf32>
      %487 = arith.mulf %485, %443 : vector<2x64xf32>
      %488 = arith.mulf %484, %483 : vector<2x64xf32>
      %489 = arith.addf %487, %488 : vector<2x64xf32>
      %490 = math.tanh %489 : vector<2x64xf32>
      %491 = arith.mulf %486, %490 : vector<2x64xf32>
      %cst_175 = arith.constant dense<0.000000e+00> : vector<2x256xf32>
      %492 = tpu.matmul %491, %127, %cst_175 {dimension_numbers = #tpu.dot_dimension_numbers<[1], [0], [0], [1], [0, 0, 1, 1], [], []>} : vector<2x64xf32>, vector<64x256xf32>, vector<2x256xf32> -> vector<2x256xf32>
      %cst_176 = arith.constant dense<0.000000e+00> : vector<2x256xf32>
      %493 = tpu.matmul %468, %128, %cst_176 {dimension_numbers = #tpu.dot_dimension_numbers<[1], [0], [0], [1], [0, 0, 1, 1], [], []>} : vector<2x64xf32>, vector<64x256xf32>, vector<2x256xf32> -> vector<2x256xf32>
      %494 = arith.addf %492, %493 : vector<2x256xf32>
      %495 = vector.broadcast %129 : vector<1x256xf32> to vector<2x256xf32>
      %496 = arith.addf %494, %495 : vector<2x256xf32>
      %497 = vector.extract_strided_slice %496 {offsets = [0, 0], sizes = [2, 192], strides = [1, 1]} : vector<2x256xf32> to vector<2x192xf32>
      %cst_177 = arith.constant 5.000000e-01 : f32
      %498 = vector.broadcast %cst_177 : f32 to vector<2x192xf32>
      %499 = arith.mulf %498, %497 : vector<2x192xf32>
      %500 = math.tanh %499 : vector<2x192xf32>
      %cst_178 = arith.constant 5.000000e-01 : f32
      %501 = vector.broadcast %cst_178 : f32 to vector<2x192xf32>
      %502 = arith.mulf %501, %500 : vector<2x192xf32>
      %cst_179 = arith.constant 5.000000e-01 : f32
      %503 = vector.broadcast %cst_179 : f32 to vector<2x192xf32>
      %504 = arith.addf %502, %503 : vector<2x192xf32>
      %505 = vector.extract_strided_slice %496 {offsets = [0, 192], sizes = [2, 64], strides = [1, 1]} : vector<2x256xf32> to vector<2x64xf32>
      %506 = math.tanh %505 : vector<2x64xf32>
      %507 = vector.extract_strided_slice %504 {offsets = [0, 0], sizes = [2, 64], strides = [1, 1]} : vector<2x192xf32> to vector<2x64xf32>
      %508 = vector.extract_strided_slice %504 {offsets = [0, 64], sizes = [2, 64], strides = [1, 1]} : vector<2x192xf32> to vector<2x64xf32>
      %509 = vector.extract_strided_slice %504 {offsets = [0, 128], sizes = [2, 64], strides = [1, 1]} : vector<2x192xf32> to vector<2x64xf32>
      %510 = arith.mulf %508, %466 : vector<2x64xf32>
      %511 = arith.mulf %507, %506 : vector<2x64xf32>
      %512 = arith.addf %510, %511 : vector<2x64xf32>
      %513 = math.tanh %512 : vector<2x64xf32>
      %514 = arith.mulf %509, %513 : vector<2x64xf32>
      scf.yield %491, %489, %514, %512 : vector<2x64xf32>, vector<2x64xf32>, vector<2x64xf32>, vector<2x64xf32>
    }
    %c8_i32_94 = arith.constant 8 : i32
    %c0_95 = arith.constant 0 : index
    %c0_96 = arith.constant 0 : index
    %133 = vector.load %arg11[%c0_95, %c0_96] : memref<64x6xf32, #tpu.memory_space<vmem>>, vector<64x6xf32>
    %cst_97 = arith.constant dense<0.000000e+00> : vector<2x6xf32>
    %134 = tpu.matmul %132#2, %133, %cst_97 {dimension_numbers = #tpu.dot_dimension_numbers<[1], [0], [0], [1], [0, 0, 1, 1], [], []>} : vector<2x64xf32>, vector<64x6xf32>, vector<2x6xf32> -> vector<2x6xf32>
    %c0_98 = arith.constant 0 : index
    %c0_99 = arith.constant 0 : index
    %135 = vector.load %arg12[%c0_98, %c0_99] : memref<1x6xf32, #tpu.memory_space<vmem>>, vector<1x6xf32>
    %136 = vector.broadcast %135 : vector<1x6xf32> to vector<2x6xf32>
    %137 = arith.addf %134, %136 : vector<2x6xf32>
    %c0_100 = arith.constant 0 : index
    %c0_101 = arith.constant 0 : index
    %138 = vector.load %arg13[%c0_100, %c0_101] : memref<2x6xf32, #tpu.memory_space<vmem>>, vector<2x6xf32>
    tpu.vector_store %arg13[%c0_100, %c0_101], %137 {strides = array<i32>} : memref<2x6xf32, #tpu.memory_space<vmem>>, vector<2x6xf32>,
    return
  }
}

</mosaic_0001>

<bundles_post_ra>
// kernel: mrm3pnet_forward.1
= control target key start
LH: loop header
LB: loop body
LE: loop exit
PB: predicated region body
PF: predicated region fallthrough
CT: control target
= control target key end

     0   :  { %18 = vsyncpa [#allocation4], 0  ;;  %v10808_v6 = vmov 0.0   ;;  %vm163_vm0 = vcmask 171008   ;;  %vm188_vm1 = vcmask 1044480   ;;  %s7961_s15 = smov 127   ;;  %s10794_s0 = inlined_call_operand.vmem [shape: f32[2,21,302], index: 0, kind: input, shape index: {}]   ;;  %s10795_s1 = inlined_call_operand.vmem [shape: f32[64,21], index: 1, kind: input, shape index: {}]   ;;  %s10796_s2 = inlined_call_operand.vmem [shape: f32[64,302], index: 2, kind: input, shape index: {}]   ;;  %s10797_s3 = inlined_call_operand.vmem [shape: f32[3,64,64], index: 3, kind: input, shape index: {}]   ;;  %s10798_s4 = inlined_call_operand.vmem [shape: f32[64,1], index: 4, kind: input, shape index: {}]   ;;  %s10799_s5 = inlined_call_operand.vmem [shape: f32[300,256], index: 5, kind: input, shape index: {}]   ;;  %s10800_s6 = inlined_call_operand.vmem [shape: f32[64,256], index: 6, kind: input, shape index: {}]   ;;  %s10801_s7 = inlined_call_operand.vmem [shape: f32[1,256], index: 7, kind: input, shape index: {}]   ;;  %s10802_s8 = inlined_call_operand.vmem [shape: f32[64,256], index: 8, kind: input, shape index: {}]   ;;  %s10803_s9 = inlined_call_operand.vmem [shape: f32[64,256], index: 9, kind: input, shape index: {}]   ;;  %s10804_s10 = inlined_call_operand.vmem [shape: f32[1,256], index: 10, kind: input, shape index: {}]   ;;  %s10805_s11 = inlined_call_operand.vmem [shape: f32[64,6], index: 11, kind: input, shape index: {}]   ;;  %s10806_s12 = inlined_call_operand.vmem [shape: f32[1,6], index: 12, kind: input, shape index: {}]   ;;  %s10807_s13 = inlined_call_operand.hbm [shape: f32[2,6], index: 13, kind: output, shape index: {}]  }
   0x1   :  { %v131_v0 = vld [vmem:[%s10794_s0 + $0x8] sm:$0xff]  ;;  %v134_v1 = vld [vmem:[%s10794_s0 + $0x20] sm:$0xff]  ;;  %v132_v3 = vld [vmem:[%s10794_s0 + $0x10] sm:$0xff]  ;;  %262 = vmatprep.mubr.f32.mxu0 %v10808_v6  ;;  %vm570_vm2 = vcmask 523264   ;;  %s7962_s26 = smov 126   ;;  %vm529_vm3 = vcmask 1039360  }
   0x2   :  { %v6532_v2 = vpack.c.bf16 %v134_v1, %v131_v0  ;;  %v135_v4 = vld [vmem:[%s10794_s0 + $0x28] sm:$0xff]  ;;  %v130_v5 = vld [vmem:[%s10794_s0] sm:$0xff]  ;;  %v133_v8 = vld [vmem:[%s10794_s0 + $0x18] sm:$0xff]  ;;  %vm1112_vm4 = vcmask 1031168   ;;  %vm1551_vm5 = vcmask 1043456   ;;  %vm7964_vm6 = vmmov 1  }
   0x3   :  { %v6536_v7 = vpack.c.bf16 %v135_v4, %v132_v3  ;;  %v6534_v9 = vpack.c.bf16 %v133_v8, %v130_v5  ;;  %v137_v10 = vld [vmem:[%s10794_s0 + $0x38] sm:$0x1f]  ;;  %v138_v11 = vld [vmem:[%s10794_s0 + $0x40] sm:$0x1f]  ;;  %v136_v13 = vld [vmem:[%s10794_s0 + $0x30] sm:$0x1f] }
   0x4   :  { %6533 = vmatprep.subr.bf16.mxu0 %v6532_v2  ;;  %v122_v12 = vld [vmem:[%s10795_s1] sm:$0xff]  ;;  %v123_v14 = vld [vmem:[%s10795_s1 + $0x8] sm:$0xff]  ;;  %v124_v15 = vld [vmem:[%s10795_s1 + $0x10] sm:$0xff]  ;;  %vm1526_vm8 = vcmask 359424  }
   0x5   :  { %6537 = vmatprep.subr.bf16.mxu1 %v6536_v7  ;;  %6315 = vmatprep.mubr.msk.f32.mxu1 %vm163_vm0, %v122_v12  ;;  %v125_v16 = vld [vmem:[%s10795_s1 + $0x18] sm:$0xff]  ;;  %v126_v17 = vld [vmem:[%s10795_s1 + $0x20] sm:$0xff]  ;;  %v127_v18 = vld [vmem:[%s10795_s1 + $0x28] sm:$0xff] }
   0x6   :  { %6535 = vmatpush1.bf16.msra.mxu0 %v6534_v9  ;;  %6539 = vmatpush3.bf16.msra.mxu1 %v6536_v7  ;;  %v128_v19 = vld [vmem:[%s10795_s1 + $0x30] sm:$0xff]  ;;  %v129_v20 = vld [vmem:[%s10795_s1 + $0x38] sm:$0xff]  ;;  %v144_v21 = vld [vmem:[%s10796_s2 + $0x28] sm:$0xff] }
   0x7   :  { %5955 = vmatprep.subr.msk.mxu0 %vm188_vm1, %v137_v10  ;;  %6313 = vmatprep.subr.msk.mxu1 %vm188_vm1, %v138_v11  ;;  %v140_v22 = vld [vmem:[%s10796_s2 + $0x8] sm:$0xff]  ;;  %v141_v23 = vld [vmem:[%s10796_s2 + $0x10] sm:$0xff]  ;;  %v139_v24 = vld [vmem:[%s10796_s2] sm:$0xff] }
   0x8   :  { %v142_v32 = vld [vmem:[%s10796_s2 + $0x18] sm:$0xff]  ;;  %v143_v35 = vld [vmem:[%s10796_s2 + $0x20] sm:$0xff]  ;;  %v156_v49 = vld [vmem:[%s10796_s2 + $0x88] sm:$0xff] }
   0x9   :  { %v150_v33 = vld [vmem:[%s10796_s2 + $0x58] sm:$0xff]  ;;  %v147_v36 = vld [vmem:[%s10796_s2 + $0x40] sm:$0xff]  ;;  %v153_v55 = vld [vmem:[%s10796_s2 + $0x70] sm:$0xff] }
   0xa   :  { %5956 = vmatpush1.msk.msra.mxu0 %vm188_vm1, %v136_v13  ;;  %6314 = vmatpush3.msk.msra.mxu1 %vm188_vm1, %v138_v11  ;;  %v146_v54 = vld [vmem:[%s10796_s2 + $0x38] sm:$0xff]  ;;  %v145_v58 = vld [vmem:[%s10796_s2 + $0x30] sm:$0xff]  ;;  %v148_v4 = vld [vmem:[%s10796_s2 + $0x48] sm:$0xff] }
   0xb   :  { %5957 = vmatmul.mubr.msk.f32.vlgmr.msra.gmra.mrb[0].mxu0 %vm163_vm0, %v122_v12  ;;  %6316 = vmatmul.mubr.msk.f32.vlgmr.msra.gmra.mrb[0].mxu1 %vm163_vm0, %v123_v14  ;;  %v162_v8 = vld [vmem:[%s10796_s2 + $0xb8] sm:$0xff]  ;;  %v149_v11 = vld [vmem:[%s10796_s2 + $0x50] sm:$0xff]  ;;  %v159_v13 = vld [vmem:[%s10796_s2 + $0xa0] sm:$0xff] }
   0xc   :  { %268 = vmatprep.mubr.f32.mxu0 %v10808_v6  ;;  %6318 = vmatprep.mubr.msk.f32.mxu1 %vm163_vm0, %v124_v15  ;;  %vm8864_vm7 = vmpackc.low %vm1551_vm5, %vm7964_vm6 }
   0xf   :  { %5958 = vmatmul.mubr.msk.f32.gmra.mrb[2].mxu0 %vm163_vm0, %v123_v14  ;;  %6319 = vmatmul.mubr.msk.f32.gmra.mrb[2].mxu1 %vm163_vm0, %v125_v16 }
  0x10   :  { %274 = vmatprep.mubr.f32.mxu0 %v10808_v6  ;;  %6321 = vmatprep.mubr.msk.f32.mxu1 %vm163_vm0, %v126_v17 }
  0x13   :  { %5959 = vmatmul.mubr.msk.f32.gmra.mrb[4].mxu0 %vm163_vm0, %v124_v15  ;;  %6322 = vmatmul.mubr.msk.f32.gmra.mrb[4].mxu1 %vm163_vm0, %v127_v18 }
  0x14   :  { %280 = vmatprep.mubr.f32.mxu0 %v10808_v6  ;;  %6324 = vmatprep.mubr.msk.f32.mxu1 %vm163_vm0, %v128_v19 }
  0x17   :  { %5960 = vmatmul.mubr.msk.f32.gmra.mrb[6].mxu0 %vm163_vm0, %v125_v16  ;;  %6325 = vmatmul.mubr.msk.f32.gmra.mrb[6].mxu1 %vm163_vm0, %v129_v20 }
  0x18   :  { %286 = vmatprep.mubr.f32.mxu0 %v10808_v6  ;;  %659 = vmatprep.mubr.f32.mxu1 %v10808_v6 }
  0x1b   :  { %5961 = vmatmul.mubr.msk.f32.gmra.mrb[8].mxu0 %vm163_vm0, %v126_v17 }
  0x1c   :  { %292 = vmatprep.mubr.f32.mxu0 %v10808_v6 }
  0x1f   :  { %5962 = vmatmul.mubr.msk.f32.gmra.mrb[10].mxu0 %vm163_vm0, %v127_v18 }
  0x20   :  { %298 = vmatprep.mubr.f32.mxu0 %v10808_v6 }
  0x23   :  { %5963 = vmatmul.mubr.msk.f32.gmra.mrb[12].mxu0 %vm163_vm0, %v128_v19 }
  0x24   :  { %304 = vmatprep.mubr.f32.mxu0 %v10808_v6 }
  0x27   :  { %5964 = vmatmul.mubr.msk.f32.gmra.mrb[14].mxu0 %vm163_vm0, %v129_v20 }
  0xde   :  { %v264_v25 = vpop.f32.mrb[0].mxu0  ;;  %v6317_v26 = vpop.f32.mrb[0].mxu1 }
  0xdf   :  { %v383_v27 = vadd.f32 %v6317_v26, %v144_v21  ;;  %v266_v28 = vpop.f32.mrb[1].mxu0  ;;  %v377_v29 = vpop.f32.mrb[1].mxu1  ;;  %v265_v34 = vadd.f32 %v264_v25, %v139_v24 }
  0xe0   :  { %v267_v30 = vadd.f32 %v266_v28, %v140_v22  ;;  %v378_v31 = vadd.f32 %v377_v29, %v141_v23 }
  0xe1   :  { %v8144_v37 = vmax.f32 %v383_v27, 0.0  ;;  %v416_v51 = vmax.f32 %v265_v34, 0.0 }
  0xe2   :  { %v8146_v38 = vmax.f32 %v267_v30, 0.0  ;;  %v8148_v39 = vmax.f32 %v378_v31, 0.0  ;;  %v270_v40 = vpop.f32.mrb[2].mxu0  ;;  %v6320_v41 = vpop.f32.mrb[2].mxu1  ;;  %v152_v31 = vld [vmem:[%s10796_s2 + $0x68] sm:$0xff] }
  0xe3   :  { %v271_v42 = vadd.f32 %v270_v40, %v142_v32  ;;  %v272_v43 = vpop.f32.mrb[3].mxu0  ;;  %v393_v44 = vadd.f32 %v6320_v41, %v150_v33  ;;  %v387_v45 = vpop.f32.mrb[3].mxu1 }
  0xe4   :  { %v273_v46 = vadd.f32 %v272_v43, %v143_v35  ;;  %v7522_v47 = vpack.i.bf16 %v8148_v39, %v8146_v38  ;;  %v388_v48 = vadd.f32 %v387_v45, %v147_v36  ;;  %v7582_v50 = vpack.i.bf16 %v8144_v37, %v8148_v39  ;;  %v151_v35 = vld [vmem:[%s10796_s2 + $0x60] sm:$0xff]  ;;  %v154_v45 = vld [vmem:[%s10796_s2 + $0x78] sm:$0xff] }
  0xe5   :  { %v419_v52 = vmax.f32 %v271_v42, 0.0  ;;  %v8157_v53 = vmax.f32 %v393_v44, 0.0  ;;  %v8167_v56 = vpack.c.bf16 %v8144_v37, %v8148_v39  ;;  %v1419_v39 = vld [vmem:[%s10798_s4] sm:$0xff] }
  0xe6   :  { %v8169_v57 = vmax.f32 %v273_v46, 0.0  ;;  %v276_v59 = vpop.f32.mrb[4].mxu0  ;;  %7523 = vrot.lane.b32.xlu0 %v7522_v47, %s7961_s15  ;;  %v6323_v60 = vpop.f32.mrb[4].mxu1  ;;  %v8177_v63 = vmax.f32 %v388_v48, 0.0 }
  0xe7   :  { %v8175_v61 = vpack.c.bf16 %v419_v52, %v416_v51  ;;  %v278_v62 = vpop.f32.mrb[5].mxu0  ;;  %v8179_v0 = vpack.i.bf16 %v419_v52, %v416_v51  ;;  %v403_v1 = vadd.f32 %v6323_v60, %v156_v49  ;;  %v397_v2 = vpop.f32.mrb[5].mxu1  ;;  %v277_v10 = vadd.f32 %v276_v59, %v145_v58  ;;  %v155_v51 = vld [vmem:[%s10796_s2 + $0x80] sm:$0xff] }
  0xe8   :  { %v279_v3 = vadd.f32 %v278_v62, %v146_v54  ;;  %v7532_v5 = vpack.i.bf16 %v8144_v37, %v8169_v57  ;;  %v398_v7 = vadd.f32 %v397_v2, %v153_v55  ;;  %v7587_v9 = vpack.i.bf16 %v8169_v57, %v8146_v38 }
  0xe9   :  { %7528 = vrot.lane.b32.xlu1 %v8179_v0, %s7961_s15  ;;  %v8196_v12 = vmax.f32 %v403_v1, 0.0  ;;  %v7597_v14 = vpack.i.bf16 %v8157_v53, %v8177_v63  ;;  %v6572_v19 = vpack.c.bf16 %v8169_v57, %v8146_v38  ;;  %v8212_v20 = vpack.c.bf16 %v8157_v53, %v8177_v63  ;;  %v5978_v38 = vld [vmem:[%s10797_s3 + $0x60] sm:$0xff]  ;;  %v5979_v57 = vld [vmem:[%s10797_s3 + $0x68] sm:$0xff] }
  0xea   :  { %v8203_v15 = vmax.f32 %v279_v3, 0.0  ;;  %v282_v16 = vpop.f32.mrb[6].mxu0  ;;  %7533 = vrot.lane.b32.xlu0 %v7532_v5, %s7961_s15  ;;  %v8206_v17 = vmax.f32 %v398_v7, 0.0  ;;  %v6326_v18 = vpop.f32.mrb[6].mxu1  ;;  %v422_v29 = vmax.f32 %v277_v10, 0.0  ;;  %v157_v7 = vld [vmem:[%s10796_s2 + $0x90] sm:$0xff] }
  0xeb   :  { %v283_v21 = vadd.f32 %v282_v16, %v148_v4  ;;  %v284_v22 = vpop.f32.mrb[7].mxu0  ;;  %v413_v23 = vadd.f32 %v6326_v18, %v162_v8  ;;  %v407_v24 = vpop.f32.mrb[7].mxu1  ;;  %v158_v4 = vld [vmem:[%s10796_s2 + $0x98] sm:$0xff]  ;;  %v160_v18 = vld [vmem:[%s10796_s2 + $0xa8] sm:$0xff] }
  0xec   :  { %v285_v25 = vadd.f32 %v284_v22, %v149_v11  ;;  %v7537_v26 = vpack.i.bf16 %v8177_v63, %v8203_v15  ;;  %v408_v27 = vadd.f32 %v407_v24, %v159_v13  ;;  %v7612_v28 = vpack.i.bf16 %v8196_v12, %v8206_v17 }
  0xed   :  { %v425_v30 = vmax.f32 %v283_v21, 0.0  ;;  %v8221_v32 = vmax.f32 %v413_v23, 0.0  ;;  %v8225_v33 = vpack.c.bf16 %v8196_v12, %v8206_v17 }
  0xee   :  { %v8227_v34 = vmax.f32 %v285_v25, 0.0  ;;  %v288_v36 = vpop.f32.mrb[8].mxu0  ;;  %7538 = vrot.lane.b32.xlu1 %v7537_v26, %s7961_s15  ;;  %v8233_v40 = vmax.f32 %v408_v27, 0.0  ;;  %v161_v25 = vld [vmem:[%s10796_s2 + $0xb0] sm:$0xff] }
  0xef   :  { %v8235_v41 = vpack.c.bf16 %v425_v30, %v422_v29  ;;  %v290_v42 = vpop.f32.mrb[9].mxu0  ;;  %v7542_v43 = vpack.i.bf16 %v425_v30, %v422_v29  ;;  %v289_v49 = vadd.f32 %v288_v36, %v151_v35 }
  0xf0   :  { %v291_v44 = vadd.f32 %v290_v42, %v152_v31  ;;  %v7547_v46 = vpack.i.bf16 %v8157_v53, %v8227_v34  ;;  %v7602_v47 = vpack.i.bf16 %v8227_v34, %v8203_v15  ;;  %v7627_v48 = vpack.i.bf16 %v8221_v32, %v8233_v40  ;;  %v8291_v31 = vld [vmem:[%s10797_s3 + $0x40] sm:$0xff] }
  0xf1   :  { %v6576_v52 = vpack.c.bf16 %v8227_v34, %v8203_v15  ;;  %v8253_v54 = vpack.c.bf16 %v8221_v32, %v8233_v40  ;;  %v428_v2 = vmax.f32 %v289_v49, 0.0  ;;  %6343 = vmatprep.mubr.msk.f32.mxu0 %vm570_vm2, %v8291_v31 }
  0xf2   :  { %v8255_v55 = vmax.f32 %v291_v44, 0.0  ;;  %v294_v58 = vpop.f32.mrb[10].mxu0  ;;  %7548 = vrot.lane.b32.xlu0 %v7547_v46, %s7961_s15  ;;  %7543 = vrot.lane.b32.xlu1 %v7542_v43, %s7961_s15 }
  0xf3   :  { %v295_v59 = vadd.f32 %v294_v58, %v154_v45  ;;  %v296_v60 = vpop.f32.mrb[11].mxu0 }
  0xf4   :  { %v297_v62 = vadd.f32 %v296_v60, %v155_v51  ;;  %v7552_v1 = vpack.i.bf16 %v8206_v17, %v8255_v55 }
  0xf5   :  { %v431_v3 = vmax.f32 %v295_v59, 0.0 }
  0xf6   :  { %v8264_v5 = vmax.f32 %v297_v62, 0.0  ;;  %v300_v8 = vpop.f32.mrb[12].mxu0  ;;  %7553 = vrot.lane.b32.xlu0 %v7552_v1, %s7961_s15 }
  0xf7   :  { %v8270_v10 = vpack.c.bf16 %v431_v3, %v428_v2  ;;  %v302_v11 = vpop.f32.mrb[13].mxu0  ;;  %v7557_v13 = vpack.i.bf16 %v431_v3, %v428_v2  ;;  %v301_v24 = vadd.f32 %v300_v8, %v157_v7  ;;  %v1424_v7 = vld [vmem:[%s10798_s4 + $0x28] sm:$0xff]  ;;  %v1423_v8 = vld [vmem:[%s10798_s4 + $0x20] sm:$0xff] }
  0xf8   :  { %v303_v16 = vadd.f32 %v302_v11, %v158_v4  ;;  %v7562_v21 = vpack.i.bf16 %v8196_v12, %v8264_v5  ;;  %v7617_v22 = vpack.i.bf16 %v8264_v5, %v8255_v55  ;;  %v6580_v23 = vpack.c.bf16 %v8264_v5, %v8255_v55 }
  0xf9   :  { %v434_v42 = vmax.f32 %v301_v24, 0.0 }
  0xfa   :  { %v8284_v26 = vmax.f32 %v303_v16, 0.0  ;;  %v306_v27 = vpop.f32.mrb[14].mxu0  ;;  %7558 = vrot.lane.b32.xlu0 %v7557_v13, %s7961_s15  ;;  %7563 = vrot.lane.b32.xlu1 %v7562_v21, %s7961_s15 }
  0xfb   :  { %v307_v29 = vadd.f32 %v306_v27, %v160_v18  ;;  %v308_v30 = vpop.f32.mrb[15].mxu0  ;;  %v1426_v27 = vld [vmem:[%s10798_s4 + $0x38] sm:$0xff] }
  0xfc   :  { %v309_v35 = vadd.f32 %v308_v30, %v161_v25  ;;  %v7567_v36 = vpack.i.bf16 %v8233_v40, %v8284_v26 }
  0xfd   :  { %v437_v44 = vmax.f32 %v307_v29, 0.0  ;;  %v1425_v29 = vld [vmem:[%s10798_s4 + $0x30] sm:$0xff] }
  0xfe   :  { %v8297_v45 = vmax.f32 %v309_v35, 0.0  ;;  %7568 = vrot.lane.b32.xlu1 %v7567_v36, %s7961_s15 }
  0xff   :  { %v8300_v46 = vpack.c.bf16 %v437_v44, %v434_v42  ;;  %v7577_v49 = vpack.i.bf16 %v437_v44, %v434_v42 }
 0x100   :  { %v7572_v51 = vpack.i.bf16 %v8221_v32, %v8297_v45  ;;  %v7632_v58 = vpack.i.bf16 %v8297_v45, %v8284_v26  ;;  %v6584_v40 = vpack.c.bf16 %v8297_v45, %v8284_v26  ;;  %v8469_v45 = vld [vmem:[%s10797_s3 + $0x8] sm:$0xff] }
 0x102   :  { %7573 = vrot.lane.b32.xlu0 %v7572_v51, %s7961_s15  ;;  %7578 = vrot.lane.b32.xlu1 %v7577_v49, %s7961_s15 }
 0x106   :  { %7583 = vrot.lane.b32.xlu0 %v7582_v50, %s7962_s26  ;;  %7588 = vrot.lane.b32.xlu1 %v7587_v9, %s7962_s26  ;;  %v1420_v50 = vld [vmem:[%s10798_s4 + $0x8] sm:$0xff]  ;;  %v7963_v9 = vmov 0  }
 0x107   :  { %7643 = vset.pattern.permute.xlu1 %v7963_v9  ;;  %7642 = vset.pattern.permute.xlu0 %v7963_v9 }
 0x10a   :  { %7593 = vrot.lane.b32.xlu0 %v8179_v0, %s7962_s26  ;;  %7598 = vrot.lane.b32.xlu1 %v7597_v14, %s7962_s26 }
 0x10e   :  { %7603 = vrot.lane.b32.xlu0 %v7602_v47, %s7962_s26  ;;  %7608 = vrot.lane.b32.xlu1 %v7542_v43, %s7962_s26  ;;  %v1422_v43 = vld [vmem:[%s10798_s4 + $0x18] sm:$0xff]  ;;  %v1421_v47 = vld [vmem:[%s10798_s4 + $0x10] sm:$0xff] }
 0x112   :  { %7613 = vrot.lane.b32.xlu0 %v7612_v28, %s7962_s26  ;;  %7618 = vrot.lane.b32.xlu1 %v7617_v22, %s7962_s26 }
 0x116   :  { %7623 = vrot.lane.b32.xlu0 %v7557_v13, %s7962_s26  ;;  %7628 = vrot.lane.b32.xlu1 %v7627_v48, %s7962_s26 }
 0x11a   :  { %7633 = vrot.lane.b32.xlu0 %v7632_v58, %s7962_s26  ;;  %7638 = vrot.lane.b32.xlu1 %v7577_v49, %s7962_s26 }
 0x11e   :  { %1429 = vperm.xlu0 %7642, %v1419_v39   ;;  %1434 = vperm.xlu1 %7643, %v1420_v50  }
 0x122   :  { %1444 = vperm.xlu0 %7642, %v1422_v43   ;;  %1439 = vperm.xlu1 %7643, %v1421_v47  }
 0x126   :  { %1454 = vperm.xlu0 %7642, %v1424_v7   ;;  %1449 = vperm.xlu1 %7643, %v1423_v8  }
 0x12a   :  { %1464 = vperm.xlu0 %7642, %v1426_v27   ;;  %1459 = vperm.xlu1 %7643, %v1425_v29   ;;  %v5975_v29 = vld [vmem:[%s10797_s3 + $0x48] sm:$0xff] }
 0x158   :  { %v7524_v37 = vpop.permute.xlu0 %7523 }
 0x159   :  { %v7526_v53 = vunpack.i.h.bf16 %v7524_v37  ;;  %v7525_v63 = vunpack.i.l.bf16 %v7524_v37 }
 0x15b   :  { %v7529_v0 = vpop.permute.xlu1 %7528  ;;  %v531_v62 = vsel %vm529_vm3, %v7525_v63, %v7526_v53 }
 0x15c   :  { %v7531_v12 = vunpack.i.h.bf16 %v7529_v0  ;;  %v7530_v14 = vunpack.i.l.bf16 %v7529_v0  ;;  %v7534_v17 = vpop.permute.xlu0 %7533 }
 0x15d   :  { %v7536_v28 = vunpack.i.h.bf16 %v7534_v17  ;;  %v7535_v32 = vunpack.i.l.bf16 %v7534_v17 }
 0x15e   :  { %v530_v48 = vsel %vm529_vm3, %v7530_v14, %v7525_v63 }
 0x15f   :  { %v532_v59 = vsel %vm529_vm3, %v7531_v12, %v7535_v32  ;;  %v6556_v60 = vpack.c.bf16 %v7536_v28, %v7526_v53  ;;  %v533_v1 = vsel %vm529_vm3, %v7535_v32, %v7536_v28 }
 0x160   :  { %v6542_v2 = vpack.c.bf16 %v532_v59, %v530_v48  ;;  %v7539_v3 = vpop.permute.xlu1 %7538  ;;  %v6540_v4 = vpack.c.bf16 %v533_v1, %v531_v62 }
 0x161   :  { %6557 = vmatprep.subr.bf16.mxu0 %v6556_v60  ;;  %v7541_v11 = vunpack.i.h.bf16 %v7539_v3  ;;  %v7540_v13 = vunpack.i.l.bf16 %v7539_v3 }
 0x162   :  { %6541 = vmatprep.subr.bf16.mxu1 %v6540_v4  ;;  %6559 = vmatpush3.bf16.msra.mxu0 %v6556_v60 }
 0x163   :  { %6543 = vmatpush1.bf16.msra.mxu1 %v6542_v2  ;;  %v535_v30 = vsel %vm529_vm3, %v7540_v13, %v7541_v11 }
 0x164   :  { %v7549_v16 = vpop.permute.xlu0 %7548  ;;  %v7544_v18 = vpop.permute.xlu1 %7543 }
 0x165   :  { %v7551_v21 = vunpack.i.h.bf16 %v7549_v16  ;;  %v7550_v22 = vunpack.i.l.bf16 %v7549_v16  ;;  %v7546_v24 = vunpack.i.h.bf16 %v7544_v18  ;;  %v7545_v25 = vunpack.i.l.bf16 %v7544_v18 }
 0x167   :  { %v6560_v35 = vpack.c.bf16 %v7551_v21, %v7541_v11  ;;  %v536_v36 = vsel %vm529_vm3, %v7546_v24, %v7550_v22  ;;  %v534_v42 = vsel %vm529_vm3, %v7545_v25, %v7540_v13  ;;  %v537_v44 = vsel %vm529_vm3, %v7550_v22, %v7551_v21 }
 0x168   :  { %v6546_v49 = vpack.c.bf16 %v536_v36, %v534_v42  ;;  %v7554_v51 = vpop.permute.xlu0 %7553  ;;  %v6544_v58 = vpack.c.bf16 %v537_v44, %v535_v30  ;;  %v5977_v42 = vld [vmem:[%s10797_s3 + $0x58] sm:$0xff]  ;;  %v8460_v44 = vld [vmem:[%s10797_s3] sm:$0xff] }
 0x169   :  { %6561 = vmatprep.subr.bf16.mxu0 %v6560_v35  ;;  %v7556_v37 = vunpack.i.h.bf16 %v7554_v51  ;;  %v7555_v39 = vunpack.i.l.bf16 %v7554_v51 }
 0x16a   :  { %6545 = vmatprep.subr.bf16.mxu1 %v6544_v58  ;;  %6563 = vmatpush3.bf16.msra.mxu0 %v6560_v35  ;;  %v5976_v35 = vld [vmem:[%s10797_s3 + $0x50] sm:$0xff] }
 0x16b   :  { %6547 = vmatpush1.bf16.msra.mxu1 %v6546_v49  ;;  %v539_v14 = vsel %vm529_vm3, %v7555_v39, %v7556_v37 }
 0x16c   :  { %v7559_v50 = vpop.permute.xlu0 %7558  ;;  %v7564_v53 = vpop.permute.xlu1 %7563 }
 0x16d   :  { %v7561_v63 = vunpack.i.h.bf16 %v7559_v50  ;;  %v7560_v0 = vunpack.i.l.bf16 %v7559_v50  ;;  %v7566_v9 = vunpack.i.h.bf16 %v7564_v53  ;;  %v7565_v12 = vunpack.i.l.bf16 %v7564_v53 }
 0x16f   :  { %v538_v17 = vsel %vm529_vm3, %v7560_v0, %v7555_v39  ;;  %v6564_v28 = vpack.c.bf16 %v7566_v9, %v7556_v37  ;;  %v540_v32 = vsel %vm529_vm3, %v7561_v63, %v7565_v12  ;;  %v541_v43 = vsel %vm529_vm3, %v7565_v12, %v7566_v9  ;;  %v8494_v37 = vld [vmem:[%s10797_s3 + $0x18] sm:$0xff]  ;;  %v8502_v39 = vld [vmem:[%s10797_s3 + $0x20] sm:$0xff]  ;;  %v8516_v0 = vld [vmem:[%s10797_s3 + $0x28] sm:$0xff] }
 0x170   :  { %v6550_v47 = vpack.c.bf16 %v540_v32, %v538_v17  ;;  %v7569_v48 = vpop.permute.xlu1 %7568  ;;  %v6548_v59 = vpack.c.bf16 %v541_v43, %v539_v14  ;;  %v8524_v9 = vld [vmem:[%s10797_s3 + $0x30] sm:$0xff]  ;;  %v112_v32 = vld [vmem:[%s10799_s5 + $0x218] sm:$0xff] }
 0x171   :  { %6565 = vmatprep.subr.bf16.mxu0 %v6564_v28  ;;  %v7571_v60 = vunpack.i.h.bf16 %v7569_v48  ;;  %v7570_v62 = vunpack.i.l.bf16 %v7569_v48 }
 0x172   :  { %6549 = vmatprep.subr.bf16.mxu1 %v6548_v59  ;;  %6567 = vmatpush3.bf16.msra.mxu0 %v6564_v28  ;;  %v110_v28 = vld [vmem:[%s10799_s5 + $0x208] sm:$0xff]  ;;  %v8546_v59 = vld [vmem:[%s10797_s3 + $0x38] sm:$0xff] }
 0x173   :  { %6551 = vmatpush1.bf16.msra.mxu1 %v6550_v47  ;;  %v543_v11 = vsel %vm529_vm3, %v7570_v62, %v7571_v60 }
 0x174   :  { %v7574_v1 = vpop.permute.xlu0 %7573  ;;  %v7579_v2 = vpop.permute.xlu1 %7578 }
 0x175   :  { %v7576_v3 = vunpack.i.h.bf16 %v7574_v1  ;;  %v7575_v4 = vunpack.i.l.bf16 %v7574_v1  ;;  %v7581_v7 = vunpack.i.h.bf16 %v7579_v2  ;;  %v7580_v8 = vunpack.i.l.bf16 %v7579_v2  ;;  %v109_v1 = vld [vmem:[%s10799_s5 + $0x200] sm:$0xff] }
 0x177   :  { %v6568_v13 = vpack.c.bf16 %v7576_v3, %v7571_v60  ;;  %v544_v16 = vsel %vm529_vm3, %v7581_v7, %v7575_v4  ;;  %v542_v18 = vsel %vm529_vm3, %v7580_v8, %v7570_v62  ;;  %v545_v21 = vsel %vm529_vm3, %v7575_v4, %v7576_v3  ;;  %v8554_v60 = vld [vmem:[%s10797_s3 + $0x80] sm:$0xff]  ;;  %v111_v8 = vld [vmem:[%s10799_s5 + $0x210] sm:$0xff] }
 0x178   :  { %v6554_v22 = vpack.c.bf16 %v544_v16, %v542_v18  ;;  %v7584_v24 = vpop.permute.xlu0 %7583  ;;  %v8375_v25 = vpop.permute.xlu1 %7588  ;;  %v6552_v27 = vpack.c.bf16 %v545_v21, %v543_v11  ;;  %v8556_v62 = vpack.c.bf16 %v112_v32, %v110_v28  ;;  %v114_v11 = vld [vmem:[%s10799_s5 + $0x228] sm:$0xff] }
 0x179   :  { %6569 = vmatprep.subr.bf16.mxu0 %v6568_v13  ;;  %v7585_v15 = vunpack.i.l.bf16 %v7584_v24  ;;  %v7590_v34 = vunpack.i.l.bf16 %v8375_v25  ;;  %v8587_v21 = vld [vmem:[%s10797_s3 + $0x88] sm:$0xff] }
 0x17a   :  { %6553 = vmatprep.subr.bf16.mxu1 %v6552_v27  ;;  %6571 = vmatpush3.bf16.msra.mxu0 %v6568_v13  ;;  %10841 = vst [vmem:[#allocation6_spill] sm:$0xff] %v8556_v62  ;;  %v116_v13 = vld [vmem:[%s10799_s5 + $0x238] sm:$0xff] }
 0x17b   :  { %6555 = vmatpush1.bf16.msra.mxu1 %v6554_v22  ;;  %6589 = vmatprep.subr.bf16.mxu0 %v8167_v56  ;;  %v1114_v55 = vsel %vm1112_vm4, %v7590_v34, %v7585_v15 }
 0x17c   :  { %v8381_v30 = vpop.permute.xlu1 %7598  ;;  %6573 = vmatprep.subr.bf16.mxu1 %v6572_v19  ;;  %v8390_v36 = vpop.permute.xlu0 %7593  ;;  %v7591_v19 = vunpack.i.h.bf16 %v8375_v25  ;;  %v8601_v25 = vld [vmem:[%s10797_s3 + $0x90] sm:$0xff] }
 0x17d   :  { %6344 = vmatmul.mubr.msk.f32.vlgmr.msra.gmra.mrb[16].mxu0 %vm570_vm2, %v5975_v29  ;;  %v7596_v12 = vunpack.i.h.bf16 %v8390_v36  ;;  %v7595_v14 = vunpack.i.l.bf16 %v8390_v36 }
 0x17e   :  { %5982 = vmatmul.mubr.msk.f32.vlgmr.msra.gmra.mrb[8].mxu1 %vm570_vm2, %v8291_v31  ;;  %6591 = vmatpush3.bf16.msra.mxu0 %v8167_v56  ;;  %v7600_v31 = vunpack.i.l.bf16 %v8381_v30 }
 0x17f   :  { %6575 = vmatpush1.bf16.msra.mxu1 %v8175_v61  ;;  %6593 = vmatprep.subr.bf16.mxu0 %v8212_v20  ;;  %v7586_v61 = vunpack.i.h.bf16 %v7584_v24  ;;  %v1113_v2 = vsel %vm1112_vm4, %v7595_v14, %v7590_v34  ;;  %v1115_v3 = vsel %vm1112_vm4, %v7596_v12, %v7591_v19 }
 0x180   :  { %6346 = vmatprep.mubr.msk.f32.mxu0 %vm570_vm2, %v5976_v35  ;;  %6577 = vmatprep.subr.bf16.mxu1 %v6576_v52  ;;  %v8409_v56 = vpop.permute.xlu1 %7608  ;;  %v8420_v52 = vpop.permute.xlu0 %7603 }
 0x181   :  { %665 = vmatprep.mubr.f32.mxu1 %v10808_v6  ;;  %6347 = vmatmul.mubr.msk.f32.gmra.mrb[18].mxu0 %vm570_vm2, %v5977_v42  ;;  %v1116_v5 = vsel %vm1112_vm4, %v7591_v19, %v7586_v61  ;;  %v7606_v43 = vunpack.i.h.bf16 %v8420_v52  ;;  %v7605_v47 = vunpack.i.l.bf16 %v8420_v52  ;;  %v7611_v4 = vunpack.i.h.bf16 %v8409_v56  ;;  %v8625_v19 = vld [vmem:[%s10797_s3 + $0x98] sm:$0xff] }
 0x182   :  { %5983 = vmatmul.mubr.msk.f32.gmra.mrb[10].mxu1 %vm570_vm2, %v5975_v29  ;;  %6595 = vmatpush3.bf16.msra.mxu0 %v8212_v20  ;;  %v5980_v20 = vld [vmem:[%s10797_s3 + $0x70] sm:$0xff]  ;;  %v6604_v26 = vpack.c.bf16 %v1116_v5, %v1114_v55  ;;  %v7610_v7 = vunpack.i.l.bf16 %v8409_v56  ;;  %v8604_v29 = vpack.c.bf16 %v111_v8, %v109_v1  ;;  %v113_v56 = vld [vmem:[%s10799_s5 + $0x220] sm:$0xff]  ;;  %v54_v1 = vld [vmem:[%s10799_s5 + $0x48] sm:$0xff] }
 0x183   :  { %6579 = vmatpush1.bf16.msra.mxu1 %v8235_v41  ;;  %6597 = vmatprep.subr.bf16.mxu0 %v8225_v33  ;;  %v8436_v41 = vld [vmem:[%s10797_s3 + $0x78] sm:$0xff]  ;;  %v1118_v22 = vsel %vm1112_vm4, %v7605_v47, %v7600_v31  ;;  %v1119_v36 = vsel %vm1112_vm4, %v7611_v4, %v7606_v43  ;;  %v8637_v5 = vld [vmem:[%s10797_s3 + $0xa0] sm:$0xff] }
 0x184   :  { %6349 = vmatprep.mubr.msk.f32.mxu0 %vm570_vm2, %v5978_v38  ;;  %6581 = vmatprep.subr.bf16.mxu1 %v6580_v23  ;;  %v8446_v23 = vpop.permute.xlu1 %7618  ;;  %v8462_v49 = vpop.permute.xlu0 %7613  ;;  %10842 = vst [vmem:[#allocation7_spill] sm:$0xff] %v8604_v29  ;;  %v53_v4 = vld [vmem:[%s10799_s5 + $0x40] sm:$0xff]  ;;  %v60_v8 = vld [vmem:[%s10799_s5 + $0x78] sm:$0xff] }
 0x185   :  { %671 = vmatprep.mubr.f32.mxu1 %v10808_v6  ;;  %6350 = vmatmul.mubr.msk.f32.gmra.mrb[20].mxu0 %vm570_vm2, %v5979_v57  ;;  %v7616_v51 = vunpack.i.h.bf16 %v8462_v49  ;;  %v7615_v58 = vunpack.i.l.bf16 %v8462_v49  ;;  %v7621_v16 = vunpack.i.h.bf16 %v8446_v23  ;;  %v7620_v18 = vunpack.i.l.bf16 %v8446_v23 }
 0x186   :  { %5984 = vmatmul.mubr.msk.f32.gmra.mrb[12].mxu1 %vm570_vm2, %v5976_v35  ;;  %6599 = vmatpush3.bf16.msra.mxu0 %v8225_v33  ;;  %v6620_v33 = vpack.c.bf16 %v7586_v61, %v7585_v15  ;;  %v8606_v35 = vpack.c.bf16 %v116_v13, %v114_v11 }
 0x187   :  { %6583 = vmatpush1.bf16.msra.mxu1 %v8270_v10  ;;  %6601 = vmatprep.subr.bf16.mxu0 %v8253_v54  ;;  %v7601_v10 = vunpack.i.h.bf16 %v8381_v30  ;;  %v6628_v50 = vpack.c.bf16 %v7616_v51, %v7615_v58  ;;  %v6606_v30 = vpack.c.bf16 %v1115_v3, %v1113_v2  ;;  %v1122_v34 = vsel %vm1112_vm4, %v7620_v18, %v7615_v58 }
 0x188   :  { %6352 = vmatprep.mubr.msk.f32.mxu0 %vm570_vm2, %v5980_v20  ;;  %6585 = vmatprep.subr.bf16.mxu1 %v6584_v40  ;;  %v8477_v40 = vld [vmem:[%s10797_s3 + $0x10] sm:$0xff]  ;;  %v7624_v48 = vpop.permute.xlu0 %7623  ;;  %10843 = vst [vmem:[#allocation8_spill] sm:$0xff] %v8606_v35  ;;  %v1124_v52 = vsel %vm1112_vm4, %v7621_v16, %v7616_v51 }
 0x189   :  { %677 = vmatprep.mubr.f32.mxu1 %v10808_v6  ;;  %6353 = vmatmul.mubr.msk.f32.gmra.mrb[22].mxu0 %vm570_vm2, %v8436_v41  ;;  %v1120_v24 = vsel %vm1112_vm4, %v7606_v43, %v7601_v10  ;;  %v7626_v61 = vunpack.i.h.bf16 %v7624_v48  ;;  %v7625_v15 = vunpack.i.l.bf16 %v7624_v48  ;;  %v51_v48 = vld [vmem:[%s10799_s5 + $0x30] sm:$0xff] }
 0x18a   :  { %5985 = vmatmul.mubr.msk.f32.gmra.mrb[14].mxu1 %vm570_vm2, %v5977_v42  ;;  %6603 = vmatpush3.bf16.msra.mxu0 %v8253_v54  ;;  %v6624_v54 = vpack.c.bf16 %v7601_v10, %v7600_v31  ;;  %v1117_v42 = vsel %vm1112_vm4, %v7610_v7, %v7605_v47  ;;  %v6612_v10 = vpack.c.bf16 %v1124_v52, %v1122_v34  ;;  %v49_v47 = vld [vmem:[%s10799_s5 + $0x20] sm:$0xff]  ;;  %v55_v7 = vld [vmem:[%s10799_s5 + $0x50] sm:$0xff]  ;;  %v72_v34 = vld [vmem:[%s10799_s5 + $0xd8] sm:$0xff] }
 0x18b   :  { %6587 = vmatpush1.bf16.msra.mxu1 %v8300_v46  ;;  %6621 = vmatprep.subr.bf16.mxu0 %v6620_v33  ;;  %v8488_v46 = vpop.permute.xlu1 %7628  ;;  %v1121_v31 = vsel %vm1112_vm4, %v7625_v15, %v7620_v18  ;;  %v8742_v2 = vpack.c.bf16 %v51_v48, %v49_v47  ;;  %v8763_v11 = vpack.c.bf16 %v55_v7, %v53_v4  ;;  %v59_v18 = vld [vmem:[%s10799_s5 + $0x70] sm:$0xff]  ;;  %v85_v7 = vld [vmem:[%s10799_s5 + $0x140] sm:$0xff] }
 0x18c   :  { %6371 = vmatprep.mubr.msk.f32.mxu0 %vm570_vm2, %v8460_v44  ;;  %6605 = vmatprep.subr.bf16.mxu1 %v6604_v26  ;;  %v7631_v53 = vunpack.i.h.bf16 %v8488_v46  ;;  %v7630_v63 = vunpack.i.l.bf16 %v8488_v46  ;;  %v7634_v27 = vpop.permute.xlu0 %7633  ;;  %v48_v46 = vld [vmem:[%s10799_s5 + $0x18] sm:$0xff]  ;;  %v83_v47 = vld [vmem:[%s10799_s5 + $0x130] sm:$0xff] }
 0x18d   :  { %683 = vmatprep.mubr.f32.mxu1 %v10808_v6  ;;  %6372 = vmatmul.mubr.msk.f32.vlgmr.msra.gmra.mrb[16].mxu0 %vm570_vm2, %v8469_v45 }
 0x18e   :  { %5986 = vmatmul.mubr.msk.f32.gmra.mrb[16].mxu1 %vm570_vm2, %v5978_v38  ;;  %6623 = vmatpush3.bf16.msra.mxu0 %v6620_v33  ;;  %v6632_v17 = vpack.c.bf16 %v7631_v53, %v7630_v63  ;;  %v6608_v38 = vpack.c.bf16 %v1120_v24, %v1118_v22  ;;  %v6610_v33 = vpack.c.bf16 %v1119_v36, %v1117_v42  ;;  %v64_v22 = vld [vmem:[%s10799_s5 + $0x98] sm:$0xff]  ;;  %v63_v36 = vld [vmem:[%s10799_s5 + $0x90] sm:$0xff] }
 0x18f   :  { %6625 = vmatprep.subr.bf16.mxu0 %v6624_v54  ;;  %6374 = vmatprep.mubr.msk.f32.mxu0 %vm570_vm2, %v8477_v40  ;;  %v7639_v55 = vpop.permute.xlu1 %7638  ;;  %v68_v42 = vld [vmem:[%s10799_s5 + $0xb8] sm:$0xff] }
 0x190   :  { %689 = vmatprep.mubr.f32.mxu1 %v10808_v6  ;;  %v7641_v49 = vunpack.i.h.bf16 %v7639_v55  ;;  %v7640_v26 = vunpack.i.l.bf16 %v7639_v55 }
 0x191   :  { %6375 = vmatmul.mubr.msk.f32.gmra.mrb[18].mxu0 %vm570_vm2, %v8494_v37 }
 0x192   :  { %5987 = vmatmul.mubr.msk.f32.gmra.mrb[18].mxu1 %vm570_vm2, %v5979_v57  ;;  %6627 = vmatpush3.bf16.msra.mxu0 %v6624_v54  ;;  %v115_v57 = vld [vmem:[%s10799_s5 + $0x230] sm:$0xff]  ;;  %v8654_v54 = vld [vmem:[%s10797_s3 + $0xa8] sm:$0xff] }
 0x193   :  { %6629 = vmatprep.subr.bf16.mxu0 %v6628_v50  ;;  %6377 = vmatprep.mubr.msk.f32.mxu0 %vm570_vm2, %v8502_v39  ;;  %v8640_v23 = vpack.c.bf16 %v115_v57, %v113_v56  ;;  %v65_v57 = vld [vmem:[%s10799_s5 + $0xa0] sm:$0xff] }
 0x194   :  { %695 = vmatprep.mubr.f32.mxu1 %v10808_v6 }
 0x195   :  { %6378 = vmatmul.mubr.msk.f32.gmra.mrb[20].mxu0 %vm570_vm2, %v8516_v0  ;;  %10844 = vst [vmem:[#allocation9_spill] sm:$0xff] %v8640_v23 }
 0x196   :  { %5988 = vmatmul.mubr.msk.f32.gmra.mrb[20].mxu1 %vm570_vm2, %v5980_v20  ;;  %6631 = vmatpush3.bf16.msra.mxu0 %v6628_v50  ;;  %v7636_v20 = vunpack.i.h.bf16 %v7634_v27 }
 0x197   :  { %6633 = vmatprep.subr.bf16.mxu0 %v6632_v17  ;;  %6380 = vmatprep.mubr.msk.f32.mxu0 %vm570_vm2, %v8524_v9 }
 0x198   :  { %701 = vmatprep.mubr.f32.mxu1 %v10808_v6  ;;  %v1128_v58 = vsel %vm1112_vm4, %v7636_v20, %v7631_v53  ;;  %v1127_v53 = vsel %vm1112_vm4, %v7641_v49, %v7636_v20  ;;  %v69_v20 = vld [vmem:[%s10799_s5 + $0xc0] sm:$0xff]  ;;  %v10846_v49 = vmov 0 }
 0x199   :  { %6381 = vmatmul.mubr.msk.f32.gmra.mrb[22].mxu0 %vm570_vm2, %v8546_v59  ;;  %v10847_v49 = vsel %vm8864_vm7, 4294967295, %v10846_v49 }
 0x19a   :  { %5989 = vmatmul.mubr.msk.f32.gmra.mrb[22].mxu1 %vm570_vm2, %v8436_v41  ;;  %6635 = vmatpush3.bf16.msra.mxu0 %v6632_v17  ;;  %v7635_v41 = vunpack.i.l.bf16 %v7634_v27  ;;  %v8686_v17 = vld [vmem:[%s10797_s3 + $0xb8] sm:$0xff]  ;;  %10848 = vst [vmem:[#allocation11_spill] sm:$0xff] %v10847_v49 }
 0x19b   :  { %6399 = vmatprep.mubr.msk.f32.mxu0 %vm570_vm2, %v8554_v60  ;;  %901 = vmatprep.mubr.f32.mxu1 %v10808_v6 }
 0x19c   :  { %6701 = vmatprep.subr.bf16.mxu0 %v8556_v62  ;;  %v1126_v51 = vsel %vm1112_vm4, %v7635_v41, %v7630_v63  ;;  %v46_v63 = vld [vmem:[%s10799_s5 + $0x8] sm:$0xff]  ;;  %v1125_v12 = vsel %vm1112_vm4, %v7640_v26, %v7635_v41  ;;  %v71_v41 = vld [vmem:[%s10799_s5 + $0xd0] sm:$0xff]  ;;  %v1829_v62 = vld [vmem:[%s10796_s2 + $0x20] sm:$0xff] }
 0x19d   :  { %6400 = vmatmul.mubr.msk.f32.vlgmr.msra.gmra.mrb[16].mxu0 %vm570_vm2, %v8587_v21  ;;  %v6616_v14 = vpack.c.bf16 %v1128_v58, %v1126_v51  ;;  %v8689_v28 = vpack.c.bf16 %v48_v46, %v46_v63  ;;  %v6618_v32 = vpack.c.bf16 %v1127_v53, %v1125_v12  ;;  %v8846_v55 = vpack.c.bf16 %v71_v41, %v69_v20  ;;  %v76_v51 = vld [vmem:[%s10799_s5 + $0xf8] sm:$0xff]  ;;  %v78_v46 = vld [vmem:[%s10799_s5 + $0x108] sm:$0xff] }
 0x19e   :  { %5998 = vmatmul.mubr.msk.f32.vlgmr.msra.gmra.mrb[8].mxu1 %vm570_vm2, %v8460_v44  ;;  %6402 = vmatprep.mubr.msk.f32.mxu0 %vm570_vm2, %v8601_v25  ;;  %v1123_v44 = vsel %vm1112_vm4, %v7626_v61, %v7621_v16  ;;  %v57_v16 = vld [vmem:[%s10799_s5 + $0x60] sm:$0xff]  ;;  %v67_v61 = vld [vmem:[%s10799_s5 + $0xb0] sm:$0xff]  ;;  %v80_v53 = vld [vmem:[%s10799_s5 + $0x118] sm:$0xff] }
 0x19f   :  { %6607 = vmatpush1.bf16.msra.mxu1 %v6606_v30  ;;  %907 = vmatprep.mubr.f32.mxu1 %v10808_v6  ;;  %v6614_v50 = vpack.c.bf16 %v1123_v44, %v1121_v31  ;;  %v8784_v24 = vpack.c.bf16 %v59_v18, %v57_v16  ;;  %v61_v30 = vld [vmem:[%s10799_s5 + $0x80] sm:$0xff]  ;;  %v8820_v15 = vpack.c.bf16 %v67_v61, %v65_v57  ;;  %v119_v44 = vld [vmem:[%s10799_s5 + $0x250] sm:$0xf]  ;;  %v90_v16 = vld [vmem:[%s10799_s5 + $0x168] sm:$0xff] }
 0x1a0   :  { %6609 = vmatprep.subr.bf16.mxu1 %v6608_v38  ;;  %6703 = vmatpush1.bf16.msra.mxu0 %v8604_v29  ;;  %v8805_v38 = vpack.c.bf16 %v63_v36, %v61_v30  ;;  %v117_v31 = vld [vmem:[%s10799_s5 + $0x240] sm:$0xff]  ;;  %v8900_v12 = vpack.c.bf16 %v80_v53, %v78_v46  ;;  %v92_v18 = vld [vmem:[%s10799_s5 + $0x178] sm:$0xff]  ;;  %v91_v30 = vld [vmem:[%s10799_s5 + $0x170] sm:$0xff] }
 0x1a1   :  { %6403 = vmatmul.mubr.msk.f32.gmra.mrb[18].mxu0 %vm570_vm2, %v8625_v19  ;;  %6705 = vmatprep.subr.bf16.mxu0 %v8606_v35  ;;  %v8868_v26 = vpack.c.bf16 %v119_v44, %v117_v31  ;;  %v93_v57 = vld [vmem:[%s10799_s5 + $0x180] sm:$0xff]  ;;  %v98_v20 = vld [vmem:[%s10799_s5 + $0x1a8] sm:$0xff]  ;;  %v100_v41 = vld [vmem:[%s10799_s5 + $0x1b8] sm:$0xff] }
 0x1a2   :  { %5999 = vmatmul.mubr.msk.f32.gmra.mrb[10].mxu1 %vm570_vm2, %v8469_v45  ;;  %6405 = vmatprep.mubr.msk.f32.mxu0 %vm570_vm2, %v8637_v5  ;;  %v8666_v45 = vld [vmem:[%s10797_s3 + $0xb0] sm:$0xff]  ;;  %v6052_v31 = vld [vmem:[%s10794_s0 + $0x68] sm:$0xff]  ;;  %v97_v44 = vld [vmem:[%s10799_s5 + $0x1a0] sm:$0xff] }
 0x1a3   :  { %6611 = vmatpush1.bf16.msra.mxu1 %v6610_v33  ;;  %913 = vmatprep.mubr.f32.mxu1 %v10808_v6  ;;  %v120_v33 = vld [vmem:[%s10799_s5 + $0x258] sm:$0xf]  ;;  %10849 = vst [vmem:[#allocation12_spill] sm:$0xff] %v8868_v26 }
 0x1a4   :  { %6613 = vmatprep.subr.bf16.mxu1 %v6612_v10  ;;  %6707 = vmatpush1.bf16.msra.mxu0 %v8640_v23  ;;  %v104_v46 = vld [vmem:[%s10799_s5 + $0x1d8] sm:$0xff] }
 0x1a5   :  { %6406 = vmatmul.mubr.msk.f32.gmra.mrb[20].mxu0 %vm570_vm2, %v8654_v54  ;;  %v1828_v35 = vld [vmem:[%s10796_s2 + $0x18] sm:$0xff] }
 0x1a6   :  { %6000 = vmatmul.mubr.msk.f32.gmra.mrb[12].mxu1 %vm570_vm2, %v8477_v40  ;;  %6408 = vmatprep.mubr.msk.f32.mxu0 %vm570_vm2, %v8666_v45  ;;  %v45_v40 = vld [vmem:[%s10799_s5] sm:$0xff] }
 0x1a7   :  { %6615 = vmatpush1.bf16.msra.mxu1 %v6614_v50  ;;  %919 = vmatprep.mubr.f32.mxu1 %v10808_v6  ;;  %v75_v50 = vld [vmem:[%s10799_s5 + $0xf0] sm:$0xff] }
 0x1a8   :  { %6617 = vmatprep.subr.bf16.mxu1 %v6616_v14  ;;  %v77_v14 = vld [vmem:[%s10799_s5 + $0x100] sm:$0xff] }
 0x1a9   :  { %6409 = vmatmul.mubr.msk.f32.gmra.mrb[22].mxu0 %vm570_vm2, %v8686_v17 }
 0x1aa   :  { %6001 = vmatmul.mubr.msk.f32.gmra.mrb[14].mxu1 %vm570_vm2, %v8494_v37  ;;  %1735 = vmatprep.mubr.f32.mxu0 %v10808_v6  ;;  %v47_v37 = vld [vmem:[%s10799_s5 + $0x10] sm:$0xff] }
 0x1ab   :  { %6619 = vmatpush1.bf16.msra.mxu1 %v6618_v32  ;;  %925 = vmatprep.mubr.f32.mxu1 %v10808_v6 }
 0x1ac   :  { %6637 = vmatprep.subr.bf16.mxu1 %v8689_v28 }
 0x1ae   :  { %6002 = vmatmul.mubr.msk.f32.gmra.mrb[16].mxu1 %vm570_vm2, %v8502_v39  ;;  %v50_v39 = vld [vmem:[%s10799_s5 + $0x28] sm:$0xff] }
 0x1af   :  { %931 = vmatprep.mubr.f32.mxu1 %v10808_v6 }
 0x1b2   :  { %6003 = vmatmul.mubr.msk.f32.gmra.mrb[18].mxu1 %vm570_vm2, %v8516_v0  ;;  %v52_v0 = vld [vmem:[%s10799_s5 + $0x38] sm:$0xff] }
 0x1b3   :  { %937 = vmatprep.mubr.f32.mxu1 %v10808_v6  ;;  %v8724_v43 = vpack.c.bf16 %v52_v0, %v50_v39  ;;  %v81_v0 = vld [vmem:[%s10799_s5 + $0x120] sm:$0xff] }
 0x1b4   :  { %v8926_v48 = vpack.c.bf16 %v83_v47, %v81_v0  ;;  %v108_v0 = vld [vmem:[%s10799_s5 + $0x1f8] sm:$0xff] }
 0x1b6   :  { %6004 = vmatmul.mubr.msk.f32.gmra.mrb[20].mxu1 %vm570_vm2, %v8524_v9  ;;  %v8722_v9 = vpack.c.bf16 %v47_v37, %v45_v40  ;;  %v82_v40 = vld [vmem:[%s10799_s5 + $0x128] sm:$0xff]  ;;  %v84_v37 = vld [vmem:[%s10799_s5 + $0x138] sm:$0xff] }
 0x1b7   :  { %943 = vmatprep.mubr.f32.mxu1 %v10808_v6  ;;  %v8918_v39 = vpack.c.bf16 %v84_v37, %v82_v40  ;;  %v106_v37 = vld [vmem:[%s10799_s5 + $0x1e8] sm:$0xff] }
 0x1b8   :  { %v9032_v47 = vpack.c.bf16 %v108_v0, %v106_v37 }
 0x1ba   :  { %6005 = vmatmul.mubr.msk.f32.gmra.mrb[22].mxu1 %vm570_vm2, %v8546_v59  ;;  %v56_v59 = vld [vmem:[%s10799_s5 + $0x58] sm:$0xff]  ;;  %10855 = vst [vmem:[#allocation18_spill] sm:$0xff] %v9032_v47 }
 0x1bb   :  { %1241 = vmatprep.mubr.f32.mxu1 %v10808_v6  ;;  %v8745_v3 = vpack.c.bf16 %v56_v59, %v54_v1  ;;  %v86_v1 = vld [vmem:[%s10799_s5 + $0x148] sm:$0xff]  ;;  %v88_v59 = vld [vmem:[%s10799_s5 + $0x158] sm:$0xff] }
 0x1bc   :  { %v8936_v4 = vpack.c.bf16 %v88_v59, %v86_v1  ;;  %v105_v1 = vld [vmem:[%s10799_s5 + $0x1e0] sm:$0xff]  ;;  %v107_v59 = vld [vmem:[%s10799_s5 + $0x1f0] sm:$0xff] }
 0x1be   :  { %6022 = vmatmul.mubr.msk.f32.vlgmr.msra.gmra.mrb[8].mxu1 %vm570_vm2, %v8554_v60  ;;  %v58_v60 = vld [vmem:[%s10799_s5 + $0x68] sm:$0xff] }
 0x1bf   :  { %1247 = vmatprep.mubr.f32.mxu1 %v10808_v6  ;;  %6639 = vmatpush1.bf16.msra.mxu1 %v8722_v9  ;;  %v8766_v13 = vpack.c.bf16 %v60_v8, %v58_v60  ;;  %v87_v60 = vld [vmem:[%s10799_s5 + $0x150] sm:$0xff] }
 0x1c0   :  { %6641 = vmatprep.subr.bf16.mxu1 %v8724_v43  ;;  %v8944_v8 = vpack.c.bf16 %v87_v60, %v85_v7  ;;  %v9040_v7 = vpack.c.bf16 %v107_v59, %v105_v1  ;;  %v1430_v60 = vpop.permute.xlu0 %1429 }
 0x1c2   :  { %6023 = vmatmul.mubr.msk.f32.gmra.mrb[10].mxu1 %vm570_vm2, %v8587_v21  ;;  %v62_v21 = vld [vmem:[%s10799_s5 + $0x88] sm:$0xff]  ;;  %10856 = vst [vmem:[#allocation19_spill] sm:$0xff] %v9040_v7 }
 0x1c3   :  { %1253 = vmatprep.mubr.f32.mxu1 %v10808_v6  ;;  %6643 = vmatpush1.bf16.msra.mxu1 %v8742_v2  ;;  %v8787_v27 = vpack.c.bf16 %v64_v22, %v62_v21  ;;  %v89_v21 = vld [vmem:[%s10799_s5 + $0x160] sm:$0xff]  ;;  %v8957_v22 = vpack.c.bf16 %v92_v18, %v90_v16  ;;  %v9044_v16 = vpop.permute.xlu1 %1434 }
 0x1c4   :  { %6645 = vmatprep.subr.bf16.mxu1 %v8745_v3  ;;  %v8962_v36 = vpack.c.bf16 %v91_v30, %v89_v21  ;;  %v6048_v21 = vld [vmem:[%s10794_s0 + $0x48] sm:$0xff]  ;;  %v6051_v30 = vld [vmem:[%s10794_s0 + $0x60] sm:$0xff] }
 0x1c6   :  { %6024 = vmatmul.mubr.msk.f32.gmra.mrb[12].mxu1 %vm570_vm2, %v8601_v25  ;;  %v66_v25 = vld [vmem:[%s10799_s5 + $0xa8] sm:$0xff] }
 0x1c7   :  { %1259 = vmatprep.mubr.f32.mxu1 %v10808_v6  ;;  %6647 = vmatpush1.bf16.msra.mxu1 %v8763_v11  ;;  %v8808_v56 = vpack.c.bf16 %v68_v42, %v66_v25  ;;  %v94_v25 = vld [vmem:[%s10799_s5 + $0x188] sm:$0xff]  ;;  %v96_v42 = vld [vmem:[%s10799_s5 + $0x198] sm:$0xff] }
 0x1c8   :  { %6649 = vmatprep.subr.bf16.mxu1 %v8766_v13  ;;  %v8975_v61 = vpack.c.bf16 %v96_v42, %v94_v25 }
 0x1ca   :  { %6025 = vmatmul.mubr.msk.f32.gmra.mrb[14].mxu1 %vm570_vm2, %v8625_v19  ;;  %v70_v19 = vld [vmem:[%s10799_s5 + $0xc8] sm:$0xff] }
 0x1cb   :  { %1265 = vmatprep.mubr.f32.mxu1 %v10808_v6  ;;  %6651 = vmatpush1.bf16.msra.mxu1 %v8784_v24  ;;  %v8838_v52 = vpack.c.bf16 %v72_v34, %v70_v19  ;;  %v95_v19 = vld [vmem:[%s10799_s5 + $0x190] sm:$0xff] }
 0x1cc   :  { %6653 = vmatprep.subr.bf16.mxu1 %v8787_v27  ;;  %v8980_v34 = vpack.c.bf16 %v95_v19, %v93_v57  ;;  %v9052_v57 = vpack.c.bf16 %v6051_v30, %v6048_v21 }
 0x1ce   :  { %6026 = vmatmul.mubr.msk.f32.gmra.mrb[16].mxu1 %vm570_vm2, %v8637_v5  ;;  %v118_v5 = vld [vmem:[%s10799_s5 + $0x248] sm:$0xff]  ;;  %10850 = vst [vmem:[#allocation13_spill] sm:$0xff] %v8980_v34 }
 0x1cf   :  { %1271 = vmatprep.mubr.f32.mxu1 %v10808_v6  ;;  %6655 = vmatpush1.bf16.msra.mxu1 %v8805_v38  ;;  %v8855_v10 = vpack.c.bf16 %v120_v33, %v118_v5  ;;  %v6049_v5 = vld [vmem:[%s10794_s0 + $0x50] sm:$0xff]  ;;  %v8993_v33 = vpack.c.bf16 %v100_v41, %v98_v20 }
 0x1d0   :  { %6657 = vmatprep.subr.bf16.mxu1 %v8808_v56 }
 0x1d1   :  { %10845 = vst [vmem:[#allocation10_spill] sm:$0xff] %v8855_v10  ;;  %6710 = vmatprep.subr.msk.bf16.mxu0 %vm8864_vm7, %v8855_v10  ;;  %10851 = vst [vmem:[#allocation14_spill] sm:$0xff] %v8993_v33 }
 0x1d2   :  { %6027 = vmatmul.mubr.msk.f32.gmra.mrb[18].mxu1 %vm570_vm2, %v8654_v54  ;;  %v74_v54 = vld [vmem:[%s10799_s5 + $0xe8] sm:$0xff]  ;;  %6713 = vmatpush1.bf16.msk.msra.mxu0 %vm8864_vm7, %v8868_v26 }
 0x1d3   :  { %1277 = vmatprep.mubr.f32.mxu1 %v10808_v6  ;;  %6659 = vmatpush1.bf16.msra.mxu1 %v8820_v15  ;;  %v8879_v58 = vpack.c.bf16 %v76_v51, %v74_v54  ;;  %v99_v54 = vld [vmem:[%s10799_s5 + $0x1b0] sm:$0xff]  ;;  %v6714_v51 = vpack.c.bf16 %v6052_v31, %v6049_v5  ;;  %v9055_v5 = vpop.permute.xlu1 %1439 }
 0x1d4   :  { %6661 = vmatprep.subr.bf16.mxu1 %v8838_v52 }
 0x1d5   :  { %6715 = vmatprep.subr.bf16.mxu0 %v6714_v51 }
 0x1d6   :  { %6028 = vmatmul.mubr.msk.f32.gmra.mrb[20].mxu1 %vm570_vm2, %v8666_v45  ;;  %v73_v45 = vld [vmem:[%s10799_s5 + $0xe0] sm:$0xff] }
 0x1d7   :  { %1283 = vmatprep.mubr.f32.mxu1 %v10808_v6  ;;  %6663 = vmatpush1.bf16.msra.mxu1 %v8846_v55  ;;  %v8890_v63 = vpack.c.bf16 %v75_v50, %v73_v45  ;;  %v9004_v45 = vpack.c.bf16 %v99_v54, %v97_v44  ;;  %v102_v50 = vld [vmem:[%s10799_s5 + $0x1c8] sm:$0xff]  ;;  %v9060_v44 = vld [vmem:[%s10794_s0 + $0x80] sm:$0x1f]  ;;  %v9080_v59 = vpop.permute.xlu1 %1449 }
 0x1d8   :  { %6665 = vmatprep.subr.bf16.mxu1 %v8879_v58  ;;  %v9014_v53 = vpack.c.bf16 %v104_v46, %v102_v50  ;;  %v9071_v46 = vld [vmem:[%s10794_s0 + $0x78] sm:$0x1f] }
 0x1d9   :  { %10852 = vst [vmem:[#allocation15_spill] sm:$0xff] %v9004_v45 }
 0x1da   :  { %6029 = vmatmul.mubr.msk.f32.gmra.mrb[22].mxu1 %vm570_vm2, %v8686_v17  ;;  %v79_v17 = vld [vmem:[%s10799_s5 + $0x110] sm:$0xff]  ;;  %10853 = vst [vmem:[#allocation16_spill] sm:$0xff] %v9014_v53 }
 0x1db   :  { %6667 = vmatpush1.bf16.msra.mxu1 %v8890_v63  ;;  %v8908_v32 = vpack.c.bf16 %v79_v17, %v77_v14  ;;  %v101_v14 = vld [vmem:[%s10799_s5 + $0x1c0] sm:$0xff]  ;;  %v103_v17 = vld [vmem:[%s10799_s5 + $0x1d0] sm:$0xff] }
 0x1dc   :  { %6669 = vmatprep.subr.bf16.mxu1 %v8900_v12  ;;  %v9023_v40 = vpack.c.bf16 %v103_v17, %v101_v14  ;;  %v9073_v14 = vpop.permute.xlu0 %1444 }
 0x1de   :  { %10854 = vst [vmem:[#allocation17_spill] sm:$0xff] %v9023_v40 }
 0x1df   :  { %6671 = vmatpush1.bf16.msra.mxu1 %v8908_v32 }
 0x1e0   :  { %6673 = vmatprep.subr.bf16.mxu1 %v8918_v39 }
 0x1e3   :  { %6675 = vmatpush1.bf16.msra.mxu1 %v8926_v48 }
 0x1e4   :  { %6677 = vmatprep.subr.bf16.mxu1 %v8936_v4 }
 0x1e7   :  { %6679 = vmatpush1.bf16.msra.mxu1 %v8944_v8 }
 0x1e8   :  { %6681 = vmatprep.subr.bf16.mxu1 %v8957_v22 }
 0x1eb   :  { %6683 = vmatpush1.bf16.msra.mxu1 %v8962_v36 }
 0x1ec   :  { %6685 = vmatprep.subr.bf16.mxu1 %v8975_v61 }
 0x1ef   :  { %6687 = vmatpush1.bf16.msra.mxu1 %v8980_v34 }
 0x1f0   :  { %6689 = vmatprep.subr.bf16.mxu1 %v8993_v33 }
 0x1f3   :  { %6691 = vmatpush1.bf16.msra.mxu1 %v9004_v45 }
 0x1f4   :  { %6693 = vmatprep.subr.bf16.mxu1 %v9014_v53 }
 0x1f7   :  { %6695 = vmatpush1.bf16.msra.mxu1 %v9023_v40 }
 0x1f8   :  { %6697 = vmatprep.subr.bf16.mxu1 %v9032_v47 }
 0x1fb   :  { %6699 = vmatpush1.bf16.msra.mxu1 %v9040_v7 }
 0x1fc   :  { %7292 = vmatprep.subr.bf16.mxu1 %v6714_v51 }
 0x270   :  { %v6401_v18 = vpop.f32.mrb[16].mxu0 }
 0x271   :  { %v1356_v25 = vpop.f32.mrb[17].mxu0  ;;  %v1472_v19 = vadd.f32 %v6401_v18, %v9044_v16 }
 0x272   :  { %v1469_v42 = vadd.f32 %v1430_v60, %v1356_v25  ;;  %v9085_v25 = vpop.permute.xlu0 %1454 }
 0x273   :  { %v1496_v54 = vmax.f32 %v1472_v19, 0.0 }
 0x274   :  { %v1493_v20 = vmax.f32 %v1469_v42, 0.0  ;;  %v6404_v41 = vpop.f32.mrb[18].mxu0 }
 0x275   :  { %v1366_v31 = vpop.f32.mrb[19].mxu0  ;;  %v1478_v37 = vadd.f32 %v6404_v41, %v9073_v14 }
 0x276   :  { %6040 = vmatmul.mubr.msk.f32.vlgmr.msra.gmra.mrb[24].mxu0 %vm1526_vm8, %v1493_v20  ;;  %v1475_v51 = vadd.f32 %v9055_v5, %v1366_v31  ;;  %v9090_v20 = vpop.permute.xlu1 %1459 }
 0x277   :  { %1741 = vmatprep.mubr.f32.mxu0 %v10808_v6  ;;  %6717 = vmatpush1.bf16.msra.mxu0 %v9052_v57  ;;  %v1502_v21 = vmax.f32 %v1478_v37, 0.0 }
 0x278   :  { %v6407_v50 = vpop.f32.mrb[20].mxu0  ;;  %6057 = vmatprep.subr.msk.mxu0 %vm188_vm1, %v9060_v44  ;;  %v1499_v0 = vmax.f32 %v1475_v51, 0.0 }
 0x279   :  { %v1376_v17 = vpop.f32.mrb[21].mxu0  ;;  %v1484_v42 = vadd.f32 %v6407_v50, %v9085_v25 }
 0x27a   :  { %6041 = vmatmul.mubr.msk.f32.gmra.mrb[26].mxu0 %vm1526_vm8, %v1496_v54  ;;  %v1481_v30 = vadd.f32 %v9080_v59, %v1376_v17  ;;  %v9095_v54 = vpop.permute.xlu0 %1464 }
 0x27b   :  { %1747 = vmatprep.mubr.f32.mxu0 %v10808_v6  ;;  %6058 = vmatpush1.msk.msra.mxu0 %vm188_vm1, %v9071_v46  ;;  %v1508_v41 = vmax.f32 %v1484_v42, 0.0 }
 0x27c   :  { %v6410_v1 = vpop.f32.mrb[22].mxu0  ;;  %v1505_v19 = vmax.f32 %v1481_v30, 0.0  ;;  %v9107_v30 = vld [vmem:[%s10795_s1] sm:$0xff] }
 0x27d   :  { %v1386_v18 = vpop.f32.mrb[23].mxu0  ;;  %v1490_v51 = vadd.f32 %v6410_v1, %v9095_v54 }
 0x27e   :  { %6042 = vmatmul.mubr.msk.f32.gmra.mrb[28].mxu0 %vm1526_vm8, %v1499_v0  ;;  %v1487_v31 = vadd.f32 %v9090_v20, %v1386_v18 }
 0x27f   :  { %1753 = vmatprep.mubr.f32.mxu0 %v10808_v6  ;;  %v1514_v50 = vmax.f32 %v1490_v51, 0.0 }
 0x280   :  { %v1511_v17 = vmax.f32 %v1487_v31, 0.0 }
 0x282   :  { %6043 = vmatmul.mubr.msk.f32.gmra.mrb[30].mxu0 %vm1526_vm8, %v1502_v21 }
 0x283   :  { %1759 = vmatprep.mubr.f32.mxu0 %v10808_v6 }
 0x286   :  { %6044 = vmatmul.mubr.msk.f32.gmra.mrb[32].mxu0 %vm1526_vm8, %v1505_v19 }
 0x287   :  { %1765 = vmatprep.mubr.f32.mxu0 %v10808_v6 }
 0x28a   :  { %6045 = vmatmul.mubr.msk.f32.gmra.mrb[34].mxu0 %vm1526_vm8, %v1508_v41 }
 0x28b   :  { %1771 = vmatprep.mubr.f32.mxu0 %v10808_v6 }
 0x28e   :  { %6046 = vmatmul.mubr.msk.f32.gmra.mrb[36].mxu0 %vm1526_vm8, %v1511_v17  ;;  %v6050_v17 = vld [vmem:[%s10794_s0 + $0x58] sm:$0xff] }
 0x28f   :  { %1777 = vmatprep.mubr.f32.mxu0 %v10808_v6 }
 0x291   :  { %v1243_v37 = vpop.f32.mrb[8].mxu1 }
 0x292   :  { %v1467_v0 = vadd.f32 %v1430_v60, %v1243_v37  ;;  %v1245_v21 = vpop.f32.mrb[9].mxu1  ;;  %6047 = vmatmul.mubr.msk.f32.gmra.mrb[38].mxu0 %vm1526_vm8, %v1514_v50  ;;  %v6053_v50 = vld [vmem:[%s10794_s0 + $0x70] sm:$0xff] }
 0x293   :  { %v1468_v18 = vadd.f32 %v1430_v60, %v1245_v21  ;;  %1946 = vmatprep.mubr.f32.mxu0 %v10808_v6  ;;  %v9117_v60 = vld [vmem:[%s10795_s1 + $0x8] sm:$0xff] }
 0x294   :  { %v1491_v19 = vmax.f32 %v1467_v0, 0.0 }
 0x295   :  { %v1492_v1 = vmax.f32 %v1468_v18, 0.0  ;;  %v1249_v42 = vpop.f32.mrb[10].mxu1 }
 0x296   :  { %v1470_v41 = vadd.f32 %v9044_v16, %v1249_v42  ;;  %v1251_v31 = vpop.f32.mrb[11].mxu1  ;;  %6059 = vmatmul.mubr.msk.f32.vlgmr.msra.gmra.mrb[40].mxu0 %vm163_vm0, %v9107_v30 }
 0x297   :  { %v1471_v51 = vadd.f32 %v9044_v16, %v1251_v31  ;;  %1622 = vmatprep.mubr.f32.mxu1 %v1492_v1  ;;  %1952 = vmatprep.mubr.f32.mxu0 %v10808_v6  ;;  %v9131_v1 = vpack.c.bf16 %v6053_v50, %v6050_v17  ;;  %v1810_v17 = vld [vmem:[%s10795_s1 + $0x18] sm:$0xff] }
 0x298   :  { %1623 = vmatmul.mubr.f32.vlgmr.msra.gmra.mrb[24].mxu1 %v1491_v19  ;;  %v1494_v16 = vmax.f32 %v1470_v41, 0.0 }
 0x299   :  { %v1495_v37 = vmax.f32 %v1471_v51, 0.0  ;;  %v1255_v0 = vpop.f32.mrb[12].mxu1  ;;  %7294 = vmatpush1.bf16.msra.mxu1 %v9052_v57  ;;  %v9138_v57 = vld [vmem:[%s10795_s1 + $0x10] sm:$0xff] }
 0x29a   :  { %v1473_v21 = vadd.f32 %v9055_v5, %v1255_v0  ;;  %v1257_v18 = vpop.f32.mrb[13].mxu1  ;;  %7293 = vmatprep.subr.msk.mxu1 %vm188_vm1, %v9060_v44  ;;  %6060 = vmatmul.mubr.msk.f32.gmra.mrb[42].mxu0 %vm163_vm0, %v9117_v60 }
 0x29b   :  { %v1474_v42 = vadd.f32 %v9055_v5, %v1257_v18  ;;  %1628 = vmatprep.mubr.f32.mxu1 %v1495_v37  ;;  %1958 = vmatprep.mubr.f32.mxu0 %v10808_v6 }
 0x29c   :  { %1629 = vmatmul.mubr.f32.gmra.mrb[26].mxu1 %v1494_v16  ;;  %v1497_v44 = vmax.f32 %v1473_v21, 0.0 }
 0x29d   :  { %v1498_v19 = vmax.f32 %v1474_v42, 0.0  ;;  %v1261_v41 = vpop.f32.mrb[14].mxu1  ;;  %7295 = vmatpush1.msk.msra.mxu1 %vm188_vm1, %v9071_v46 }
 0x29e   :  { %v1476_v31 = vadd.f32 %v9073_v14, %v1261_v41  ;;  %v1263_v51 = vpop.f32.mrb[15].mxu1  ;;  %6061 = vmatmul.mubr.msk.f32.gmra.mrb[44].mxu0 %vm163_vm0, %v9138_v57  ;;  %6719 = vmatprep.subr.bf16.mxu1 %v9131_v1 }
 0x29f   :  { %v1477_v5 = vadd.f32 %v9073_v14, %v1263_v51  ;;  %1634 = vmatprep.mubr.f32.mxu1 %v1498_v19  ;;  %1964 = vmatprep.mubr.f32.mxu0 %v10808_v6  ;;  %v1811_v14 = vld [vmem:[%s10795_s1 + $0x20] sm:$0xff] }
 0x2a0   :  { %1635 = vmatmul.mubr.f32.gmra.mrb[28].mxu1 %v1497_v44  ;;  %v1500_v37 = vmax.f32 %v1476_v31, 0.0 }
 0x2a1   :  { %v1501_v46 = vmax.f32 %v1477_v5, 0.0  ;;  %v1267_v50 = vpop.f32.mrb[16].mxu1 }
 0x2a2   :  { %v1479_v0 = vadd.f32 %v9080_v59, %v1267_v50  ;;  %v1269_v16 = vpop.f32.mrb[17].mxu1  ;;  %6062 = vmatmul.mubr.msk.f32.gmra.mrb[46].mxu0 %vm163_vm0, %v1810_v17 }
 0x2a3   :  { %v1480_v21 = vadd.f32 %v9080_v59, %v1269_v16  ;;  %1640 = vmatprep.mubr.f32.mxu1 %v1501_v46  ;;  %1970 = vmatprep.mubr.f32.mxu0 %v10808_v6  ;;  %v1812_v59 = vld [vmem:[%s10795_s1 + $0x28] sm:$0xff] }
 0x2a4   :  { %1641 = vmatmul.mubr.f32.gmra.mrb[30].mxu1 %v1500_v37  ;;  %v1503_v19 = vmax.f32 %v1479_v0, 0.0 }
 0x2a5   :  { %v1504_v18 = vmax.f32 %v1480_v21, 0.0  ;;  %v1273_v42 = vpop.f32.mrb[18].mxu1 }
 0x2a6   :  { %v1482_v41 = vadd.f32 %v9085_v25, %v1273_v42  ;;  %v1275_v44 = vpop.f32.mrb[19].mxu1  ;;  %6063 = vmatmul.mubr.msk.f32.gmra.mrb[48].mxu0 %vm163_vm0, %v1811_v14 }
 0x2a7   :  { %v1483_v31 = vadd.f32 %v9085_v25, %v1275_v44  ;;  %1646 = vmatprep.mubr.f32.mxu1 %v1504_v18  ;;  %1976 = vmatprep.mubr.f32.mxu0 %v10808_v6 }
 0x2a8   :  { %1647 = vmatmul.mubr.f32.gmra.mrb[32].mxu1 %v1503_v19  ;;  %v1506_v46 = vmax.f32 %v1482_v41, 0.0 }
 0x2a9   :  { %v1507_v51 = vmax.f32 %v1483_v31, 0.0  ;;  %v1279_v5 = vpop.f32.mrb[20].mxu1  ;;  %v6056_v31 = vld [vmem:[%s10794_s0 + $0x88] sm:$0x1f] }
 0x2aa   :  { %v1485_v50 = vadd.f32 %v9090_v20, %v1279_v5  ;;  %v1281_v37 = vpop.f32.mrb[21].mxu1  ;;  %6064 = vmatmul.mubr.msk.f32.gmra.mrb[50].mxu0 %vm163_vm0, %v1812_v59 }
 0x2ab   :  { %v1486_v0 = vadd.f32 %v9090_v20, %v1281_v37  ;;  %1652 = vmatprep.mubr.f32.mxu1 %v1507_v51  ;;  %v1813_v20 = vld [vmem:[%s10795_s1 + $0x30] sm:$0xff] }
 0x2ac   :  { %1653 = vmatmul.mubr.f32.gmra.mrb[34].mxu1 %v1506_v46  ;;  %v1509_v21 = vmax.f32 %v1485_v50, 0.0  ;;  %v1516_v50 = vlaneseq }
 0x2ad   :  { %v1510_v25 = vmax.f32 %v1486_v0, 0.0  ;;  %v1285_v16 = vpop.f32.mrb[22].mxu1 }
 0x2ae   :  { %v1488_v18 = vadd.f32 %v9095_v54, %v1285_v16  ;;  %v1287_v42 = vpop.f32.mrb[23].mxu1 }
 0x2af   :  { %v1489_v19 = vadd.f32 %v9095_v54, %v1287_v42  ;;  %1658 = vmatprep.mubr.f32.mxu1 %v1510_v25  ;;  %v1814_v54 = vld [vmem:[%s10795_s1 + $0x38] sm:$0xff]  ;;  %v9214_v25 = vshrl.u32 %v1516_v50, 7 }
 0x2b0   :  { %1659 = vmatmul.mubr.f32.gmra.mrb[36].mxu1 %v1509_v21  ;;  %v1512_v44 = vmax.f32 %v1488_v18, 0.0 }
 0x2b1   :  { %v1513_v41 = vmax.f32 %v1489_v19, 0.0  ;;  %10857 = vst [vmem:[#allocation20_spill] sm:$0xff] %v9214_v25  ;;  %v10816_v18 = vsub.s32 0, %v9214_v25  ;;  %v121_v19 = vld [vmem:[%s10801_s7] sm:$0x3] }
 0x2b3   :  { %1664 = vmatprep.mubr.f32.mxu1 %v1513_v41  ;;  %v10819_v41 = vsub.s32 1, %v9214_v25 }
 0x2b4   :  { %1665 = vmatmul.mubr.f32.gmra.mrb[38].mxu1 %v1512_v44 }
 0x2b5   :  { %1982 = vmatprep.mubr.f32.mxu1 %v10808_v6  ;;  %v9241_v50 = vrot.slane %v121_v19, %v10819_v41 }
 0x2b8   :  { %6065 = vmatmul.mubr.msk.f32.vlgmr.msra.gmra.mrb[40].mxu1 %vm163_vm0, %v1813_v20 }
 0x2b9   :  { %6721 = vmatpush3.bf16.msra.mxu1 %v9131_v1  ;;  %1988 = vmatprep.mubr.f32.mxu1 %v10808_v6 }
 0x2ba   :  { %6415 = vmatprep.subr.msk.mxu1 %vm188_vm1, %v6056_v31 }
 0x2bc   :  { %6066 = vmatmul.mubr.msk.f32.gmra.mrb[42].mxu1 %vm163_vm0, %v1814_v54 }
 0x2bd   :  { %6416 = vmatpush3.msk.msra.mxu1 %vm188_vm1, %v6056_v31  ;;  %6417 = vmatprep.mubr.msk.f32.mxu1 %vm163_vm0, %v9107_v30  ;;  %v9234_v31 = vrot.slane %v121_v19, %v10816_v18 }
 0x2c0   :  { %6418 = vmatmul.mubr.msk.f32.vlgmr.msra.gmra.mrb[44].mxu1 %vm163_vm0, %v9117_v60 }
 0x2c1   :  { %6420 = vmatprep.mubr.msk.f32.mxu1 %vm163_vm0, %v9138_v57 }
 0x2c4   :  { %6421 = vmatmul.mubr.msk.f32.gmra.mrb[46].mxu1 %vm163_vm0, %v1810_v17 }
 0x2c5   :  { %6423 = vmatprep.mubr.msk.f32.mxu1 %vm163_vm0, %v1811_v14 }
 0x2c8   :  { %6424 = vmatmul.mubr.msk.f32.gmra.mrb[48].mxu1 %vm163_vm0, %v1812_v59 }
 0x2c9   :  { %6426 = vmatprep.mubr.msk.f32.mxu1 %vm163_vm0, %v1813_v20  ;;  %v1825_v20 = vld [vmem:[%s10796_s2] sm:$0xff] }
 0x2cc   :  { %6427 = vmatmul.mubr.msk.f32.gmra.mrb[50].mxu1 %vm163_vm0, %v1814_v54  ;;  %v1826_v54 = vld [vmem:[%s10796_s2 + $0x8] sm:$0xff] }
 0x2cd   :  { %2340 = vmatprep.mubr.f32.mxu1 %v10808_v6 }
 0x349   :  { %v1737_v1 = vpop.f32.mrb[24].mxu0 }
 0x34a   :  { %v1739_v30 = vpop.f32.mrb[25].mxu0 }
 0x34d   :  { %v1743_v51 = vpop.f32.mrb[26].mxu0 }
 0x34e   :  { %v1745_v5 = vpop.f32.mrb[27].mxu0 }
 0x351   :  { %v9198_v60 = vpop.f32.mrb[28].mxu0 }
 0x352   :  { %v9200_v46 = vpop.f32.mrb[29].mxu0 }
 0x355   :  { %v9202_v57 = vpop.f32.mrb[30].mxu0 }
 0x356   :  { %v9204_v17 = vpop.f32.mrb[31].mxu0 }
 0x359   :  { %v9206_v14 = vpop.f32.mrb[32].mxu0 }
 0x35a   :  { %v9208_v59 = vpop.f32.mrb[33].mxu0 }
 0x35d   :  { %v9210_v37 = vpop.f32.mrb[34].mxu0 }
 0x35e   :  { %v9212_v0 = vpop.f32.mrb[35].mxu0 }
 0x361   :  { %v9216_v16 = vpop.f32.mrb[36].mxu0 }
 0x362   :  { %v9218_v21 = vpop.f32.mrb[37].mxu0 }
 0x365   :  { %v9221_v42 = vpop.f32.mrb[38].mxu0 }
 0x366   :  { %v9227_v44 = vpop.f32.mrb[39].mxu0 }
 0x369   :  { %v1948_v6 = vpop.f32.mrb[40].mxu0 }
 0x36a   :  { %v1949_v26 = vadd.f32 %v1948_v6, %v1825_v20  ;;  %v1950_v49 = vpop.f32.mrb[41].mxu0 }
 0x36b   :  { %v1624_v10 = vpop.f32.mrb[24].mxu1  ;;  %v9243_v23 = vadd.f32 %v1950_v49, %v1826_v54 }
 0x36c   :  { %v1625_v18 = vadd.f32 %v1624_v10, %v9234_v31  ;;  %v1626_v29 = vpop.f32.mrb[25].mxu1  ;;  %v2100_v6 = vmax.f32 %v1949_v26, 0.0  ;;  %v1831_v10 = vld [vmem:[%s10796_s2 + $0x30] sm:$0xff] }
 0x36d   :  { %v1627_v19 = vadd.f32 %v1626_v29, %v9241_v50  ;;  %v1954_v41 = vpop.f32.mrb[42].mxu0  ;;  %v10827_v47 = vmax.f32 %v9243_v23, 0.0 }
 0x36e   :  { %v1738_v25 = vadd.f32 %v1737_v1, %v1625_v18  ;;  %v1955_v20 = vadd.f32 %v1954_v41, %v1828_v35  ;;  %v1956_v7 = vpop.f32.mrb[43].mxu0  ;;  %v1832_v35 = vld [vmem:[%s10796_s2 + $0x38] sm:$0xff] }
 0x36f   :  { %v1740_v49 = vadd.f32 %v1739_v30, %v1627_v19  ;;  %v1630_v54 = vpop.f32.mrb[26].mxu1  ;;  %v9254_v40 = vadd.f32 %v1956_v7, %v1829_v62 }
 0x370   :  { %1784 = vst [vmem:[#allocation2] sm:$0xff] %v1738_v25  ;;  %v1631_v53 = vadd.f32 %v1630_v54, %v9234_v31  ;;  %v1632_v45 = vpop.f32.mrb[27].mxu1  ;;  %v2103_v29 = vmax.f32 %v1955_v20, 0.0 }
 0x371   :  { %1785 = vst [vmem:[#allocation2 + $0x8] sm:$0xff] %v1740_v49  ;;  %v1633_v26 = vadd.f32 %v1632_v45, %v9241_v50  ;;  %v10828_v1 = vmax.f32 %v9254_v40, 0.0  ;;  %v1960_v62 = vpop.f32.mrb[44].mxu0  ;;  %v1834_v49 = vld [vmem:[%s10796_s2 + $0x48] sm:$0xff] }
 0x372   :  { %v1744_v7 = vadd.f32 %v1743_v51, %v1631_v53  ;;  %v9265_v30 = vpack.c.bf16 %v2103_v29, %v2100_v6  ;;  %v1961_v18 = vadd.f32 %v1960_v62, %v1831_v10  ;;  %v1962_v41 = vpop.f32.mrb[45].mxu0  ;;  %v9267_v25 = vpack.i.bf16 %v2103_v29, %v2100_v6 }
 0x373   :  { %v1746_v19 = vadd.f32 %v1745_v5, %v1633_v26  ;;  %v1636_v54 = vpop.f32.mrb[28].mxu1  ;;  %v9269_v20 = vadd.f32 %v1962_v41, %v1832_v35  ;;  %v9278_v45 = vpack.c.bf16 %v10828_v1, %v10827_v47  ;;  %v1835_v5 = vld [vmem:[%s10796_s2 + $0x50] sm:$0xff]  ;;  %v1837_v1 = vld [vmem:[%s10796_s2 + $0x60] sm:$0xff] }
 0x374   :  { %1787 = vst [vmem:[#allocation2 + $0x10] sm:$0xff] %v1744_v7  ;;  %v1637_v53 = vadd.f32 %v1636_v54, %v9234_v31  ;;  %v1638_v51 = vpop.f32.mrb[29].mxu1  ;;  %7645 = vrot.lane.b32.xlu1 %v9267_v25, %s7961_s15  ;;  %v2106_v35 = vmax.f32 %v1961_v18, 0.0 }
 0x375   :  { %1788 = vst [vmem:[#allocation2 + $0x18] sm:$0xff] %v1746_v19  ;;  %v1639_v6 = vadd.f32 %v1638_v51, %v9241_v50  ;;  %v1966_v10 = vpop.f32.mrb[46].mxu0  ;;  %v10830_v54 = vmax.f32 %v9269_v20, 0.0 }
 0x376   :  { %v1750_v29 = vadd.f32 %v9198_v60, %v1637_v53  ;;  %v1967_v26 = vadd.f32 %v1966_v10, %v1834_v49  ;;  %v1968_v62 = vpop.f32.mrb[47].mxu0  ;;  %v1838_v60 = vld [vmem:[%s10796_s2 + $0x68] sm:$0xff] }
 0x377   :  { %v1752_v7 = vadd.f32 %v9200_v46, %v1639_v6  ;;  %v1642_v41 = vpop.f32.mrb[30].mxu1  ;;  %v9290_v47 = vadd.f32 %v1968_v62, %v1835_v5 }
 0x378   :  { %1790 = vst [vmem:[#allocation2 + $0x20] sm:$0xff] %v1750_v29  ;;  %v1643_v19 = vadd.f32 %v1642_v41, %v9234_v31  ;;  %v1644_v51 = vpop.f32.mrb[31].mxu1  ;;  %v2109_v33 = vmax.f32 %v1967_v26, 0.0 }
 0x379   :  { %1791 = vst [vmem:[#allocation2 + $0x28] sm:$0xff] %v1752_v7  ;;  %v1645_v46 = vadd.f32 %v1644_v51, %v9241_v50  ;;  %v10831_v18 = vmax.f32 %v9290_v47, 0.0  ;;  %v1972_v49 = vpop.f32.mrb[48].mxu0  ;;  %v1840_v7 = vld [vmem:[%s10796_s2 + $0x78] sm:$0xff] }
 0x37a   :  { %v1756_v53 = vadd.f32 %v9202_v57, %v1643_v19  ;;  %v9302_v5 = vpack.c.bf16 %v2109_v33, %v2106_v35  ;;  %v1973_v6 = vadd.f32 %v1972_v49, %v1837_v1  ;;  %v1974_v10 = vpop.f32.mrb[49].mxu0  ;;  %v9304_v29 = vpack.i.bf16 %v2109_v33, %v2106_v35 }
 0x37b   :  { %v1758_v26 = vadd.f32 %v9204_v17, %v1645_v46  ;;  %v1648_v62 = vpop.f32.mrb[32].mxu1  ;;  %v9307_v41 = vadd.f32 %v1974_v10, %v1838_v60  ;;  %v9316_v57 = vpack.c.bf16 %v10831_v18, %v10830_v54  ;;  %v1841_v17 = vld [vmem:[%s10796_s2 + $0x80] sm:$0xff] }
 0x37c   :  { %1793 = vst [vmem:[#allocation2 + $0x30] sm:$0xff] %v1756_v53  ;;  %v1649_v1 = vadd.f32 %v1648_v62, %v9234_v31  ;;  %v1650_v33 = vpop.f32.mrb[33].mxu1  ;;  %7650 = vrot.lane.b32.xlu0 %v9304_v29, %s7961_s15  ;;  %v2112_v60 = vmax.f32 %v1973_v6, 0.0 }
 0x37d   :  { %1794 = vst [vmem:[#allocation2 + $0x38] sm:$0xff] %v1758_v26  ;;  %v1651_v35 = vadd.f32 %v1650_v33, %v9241_v50  ;;  %v1978_v19 = vpop.f32.mrb[50].mxu0  ;;  %v10833_v62 = vmax.f32 %v9307_v41, 0.0 }
 0x37e   :  { %v1762_v51 = vadd.f32 %v9206_v14, %v1649_v1  ;;  %v1979_v46 = vadd.f32 %v1978_v19, %v1840_v7  ;;  %v1980_v49 = vpop.f32.mrb[51].mxu0 }
 0x37f   :  { %v1764_v53 = vadd.f32 %v9208_v59, %v1651_v35  ;;  %v1654_v10 = vpop.f32.mrb[34].mxu1  ;;  %v9328_v54 = vadd.f32 %v1980_v49, %v1841_v17 }
 0x380   :  { %1796 = vst [vmem:[#allocation2 + $0x40] sm:$0xff] %v1762_v51  ;;  %v1655_v18 = vadd.f32 %v1654_v10, %v9234_v31  ;;  %v1656_v34 = vpop.f32.mrb[35].mxu1  ;;  %v2115_v26 = vmax.f32 %v1979_v46, 0.0 }
 0x381   :  { %1797 = vst [vmem:[#allocation2 + $0x48] sm:$0xff] %v1764_v53  ;;  %v1657_v33 = vadd.f32 %v1656_v34, %v9241_v50  ;;  %v10834_v14 = vmax.f32 %v9328_v54, 0.0 }
 0x382   :  { %v1768_v6 = vadd.f32 %v9210_v37, %v1655_v18  ;;  %v9334_v7 = vpack.c.bf16 %v2115_v26, %v2112_v60  ;;  %v9336_v59 = vpack.i.bf16 %v2115_v26, %v2112_v60  ;;  %v1843_v26 = vld [vmem:[%s10796_s2 + $0x90] sm:$0xff] }
 0x383   :  { %v1770_v1 = vadd.f32 %v9212_v0, %v1657_v33  ;;  %v1660_v17 = vpop.f32.mrb[36].mxu1  ;;  %v9343_v35 = vpack.c.bf16 %v10834_v14, %v10833_v62 }
 0x384   :  { %1799 = vst [vmem:[#allocation2 + $0x50] sm:$0xff] %v1768_v6  ;;  %v1661_v34 = vadd.f32 %v1660_v17, %v9234_v31  ;;  %v1662_v19 = vpop.f32.mrb[37].mxu1  ;;  %7655 = vrot.lane.b32.xlu1 %v9336_v59, %s7961_s15  ;;  %v1846_v6 = vld [vmem:[%s10796_s2 + $0xa8] sm:$0xff] }
 0x385   :  { %1800 = vst [vmem:[#allocation2 + $0x58] sm:$0xff] %v1770_v1  ;;  %v1663_v37 = vadd.f32 %v1662_v19, %v9241_v50 }
 0x386   :  { %v1774_v18 = vadd.f32 %v9216_v16, %v1661_v34  ;;  %v1844_v16 = vld [vmem:[%s10796_s2 + $0x98] sm:$0xff] }
 0x387   :  { %v1776_v0 = vadd.f32 %v9218_v21, %v1663_v37  ;;  %v1666_v51 = vpop.f32.mrb[38].mxu1 }
 0x388   :  { %1802 = vst [vmem:[#allocation2 + $0x60] sm:$0xff] %v1774_v18  ;;  %v1667_v60 = vadd.f32 %v1666_v51, %v9234_v31  ;;  %v1668_v46 = vpop.f32.mrb[39].mxu1  ;;  %v1830_v18 = vld [vmem:[%s10796_s2 + $0x28] sm:$0xff] }
 0x389   :  { %1803 = vst [vmem:[#allocation2 + $0x68] sm:$0xff] %v1776_v0  ;;  %v1669_v49 = vadd.f32 %v1668_v46, %v9241_v50 }
 0x38a   :  { %v1780_v53 = vadd.f32 %v9221_v42, %v1667_v60  ;;  %v1847_v42 = vld [vmem:[%s10796_s2 + $0xb0] sm:$0xff] }
 0x38b   :  { %v1782_v10 = vadd.f32 %v9227_v44, %v1669_v49  ;;  %v1984_v33 = vpop.f32.mrb[40].mxu1  ;;  %v1827_v60 = vld [vmem:[%s10796_s2 + $0x10] sm:$0xff] }
 0x38c   :  { %1805 = vst [vmem:[#allocation2 + $0x70] sm:$0xff] %v1780_v53  ;;  %v1986_v21 = vpop.f32.mrb[41].mxu1  ;;  %v1985_v1 = vadd.f32 %v1984_v33, %v1843_v26 }
 0x38d   :  { %1806 = vst [vmem:[#allocation2 + $0x78] sm:$0xff] %v1782_v10  ;;  %v9367_v44 = vadd.f32 %v1986_v21, %v1844_v16 }
 0x38e   :  { %v2118_v0 = vmax.f32 %v1985_v1, 0.0 }
 0x38f   :  { %v1990_v17 = vpop.f32.mrb[42].mxu1  ;;  %v2119_v46 = vmax.f32 %v9367_v44, 0.0  ;;  %v1833_v44 = vld [vmem:[%s10796_s2 + $0x40] sm:$0xff] }
 0x390   :  { %v1991_v34 = vadd.f32 %v1990_v17, %v1846_v6  ;;  %v1992_v19 = vpop.f32.mrb[43].mxu1  ;;  %v1836_v6 = vld [vmem:[%s10796_s2 + $0x58] sm:$0xff] }
 0x391   :  { %v1993_v37 = vadd.f32 %v1992_v19, %v1847_v42 }
 0x392   :  { %v2121_v51 = vmax.f32 %v1991_v34, 0.0 }
 0x393   :  { %v2122_v49 = vmax.f32 %v1993_v37, 0.0  ;;  %v6419_v53 = vpop.f32.mrb[44].mxu1 }
 0x394   :  { %v9376_v10 = vpack.c.bf16 %v2121_v51, %v2118_v0  ;;  %v2067_v26 = vadd.f32 %v6419_v53, %v1830_v18  ;;  %v2061_v33 = vpop.f32.mrb[45].mxu1  ;;  %v9378_v16 = vpack.i.bf16 %v2121_v51, %v2118_v0  ;;  %v10858_v18 = vmax.f32 %v9254_v40, 0.0 }
 0x395   :  { %v2062_v21 = vadd.f32 %v2061_v33, %v1827_v60  ;;  %v9383_v1 = vpack.c.bf16 %v2122_v49, %v2119_v46  ;;  %v1842_v60 = vld [vmem:[%s10796_s2 + $0x88] sm:$0xff]  ;;  %v10859_v53 = vmax.f32 %v9243_v23, 0.0 }
 0x396   :  { %v2105_v42 = vmax.f32 %v2067_v26, 0.0 }
 0x397   :  { %v2102_v17 = vmax.f32 %v2062_v21, 0.0  ;;  %v6422_v34 = vpop.f32.mrb[46].mxu1  ;;  %v1839_v21 = vld [vmem:[%s10796_s2 + $0x70] sm:$0xff] }
 0x398   :  { %v2077_v19 = vadd.f32 %v6422_v34, %v1836_v6  ;;  %v2071_v37 = vpop.f32.mrb[47].mxu1  ;;  %v7659_v0 = vpack.i.bf16 %v2105_v42, %v10858_v18 }
 0x399   :  { %v2072_v51 = vadd.f32 %v2071_v37, %v1833_v44  ;;  %v7664_v33 = vpack.i.bf16 %v2102_v17, %v10859_v53  ;;  %v9395_v26 = vpack.c.bf16 %v2105_v42, %v2102_v17  ;;  %v10860_v37 = vmax.f32 %v9290_v47, 0.0  ;;  %v1848_v42 = vld [vmem:[%s10796_s2 + $0xb8] sm:$0xff] }
 0x39a   :  { %v2111_v62 = vmax.f32 %v2077_v19, 0.0  ;;  %7660 = vrot.lane.b32.xlu0 %v7659_v0, %s7961_s15  ;;  %v10861_v17 = vmax.f32 %v9269_v20, 0.0 }
 0x39b   :  { %v2108_v6 = vmax.f32 %v2072_v51, 0.0  ;;  %v6425_v40 = vpop.f32.mrb[48].mxu1  ;;  %7665 = vrot.lane.b32.xlu1 %v7664_v33, %s7961_s15  ;;  %v1845_v51 = vld [vmem:[%s10796_s2 + $0xa0] sm:$0xff] }
 0x39c   :  { %v2087_v44 = vadd.f32 %v6425_v40, %v1842_v60  ;;  %v2081_v34 = vpop.f32.mrb[49].mxu1  ;;  %v7669_v18 = vpack.i.bf16 %v2111_v62, %v10860_v37 }
 0x39d   :  { %v2082_v23 = vadd.f32 %v2081_v34, %v1839_v21  ;;  %v7674_v19 = vpack.i.bf16 %v2108_v6, %v10861_v17  ;;  %v9409_v53 = vpack.c.bf16 %v2111_v62, %v2108_v6  ;;  %v10862_v34 = vmax.f32 %v9328_v54, 0.0 }
 0x39e   :  { %v2117_v14 = vmax.f32 %v2087_v44, 0.0  ;;  %v10863_v62 = vmax.f32 %v9307_v41, 0.0  ;;  %v9423_v44 = vld [vmem:[%s10797_s3 + $0x40] sm:$0xff] }
 0x39f   :  { %v2114_v60 = vmax.f32 %v2082_v23, 0.0  ;;  %v6428_v40 = vpop.f32.mrb[50].mxu1  ;;  %7675 = vrot.lane.b32.xlu0 %v7674_v19, %s7961_s15  ;;  %7670 = vrot.lane.b32.xlu1 %v7669_v18, %s7961_s15 }
 0x3a0   :  { %v2097_v47 = vadd.f32 %v6428_v40, %v1848_v42  ;;  %v2091_v21 = vpop.f32.mrb[51].mxu1  ;;  %v7679_v37 = vpack.i.bf16 %v2117_v14, %v10862_v34  ;;  %6445 = vmatprep.mubr.msk.f32.mxu0 %vm570_vm2, %v9423_v44 }
 0x3a1   :  { %v2092_v20 = vadd.f32 %v2091_v21, %v1845_v51  ;;  %v7684_v6 = vpack.i.bf16 %v2114_v60, %v10863_v62  ;;  %v9425_v23 = vpack.c.bf16 %v2117_v14, %v2114_v60  ;;  %v3099_v14 = vld [vmem:[%s10798_s4 + $0x8] sm:$0xff] }
 0x3a2   :  { %v2123_v17 = vmax.f32 %v2097_v47, 0.0 }
 0x3a3   :  { %v2120_v42 = vmax.f32 %v2092_v20, 0.0  ;;  %7680 = vrot.lane.b32.xlu0 %v7679_v37, %s7961_s15  ;;  %7685 = vrot.lane.b32.xlu1 %v7684_v6, %s7961_s15 }
 0x3a4   :  { %v7689_v54 = vpack.i.bf16 %v2123_v17, %v2122_v49  ;;  %v3104_v49 = vld [vmem:[%s10798_s4 + $0x30] sm:$0xff] }
 0x3a5   :  { %v7694_v51 = vpack.i.bf16 %v2120_v42, %v2119_v46  ;;  %v9431_v41 = vpack.c.bf16 %v2123_v17, %v2120_v42  ;;  %v3101_v46 = vld [vmem:[%s10798_s4 + $0x18] sm:$0xff] }
 0x3a7   :  { %7690 = vrot.lane.b32.xlu1 %v7689_v54, %s7961_s15  ;;  %7695 = vrot.lane.b32.xlu0 %v7694_v51, %s7961_s15 }
 0x3ab   :  { %7705 = vrot.lane.b32.xlu1 %v7664_v33, %s7962_s26  ;;  %7700 = vrot.lane.b32.xlu0 %v9378_v16, %s7961_s15 }
 0x3af   :  { %7715 = vrot.lane.b32.xlu1 %v9267_v25, %s7962_s26  ;;  %7710 = vrot.lane.b32.xlu0 %v7659_v0, %s7962_s26  ;;  %v3098_v25 = vld [vmem:[%s10798_s4] sm:$0xff]  ;;  %v3105_v0 = vld [vmem:[%s10798_s4 + $0x38] sm:$0xff] }
 0x3b3   :  { %7725 = vrot.lane.b32.xlu1 %v7669_v18, %s7962_s26  ;;  %7720 = vrot.lane.b32.xlu0 %v7674_v19, %s7962_s26 }
 0x3b7   :  { %7735 = vrot.lane.b32.xlu1 %v7684_v6, %s7962_s26  ;;  %7730 = vrot.lane.b32.xlu0 %v9304_v29, %s7962_s26  ;;  %v3100_v29 = vld [vmem:[%s10798_s4 + $0x10] sm:$0xff] }
 0x3bb   :  { %7745 = vrot.lane.b32.xlu1 %v9336_v59, %s7962_s26  ;;  %7740 = vrot.lane.b32.xlu0 %v7679_v37, %s7962_s26  ;;  %v3102_v59 = vld [vmem:[%s10798_s4 + $0x20] sm:$0xff] }
 0x3bf   :  { %7750 = vrot.lane.b32.xlu1 %v7689_v54, %s7962_s26  ;;  %7755 = vrot.lane.b32.xlu0 %v7694_v51, %s7962_s26 }
 0x3c3   :  { %3108 = vperm.xlu1 %7643, %v3098_v25   ;;  %7760 = vrot.lane.b32.xlu0 %v9378_v16, %s7962_s26  ;;  %v3103_v16 = vld [vmem:[%s10798_s4 + $0x28] sm:$0xff] }
 0x3c7   :  { %3118 = vperm.xlu1 %7643, %v3100_v29   ;;  %3113 = vperm.xlu0 %7642, %v3099_v14  }
 0x3cb   :  { %3128 = vperm.xlu1 %7643, %v3102_v59   ;;  %3123 = vperm.xlu0 %7642, %v3101_v46  }
 0x3cf   :  { %3138 = vperm.xlu1 %7643, %v3104_v49   ;;  %3133 = vperm.xlu0 %7642, %v3103_v16  }
 0x3d3   :  { %3143 = vperm.xlu0 %7642, %v3105_v0  }
 0x3e6   :  { %v7646_v33 = vpop.permute.xlu1 %7645 }
 0x3e7   :  { %v7648_v40 = vunpack.i.h.bf16 %v7646_v33  ;;  %v7647_v37 = vunpack.i.l.bf16 %v7646_v33 }
 0x3ee   :  { %v7651_v19 = vpop.permute.xlu0 %7650 }
 0x3ef   :  { %v7653_v25 = vunpack.i.h.bf16 %v7651_v19  ;;  %v7652_v29 = vunpack.i.l.bf16 %v7651_v19 }
 0x3f6   :  { %v7656_v18 = vpop.permute.xlu1 %7655 }
 0x3f7   :  { %v7658_v19 = vunpack.i.h.bf16 %v7656_v18 }
 0x40c   :  { %v7661_v60 = vpop.permute.xlu0 %7660 }
 0x40d   :  { %v7663_v47 = vunpack.i.h.bf16 %v7661_v60  ;;  %v7662_v21 = vunpack.i.l.bf16 %v7661_v60  ;;  %v7666_v34 = vpop.permute.xlu1 %7665 }
 0x40e   :  { %v7668_v20 = vunpack.i.h.bf16 %v7666_v34  ;;  %v7667_v62 = vunpack.i.l.bf16 %v7666_v34 }
 0x40f   :  { %v2214_v6 = vsel %vm529_vm3, %v7648_v40, %v7662_v21  ;;  %v2215_v17 = vsel %vm529_vm3, %v7662_v21, %v7663_v47 }
 0x410   :  { %v6738_v42 = vpack.c.bf16 %v7663_v47, %v7668_v20  ;;  %v2212_v54 = vsel %vm529_vm3, %v7647_v37, %v7667_v62  ;;  %v2213_v51 = vsel %vm529_vm3, %v7667_v62, %v7668_v20  ;;  %v7657_v37 = vunpack.i.l.bf16 %v7656_v18 }
 0x411   :  { %v6724_v14 = vpack.c.bf16 %v2214_v6, %v2212_v54  ;;  %v7676_v59 = vpop.permute.xlu0 %7675  ;;  %v7671_v46 = vpop.permute.xlu1 %7670  ;;  %v6722_v49 = vpack.c.bf16 %v2215_v17, %v2213_v51 }
 0x412   :  { %v7678_v16 = vunpack.i.h.bf16 %v7676_v59  ;;  %v7677_v0 = vunpack.i.l.bf16 %v7676_v59  ;;  %v7673_v33 = vunpack.i.h.bf16 %v7671_v46  ;;  %v7672_v60 = vunpack.i.l.bf16 %v7671_v46  ;;  %6739 = vmatprep.subr.bf16.mxu0 %v6738_v42 }
 0x413   :  { %6723 = vmatprep.subr.bf16.mxu1 %v6722_v49  ;;  %6741 = vmatpush3.bf16.msra.mxu0 %v6738_v42 }
 0x414   :  { %v2216_v40 = vsel %vm529_vm3, %v7652_v29, %v7677_v0  ;;  %v6742_v47 = vpack.c.bf16 %v7673_v33, %v7678_v16  ;;  %v2218_v21 = vsel %vm529_vm3, %v7653_v25, %v7672_v60  ;;  %6725 = vmatpush1.bf16.msra.mxu1 %v6724_v14  ;;  %v2217_v34 = vsel %vm529_vm3, %v7677_v0, %v7678_v16 }
 0x415   :  { %v6728_v20 = vpack.c.bf16 %v2218_v21, %v2216_v40  ;;  %v7681_v62 = vpop.permute.xlu0 %7680  ;;  %v7686_v6 = vpop.permute.xlu1 %7685  ;;  %v2219_v17 = vsel %vm529_vm3, %v7672_v60, %v7673_v33 }
 0x416   :  { %v7683_v54 = vunpack.i.h.bf16 %v7681_v62  ;;  %v7682_v51 = vunpack.i.l.bf16 %v7681_v62  ;;  %v7688_v59 = vunpack.i.h.bf16 %v7686_v6  ;;  %v7687_v46 = vunpack.i.l.bf16 %v7686_v6  ;;  %6743 = vmatprep.subr.bf16.mxu0 %v6742_v47 }
 0x417   :  { %v6726_v42 = vpack.c.bf16 %v2219_v17, %v2217_v34  ;;  %6745 = vmatpush3.bf16.msra.mxu0 %v6742_v47 }
 0x418   :  { %v2222_v29 = vsel %vm529_vm3, %v7658_v19, %v7682_v51  ;;  %v6746_v25 = vpack.c.bf16 %v7683_v54, %v7688_v59  ;;  %v2220_v14 = vsel %vm529_vm3, %v7657_v37, %v7687_v46  ;;  %v2221_v49 = vsel %vm529_vm3, %v7687_v46, %v7688_v59 }
 0x419   :  { %v6732_v18 = vpack.c.bf16 %v2222_v29, %v2220_v14  ;;  %6727 = vmatprep.subr.bf16.mxu1 %v6726_v42  ;;  %v7691_v16 = vpop.permute.xlu1 %7690  ;;  %v7696_v0 = vpop.permute.xlu0 %7695  ;;  %v2223_v33 = vsel %vm529_vm3, %v7682_v51, %v7683_v54  ;;  %v6077_v51 = vld [vmem:[%s10797_s3 + $0x48] sm:$0xff] }
 0x41a   :  { %6729 = vmatpush1.bf16.msra.mxu1 %v6728_v20  ;;  %v7693_v60 = vunpack.i.h.bf16 %v7691_v16  ;;  %v7692_v40 = vunpack.i.l.bf16 %v7691_v16  ;;  %v7698_v21 = vunpack.i.h.bf16 %v7696_v0  ;;  %v7697_v62 = vunpack.i.l.bf16 %v7696_v0  ;;  %6747 = vmatprep.subr.bf16.mxu0 %v6746_v25 }
 0x41b   :  { %v6730_v47 = vpack.c.bf16 %v2223_v33, %v2221_v49  ;;  %6749 = vmatpush3.bf16.msra.mxu0 %v6746_v25  ;;  %v6078_v49 = vld [vmem:[%s10797_s3 + $0x50] sm:$0xff] }
 0x41c   :  { %v6750_v34 = vpack.c.bf16 %v7693_v60, %v7698_v21  ;;  %v2225_v19 = vsel %vm529_vm3, %v7697_v62, %v7698_v21  ;;  %v2227_v37 = vsel %vm529_vm3, %v7692_v40, %v7693_v60  ;;  %v10864_v60 = vmov 0.0  }
 0x41d   :  { %6731 = vmatprep.subr.bf16.mxu1 %v6730_v47  ;;  %v9491_v6 = vpop.permute.xlu1 %7705  ;;  %v7701_v17 = vpop.permute.xlu0 %7700  ;;  %v6734_v59 = vpack.c.bf16 %v2227_v37, %v2225_v19  ;;  %v9582_v37 = vld [vmem:[%s10797_s3 + $0x8] sm:$0xff] }
 0x41e   :  { %6733 = vmatpush1.bf16.msra.mxu1 %v6732_v18  ;;  %v7703_v54 = vunpack.i.h.bf16 %v7701_v17  ;;  %v7702_v20 = vunpack.i.l.bf16 %v7701_v17  ;;  %6751 = vmatprep.subr.bf16.mxu0 %v6750_v34  ;;  %v6079_v18 = vld [vmem:[%s10797_s3 + $0x58] sm:$0xff]  ;;  %v7708_v21 = vunpack.i.h.bf16 %v9491_v6 }
 0x41f   :  { %6735 = vmatprep.subr.bf16.mxu1 %v6734_v59  ;;  %6753 = vmatpush3.bf16.msra.mxu0 %v6750_v34 }
 0x420   :  { %v2226_v46 = vsel %vm529_vm3, %v7703_v54, %v7692_v40  ;;  %v2224_v42 = vsel %vm529_vm3, %v7702_v20, %v7697_v62  ;;  %6771 = vmatprep.subr.bf16.mxu0 %v9395_v26  ;;  %v9554_v40 = vld [vmem:[%s10797_s3 + $0x78] sm:$0xff]  ;;  %v7707_v62 = vunpack.i.l.bf16 %v9491_v6  ;;  %v9605_v54 = vld [vmem:[%s10797_s3 + $0x10] sm:$0xff] }
 0x421   :  { %v6736_v29 = vpack.c.bf16 %v2226_v46, %v2224_v42  ;;  %v9499_v25 = vpop.permute.xlu1 %7715  ;;  %v9501_v14 = vpop.permute.xlu0 %7710  ;;  %v9615_v46 = vld [vmem:[%s10797_s3 + $0x18] sm:$0xff] }
 0x422   :  { %6446 = vmatmul.mubr.msk.f32.vlgmr.msra.gmra.mrb[52].mxu0 %vm570_vm2, %v6077_v51  ;;  %v9710_v6 = vld [vmem:[%s10797_s3 + $0x98] sm:$0xff] }
 0x423   :  { %6737 = vmatpush1.bf16.msra.mxu1 %v6736_v29  ;;  %6773 = vmatpush3.bf16.msra.mxu0 %v9395_v26  ;;  %v6080_v26 = vld [vmem:[%s10797_s3 + $0x60] sm:$0xff] }
 0x424   :  { %6755 = vmatprep.subr.bf16.mxu1 %v9278_v45  ;;  %6775 = vmatprep.subr.bf16.mxu0 %v9409_v53  ;;  %v9529_v45 = vld [vmem:[%s10797_s3 + $0x68] sm:$0xff]  ;;  %v9624_v29 = vld [vmem:[%s10797_s3 + $0x20] sm:$0xff] }
 0x425   :  { %v9513_v16 = vpop.permute.xlu1 %7725  ;;  %6448 = vmatprep.mubr.msk.f32.mxu0 %vm570_vm2, %v6078_v49  ;;  %v9516_v0 = vpop.permute.xlu0 %7720 }
 0x426   :  { %6084 = vmatmul.mubr.msk.f32.vlgmr.msra.gmra.mrb[52].mxu1 %vm570_vm2, %v9423_v44  ;;  %6449 = vmatmul.mubr.msk.f32.gmra.mrb[54].mxu0 %vm570_vm2, %v6079_v18  ;;  %v7728_v34 = vunpack.i.h.bf16 %v9513_v16  ;;  %v7723_v19 = vunpack.i.h.bf16 %v9516_v0 }
 0x427   :  { %6757 = vmatpush1.bf16.msra.mxu1 %v9265_v30  ;;  %6777 = vmatpush3.bf16.msra.mxu0 %v9409_v53  ;;  %v7713_v30 = vunpack.i.h.bf16 %v9501_v14  ;;  %v7712_v53 = vunpack.i.l.bf16 %v9501_v14 }
 0x428   :  { %6759 = vmatprep.subr.bf16.mxu1 %v9316_v57  ;;  %6779 = vmatprep.subr.bf16.mxu0 %v9425_v23  ;;  %v9546_v57 = vld [vmem:[%s10797_s3 + $0x70] sm:$0xff] }
 0x429   :  { %v9533_v44 = vpop.permute.xlu1 %7735  ;;  %6451 = vmatprep.mubr.msk.f32.mxu0 %vm570_vm2, %v6080_v26  ;;  %v9536_v33 = vpop.permute.xlu0 %7730  ;;  %2346 = vmatprep.mubr.f32.mxu1 %v10864_v60  ;;  %v2795_v17 = vsel %vm1112_vm4, %v7712_v53, %v7713_v30 }
 0x42a   :  { %6085 = vmatmul.mubr.msk.f32.gmra.mrb[54].mxu1 %vm570_vm2, %v6077_v51  ;;  %6452 = vmatmul.mubr.msk.f32.gmra.mrb[56].mxu0 %vm570_vm2, %v9529_v45  ;;  %v7738_v42 = vunpack.i.h.bf16 %v9533_v44 }
 0x42b   :  { %6761 = vmatpush1.bf16.msra.mxu1 %v9302_v5  ;;  %6781 = vmatpush3.bf16.msra.mxu0 %v9425_v23  ;;  %v6802_v23 = vpack.c.bf16 %v7713_v30, %v7708_v21  ;;  %v9639_v30 = vld [vmem:[%s10797_s3 + $0x28] sm:$0xff] }
 0x42c   :  { %6763 = vmatprep.subr.bf16.mxu1 %v9343_v35  ;;  %6783 = vmatprep.subr.bf16.mxu0 %v9431_v41  ;;  %v9575_v35 = vld [vmem:[%s10797_s3] sm:$0xff] }
 0x42d   :  { %v9560_v47 = vpop.permute.xlu1 %7745  ;;  %6454 = vmatprep.mubr.msk.f32.mxu0 %vm570_vm2, %v9546_v57  ;;  %v9564_v5 = vpop.permute.xlu0 %7740  ;;  %2352 = vmatprep.mubr.f32.mxu1 %v10864_v60 }
 0x42e   :  { %6086 = vmatmul.mubr.msk.f32.gmra.mrb[56].mxu1 %vm570_vm2, %v6078_v49  ;;  %6455 = vmatmul.mubr.msk.f32.gmra.mrb[58].mxu0 %vm570_vm2, %v9554_v40  ;;  %v7743_v59 = vunpack.i.h.bf16 %v9564_v5 }
 0x42f   :  { %6765 = vmatpush1.bf16.msra.mxu1 %v9334_v7  ;;  %6785 = vmatpush3.bf16.msra.mxu0 %v9431_v41  ;;  %v2793_v7 = vsel %vm1112_vm4, %v7707_v62, %v7708_v21  ;;  %v6806_v41 = vpack.c.bf16 %v7728_v34, %v7723_v19  ;;  %v9646_v21 = vld [vmem:[%s10797_s3 + $0x30] sm:$0xff] }
 0x430   :  { %6767 = vmatprep.subr.bf16.mxu1 %v9383_v1  ;;  %6803 = vmatprep.subr.bf16.mxu0 %v6802_v23  ;;  %v6786_v1 = vpack.c.bf16 %v2795_v17, %v2793_v7  ;;  %v9667_v17 = vld [vmem:[%s10797_s3 + $0x80] sm:$0xff]  ;;  %v7717_v7 = vunpack.i.l.bf16 %v9499_v25 }
 0x431   :  { %6473 = vmatprep.mubr.msk.f32.mxu0 %vm570_vm2, %v9575_v35  ;;  %2358 = vmatprep.mubr.f32.mxu1 %v10864_v60  ;;  %v9607_v20 = vpop.permute.xlu1 %7750  ;;  %v9609_v51 = vpop.permute.xlu0 %7755 }
 0x432   :  { %6087 = vmatmul.mubr.msk.f32.gmra.mrb[58].mxu1 %vm570_vm2, %v6079_v18  ;;  %6474 = vmatmul.mubr.msk.f32.vlgmr.msra.gmra.mrb[52].mxu0 %vm570_vm2, %v9582_v37  ;;  %v10835_v49 = vunpack.i.h.bf16 %v9607_v20  ;;  %v10836_v18 = vunpack.i.h.bf16 %v9609_v51 }
 0x433   :  { %6769 = vmatpush1.bf16.msra.mxu1 %v9376_v10  ;;  %6805 = vmatpush3.bf16.msra.mxu0 %v6802_v23  ;;  %v6810_v10 = vpack.c.bf16 %v7743_v59, %v7738_v42  ;;  %v9660_v23 = vld [vmem:[%s10797_s3 + $0x38] sm:$0xff] }
 0x434   :  { %6787 = vmatprep.subr.bf16.mxu1 %v6786_v1  ;;  %6807 = vmatprep.subr.bf16.mxu0 %v6806_v41  ;;  %v7722_v1 = vunpack.i.l.bf16 %v9516_v0 }
 0x435   :  { %6476 = vmatprep.mubr.msk.f32.mxu0 %vm570_vm2, %v9605_v54  ;;  %2364 = vmatprep.mubr.f32.mxu1 %v10864_v60 }
 0x436   :  { %6088 = vmatmul.mubr.msk.f32.gmra.mrb[60].mxu1 %vm570_vm2, %v6080_v26  ;;  %6477 = vmatmul.mubr.msk.f32.gmra.mrb[54].mxu0 %vm570_vm2, %v9615_v46  ;;  %v6814_v26 = vpack.c.bf16 %v10835_v49, %v10836_v18  ;;  %v7733_v49 = vunpack.i.h.bf16 %v9536_v33  ;;  %v7732_v18 = vunpack.i.l.bf16 %v9536_v33  ;;  %v2797_v14 = vsel %vm1112_vm4, %v7722_v1, %v7723_v19 }
 0x437   :  { %6809 = vmatpush3.bf16.msra.mxu0 %v6806_v41  ;;  %2370 = vmatprep.mubr.f32.mxu1 %v10864_v60  ;;  %v7727_v41 = vunpack.i.l.bf16 %v9513_v16  ;;  %v7752_v19 = vunpack.i.l.bf16 %v9607_v20 }
 0x438   :  { %6811 = vmatprep.subr.bf16.mxu0 %v6810_v10  ;;  %6479 = vmatprep.mubr.msk.f32.mxu0 %vm570_vm2, %v9624_v29  ;;  %v2796_v16 = vsel %vm1112_vm4, %v7732_v18, %v7722_v1 }
 0x439   :  { %v2799_v33 = vsel %vm1112_vm4, %v7727_v41, %v7728_v34  ;;  %v2798_v0 = vsel %vm1112_vm4, %v7733_v49, %v7727_v41  ;;  %v7748_v34 = vunpack.i.h.bf16 %v9560_v47  ;;  %v9754_v41 = vld [vmem:[%s10797_s3 + $0xb0] sm:$0xff] }
 0x43a   :  { %6089 = vmatmul.mubr.msk.f32.gmra.mrb[62].mxu1 %vm570_vm2, %v9529_v45  ;;  %6480 = vmatmul.mubr.msk.f32.gmra.mrb[56].mxu0 %vm570_vm2, %v9639_v30  ;;  %v7718_v45 = vunpack.i.h.bf16 %v9499_v25  ;;  %v9688_v25 = vld [vmem:[%s10797_s3 + $0x90] sm:$0xff] }
 0x43b   :  { %6813 = vmatpush3.bf16.msra.mxu0 %v6810_v10  ;;  %2376 = vmatprep.mubr.f32.mxu1 %v10864_v60  ;;  %v9681_v10 = vld [vmem:[%s10797_s3 + $0x88] sm:$0xff] }
 0x43c   :  { %6815 = vmatprep.subr.bf16.mxu0 %v6814_v26  ;;  %6482 = vmatprep.mubr.msk.f32.mxu0 %vm570_vm2, %v9646_v21 }
 0x43e   :  { %6090 = vmatmul.mubr.msk.f32.gmra.mrb[64].mxu1 %vm570_vm2, %v9546_v57  ;;  %6483 = vmatmul.mubr.msk.f32.gmra.mrb[58].mxu0 %vm570_vm2, %v9660_v23  ;;  %v2792_v57 = vsel %vm1112_vm4, %v7717_v7, %v7707_v62  ;;  %v7747_v62 = vunpack.i.l.bf16 %v9560_v47  ;;  %v7757_v7 = vunpack.i.l.bf16 %v9609_v51 }
 0x43f   :  { %6817 = vmatpush3.bf16.msra.mxu0 %v6814_v26  ;;  %2382 = vmatprep.mubr.f32.mxu1 %v10864_v60  ;;  %v2794_v26 = vsel %vm1112_vm4, %v7718_v45, %v7712_v53  ;;  %v9724_v45 = vld [vmem:[%s10797_s3 + $0xa0] sm:$0xff] }
 0x440   :  { %6501 = vmatprep.mubr.msk.f32.mxu0 %vm570_vm2, %v9667_v17  ;;  %6819 = vmatprep.subr.bf16.mxu0 %v8689_v28  ;;  %v7742_v28 = vunpack.i.l.bf16 %v9564_v5  ;;  %v6788_v53 = vpack.c.bf16 %v2794_v26, %v2792_v57  ;;  %v7761_v57 = vpop.permute.xlu0 %7760 }
 0x441   :  { %v7762_v1 = vunpack.i.l.bf16 %v7761_v57 }
 0x442   :  { %6091 = vmatmul.mubr.msk.f32.gmra.mrb[66].mxu1 %vm570_vm2, %v9554_v40  ;;  %6502 = vmatmul.mubr.msk.f32.vlgmr.msra.gmra.mrb[52].mxu0 %vm570_vm2, %v9681_v10  ;;  %v7737_v40 = vunpack.i.l.bf16 %v9533_v44  ;;  %v2803_v47 = vsel %vm1112_vm4, %v7742_v28, %v7743_v59  ;;  %v2802_v5 = vsel %vm1112_vm4, %v7748_v34, %v7742_v28  ;;  %v7763_v59 = vunpack.i.h.bf16 %v7761_v57  ;;  %v10877_v57 = vld [vmem:[#allocation9_spill] sm:$0xff] }
 0x443   :  { %2582 = vmatprep.mubr.f32.mxu1 %v10864_v60  ;;  %6504 = vmatprep.mubr.msk.f32.mxu0 %vm570_vm2, %v9688_v25  ;;  %v10866_v28 = vunpack.i.h.bf16 %v9607_v20 }
 0x444   :  { %6821 = vmatpush1.bf16.msra.mxu0 %v8722_v9  ;;  %v6790_v9 = vpack.c.bf16 %v2799_v33, %v2797_v14  ;;  %v2800_v49 = vsel %vm1112_vm4, %v7747_v62, %v7737_v40  ;;  %v2801_v18 = vsel %vm1112_vm4, %v7737_v40, %v7738_v42  ;;  %v9766_v42 = vld [vmem:[%s10797_s3 + $0xb8] sm:$0xff]  ;;  %v2806_v33 = vsel %vm1112_vm4, %v7763_v59, %v7752_v19  ;;  %v10875_v40 = vld [vmem:[#allocation7_spill] sm:$0xff] }
 0x445   :  { %6823 = vmatprep.subr.bf16.mxu0 %v8724_v43  ;;  %v9740_v43 = vld [vmem:[%s10797_s3 + $0xa8] sm:$0xff]  ;;  %v6794_v44 = vpack.c.bf16 %v2803_v47, %v2801_v18  ;;  %v6796_v14 = vpack.c.bf16 %v2802_v5, %v2800_v49 }
 0x446   :  { %6100 = vmatmul.mubr.msk.f32.vlgmr.msra.gmra.mrb[52].mxu1 %vm570_vm2, %v9575_v35  ;;  %6505 = vmatmul.mubr.msk.f32.gmra.mrb[54].mxu0 %vm570_vm2, %v9710_v6  ;;  %v6792_v35 = vpack.c.bf16 %v2798_v0, %v2796_v16  ;;  %v10876_v16 = vld [vmem:[#allocation8_spill] sm:$0xff]  ;;  %v10878_v49 = vld [vmem:[#allocation10_spill] sm:$0xff] }
 0x447   :  { %6789 = vmatpush1.bf16.msra.mxu1 %v6788_v53  ;;  %2588 = vmatprep.mubr.f32.mxu1 %v10864_v60  ;;  %v2804_v53 = vsel %vm1112_vm4, %v7762_v1, %v7757_v7  ;;  %v9982_v18 = vld [vmem:[%s10800_s6 + $0x68] sm:$0xff] }
 0x448   :  { %6791 = vmatprep.subr.bf16.mxu1 %v6790_v9  ;;  %6507 = vmatprep.mubr.msk.f32.mxu0 %vm570_vm2, %v9724_v45  ;;  %10891 = vst [vmem:[#allocation9_spill] sm:$0xff] %v9982_v18 }
 0x449   :  { %6825 = vmatpush1.bf16.msra.mxu0 %v8742_v2  ;;  %v10865_v2 = vunpack.i.h.bf16 %v9609_v51  ;;  %v6800_v51 = vpack.c.bf16 %v2806_v33, %v2804_v53 }
 0x44a   :  { %6101 = vmatmul.mubr.msk.f32.gmra.mrb[54].mxu1 %vm570_vm2, %v9582_v37  ;;  %6508 = vmatmul.mubr.msk.f32.gmra.mrb[56].mxu0 %vm570_vm2, %v9740_v43  ;;  %v2807_v37 = vsel %vm1112_vm4, %v7752_v19, %v10866_v28 }
 0x44b   :  { %6793 = vmatpush1.bf16.msra.mxu1 %v6792_v35  ;;  %2594 = vmatprep.mubr.f32.mxu1 %v10864_v60  ;;  %v2805_v26 = vsel %vm1112_vm4, %v7757_v7, %v10865_v2 }
 0x44c   :  { %6795 = vmatprep.subr.bf16.mxu1 %v6794_v44  ;;  %6510 = vmatprep.mubr.msk.f32.mxu0 %vm570_vm2, %v9754_v41  ;;  %v6798_v20 = vpack.c.bf16 %v2807_v37, %v2805_v26  ;;  %v10880_v44 = vld [vmem:[#allocation12_spill] sm:$0xff] }
 0x44d   :  { %6827 = vmatprep.subr.bf16.mxu0 %v8745_v3  ;;  %v10867_v3 = vld [vmem:[#allocation13_spill] sm:$0xff] }
 0x44e   :  { %6102 = vmatmul.mubr.msk.f32.gmra.mrb[56].mxu1 %vm570_vm2, %v9605_v54  ;;  %6511 = vmatmul.mubr.msk.f32.gmra.mrb[58].mxu0 %vm570_vm2, %v9766_v42  ;;  %v9870_v54 = vpop.permute.xlu0 %3113 }
 0x44f   :  { %6797 = vmatpush1.bf16.msra.mxu1 %v6796_v14  ;;  %2600 = vmatprep.mubr.f32.mxu1 %v10864_v60 }
 0x450   :  { %6799 = vmatprep.subr.bf16.mxu1 %v6798_v20  ;;  %6829 = vmatpush1.bf16.msra.mxu0 %v8763_v11  ;;  %v10868_v11 = vld [vmem:[#allocation14_spill] sm:$0xff] }
 0x451   :  { %6831 = vmatprep.subr.bf16.mxu0 %v8766_v13  ;;  %v10869_v13 = vld [vmem:[#allocation15_spill] sm:$0xff] }
 0x452   :  { %6103 = vmatmul.mubr.msk.f32.gmra.mrb[58].mxu1 %vm570_vm2, %v9615_v46  ;;  %v3124_v9 = vpop.permute.xlu0 %3123 }
 0x453   :  { %6801 = vmatpush1.bf16.msra.mxu1 %v6800_v51  ;;  %2606 = vmatprep.mubr.f32.mxu1 %v10864_v60 }
 0x454   :  { %6833 = vmatpush1.bf16.msra.mxu0 %v8784_v24  ;;  %v10870_v24 = vld [vmem:[#allocation16_spill] sm:$0xff] }
 0x455   :  { %6835 = vmatprep.subr.bf16.mxu0 %v8787_v27  ;;  %v10871_v27 = vld [vmem:[#allocation17_spill] sm:$0xff] }
 0x456   :  { %6104 = vmatmul.mubr.msk.f32.gmra.mrb[60].mxu1 %vm570_vm2, %v9624_v29  ;;  %v3134_v37 = vpop.permute.xlu0 %3133 }
 0x457   :  { %2612 = vmatprep.mubr.f32.mxu1 %v10864_v60 }
 0x458   :  { %6837 = vmatpush1.bf16.msra.mxu0 %v8805_v38  ;;  %v10872_v38 = vld [vmem:[#allocation18_spill] sm:$0xff] }
 0x459   :  { %6839 = vmatprep.subr.bf16.mxu0 %v8808_v56  ;;  %v10873_v56 = vld [vmem:[#allocation19_spill] sm:$0xff] }
 0x45a   :  { %6105 = vmatmul.mubr.msk.f32.gmra.mrb[62].mxu1 %vm570_vm2, %v9639_v30 }
 0x45b   :  { %2618 = vmatprep.mubr.f32.mxu1 %v10864_v60 }
 0x45c   :  { %6841 = vmatpush1.bf16.msra.mxu0 %v8820_v15  ;;  %v10874_v15 = vld [vmem:[#allocation6_spill] sm:$0xff] }
 0x45d   :  { %6843 = vmatprep.subr.bf16.mxu0 %v8838_v52 }
 0x45e   :  { %6106 = vmatmul.mubr.msk.f32.gmra.mrb[64].mxu1 %vm570_vm2, %v9646_v21 }
 0x45f   :  { %2624 = vmatprep.mubr.f32.mxu1 %v10864_v60 }
 0x460   :  { %6845 = vmatpush1.bf16.msra.mxu0 %v8846_v55 }
 0x461   :  { %6847 = vmatprep.subr.bf16.mxu0 %v8879_v58 }
 0x462   :  { %6107 = vmatmul.mubr.msk.f32.gmra.mrb[66].mxu1 %vm570_vm2, %v9660_v23 }
 0x463   :  { %2920 = vmatprep.mubr.f32.mxu1 %v10864_v60 }
 0x464   :  { %6849 = vmatpush1.bf16.msra.mxu0 %v8890_v63 }
 0x465   :  { %6851 = vmatprep.subr.bf16.mxu0 %v8900_v12 }
 0x466   :  { %6124 = vmatmul.mubr.msk.f32.vlgmr.msra.gmra.mrb[52].mxu1 %vm570_vm2, %v9667_v17 }
 0x467   :  { %2926 = vmatprep.mubr.f32.mxu1 %v10864_v60 }
 0x468   :  { %6853 = vmatpush1.bf16.msra.mxu0 %v8908_v32 }
 0x469   :  { %6855 = vmatprep.subr.bf16.mxu0 %v8918_v39 }
 0x46a   :  { %6125 = vmatmul.mubr.msk.f32.gmra.mrb[54].mxu1 %vm570_vm2, %v9681_v10 }
 0x46b   :  { %2932 = vmatprep.mubr.f32.mxu1 %v10864_v60 }
 0x46c   :  { %6857 = vmatpush1.bf16.msra.mxu0 %v8926_v48 }
 0x46d   :  { %6859 = vmatprep.subr.bf16.mxu0 %v8936_v4  ;;  %v9866_v4 = vpop.permute.xlu1 %3108 }
 0x46e   :  { %6126 = vmatmul.mubr.msk.f32.gmra.mrb[56].mxu1 %vm570_vm2, %v9688_v25 }
 0x46f   :  { %2938 = vmatprep.mubr.f32.mxu1 %v10864_v60 }
 0x470   :  { %6861 = vmatpush1.bf16.msra.mxu0 %v8944_v8 }
 0x471   :  { %6863 = vmatprep.subr.bf16.mxu0 %v8957_v22  ;;  %v9874_v10 = vpop.permute.xlu1 %3118 }
 0x472   :  { %6127 = vmatmul.mubr.msk.f32.gmra.mrb[58].mxu1 %vm570_vm2, %v9710_v6 }
 0x473   :  { %2944 = vmatprep.mubr.f32.mxu1 %v10864_v60 }
 0x474   :  { %6865 = vmatpush1.bf16.msra.mxu0 %v8962_v36 }
 0x475   :  { %6867 = vmatprep.subr.bf16.mxu0 %v8975_v61  ;;  %v3129_v5 = vpop.permute.xlu1 %3128 }
 0x476   :  { %6128 = vmatmul.mubr.msk.f32.gmra.mrb[60].mxu1 %vm570_vm2, %v9724_v45 }
 0x477   :  { %2950 = vmatprep.mubr.f32.mxu1 %v10864_v60 }
 0x478   :  { %6869 = vmatpush1.bf16.msra.mxu0 %v10867_v3 }
 0x479   :  { %6871 = vmatprep.subr.bf16.mxu0 %v10868_v11  ;;  %v3139_v11 = vpop.permute.xlu1 %3138 }
 0x47a   :  { %6129 = vmatmul.mubr.msk.f32.gmra.mrb[62].mxu1 %vm570_vm2, %v9740_v43 }
 0x47b   :  { %2956 = vmatprep.mubr.f32.mxu1 %v10864_v60 }
 0x47c   :  { %6873 = vmatpush1.bf16.msra.mxu0 %v10869_v13 }
 0x47d   :  { %6875 = vmatprep.subr.bf16.mxu0 %v10870_v24 }
 0x47e   :  { %6130 = vmatmul.mubr.msk.f32.gmra.mrb[64].mxu1 %vm570_vm2, %v9754_v41 }
 0x47f   :  { %2962 = vmatprep.mubr.f32.mxu1 %v10864_v60 }
 0x480   :  { %6877 = vmatpush1.bf16.msra.mxu0 %v10871_v27 }
 0x481   :  { %6879 = vmatprep.subr.bf16.mxu0 %v10872_v38 }
 0x482   :  { %6131 = vmatmul.mubr.msk.f32.gmra.mrb[66].mxu1 %vm570_vm2, %v9766_v42 }
 0x484   :  { %6881 = vmatpush1.bf16.msra.mxu0 %v10873_v56 }
 0x485   :  { %6883 = vmatprep.subr.bf16.mxu0 %v10874_v15 }
 0x515   :  { %v9850_v52 = vpop.f32.mrb[52].mxu0 }
 0x516   :  { %v9852_v55 = vpop.f32.mrb[53].mxu0 }
 0x519   :  { %v9854_v58 = vpop.f32.mrb[54].mxu0 }
 0x51a   :  { %v9856_v63 = vpop.f32.mrb[55].mxu0 }
 0x51d   :  { %v9858_v12 = vpop.f32.mrb[56].mxu0 }
 0x51e   :  { %v9860_v32 = vpop.f32.mrb[57].mxu0 }
 0x521   :  { %v9862_v39 = vpop.f32.mrb[58].mxu0 }
 0x522   :  { %v9864_v48 = vpop.f32.mrb[59].mxu0 }
 0x539   :  { %v2922_v8 = vpop.f32.mrb[52].mxu1 }
 0x53a   :  { %v3146_v22 = vadd.f32 %v9866_v4, %v2922_v8  ;;  %v2924_v36 = vpop.f32.mrb[53].mxu1  ;;  %v3144_v8 = vpop.permute.xlu0 %3143 }
 0x53b   :  { %v3147_v61 = vadd.f32 %v9866_v4, %v2924_v36 }
 0x53c   :  { %v3170_v30 = vmax.f32 %v3146_v22, 0.0 }
 0x53d   :  { %v3171_v46 = vmax.f32 %v3147_v61, 0.0  ;;  %v2928_v29 = vpop.f32.mrb[54].mxu1 }
 0x53e   :  { %v3149_v21 = vadd.f32 %v9870_v54, %v2928_v29  ;;  %v2930_v23 = vpop.f32.mrb[55].mxu1 }
 0x53f   :  { %v3150_v17 = vadd.f32 %v9870_v54, %v2930_v23  ;;  %3282 = vmatprep.mubr.f32.mxu0 %v3171_v46  ;;  %v3148_v23 = vadd.f32 %v9866_v4, %v9852_v55  ;;  %v3157_v55 = vadd.f32 %v9854_v58, %v3124_v9 }
 0x540   :  { %3283 = vmatmul.mubr.f32.vlgmr.msra.gmra.mrb[60].mxu0 %v3170_v30  ;;  %v3173_v62 = vmax.f32 %v3149_v21, 0.0 }
 0x541   :  { %v3174_v25 = vmax.f32 %v3150_v17, 0.0  ;;  %v2934_v6 = vpop.f32.mrb[56].mxu1  ;;  %6885 = vmatpush1.bf16.msra.mxu0 %v10875_v40 }
 0x542   :  { %v3152_v45 = vadd.f32 %v9874_v10, %v2934_v6  ;;  %v2936_v0 = vpop.f32.mrb[57].mxu1  ;;  %6887 = vmatprep.subr.bf16.mxu0 %v10876_v16  ;;  %v3172_v6 = vmax.f32 %v3148_v23, 0.0  ;;  %v9917_v16 = vld [vmem:[%s10800_s6] sm:$0xff]  ;;  %v10142_v23 = vld [vmem:[%s10803_s9 + $0x68] sm:$0xff] }
 0x543   :  { %v3153_v34 = vadd.f32 %v9874_v10, %v2936_v0  ;;  %3288 = vmatprep.mubr.f32.mxu0 %v3174_v25  ;;  %v3151_v25 = vadd.f32 %v9850_v52, %v9870_v54  ;;  %v3181_v52 = vmax.f32 %v3157_v55, 0.0  ;;  %v3160_v54 = vadd.f32 %v3129_v5, %v9860_v32  ;;  %10881 = vst [vmem:[#allocation13_spill] sm:$0xff] %v9917_v16 }
 0x544   :  { %3289 = vmatmul.mubr.f32.gmra.mrb[62].mxu0 %v3173_v62  ;;  %v3176_v43 = vmax.f32 %v3152_v45, 0.0  ;;  %v3154_v62 = vadd.f32 %v9874_v10, %v9856_v63  ;;  %v3163_v63 = vadd.f32 %v9858_v12, %v3134_v37  ;;  %v3166_v45 = vadd.f32 %v3139_v11, %v9864_v48  ;;  %v9922_v48 = vld [vmem:[%s10800_s6 + $0x8] sm:$0xff]  ;;  %10916 = vst [vmem:[#allocation42_spill] sm:$0xff] %v10142_v23 }
 0x545   :  { %v3177_v19 = vmax.f32 %v3153_v34, 0.0  ;;  %v2940_v7 = vpop.f32.mrb[58].mxu1  ;;  %6889 = vmatpush1.bf16.msra.mxu0 %v10877_v57  ;;  %v3175_v40 = vmax.f32 %v3151_v25, 0.0  ;;  %v3184_v10 = vmax.f32 %v3160_v54, 0.0  ;;  %v3169_v32 = vadd.f32 %v9862_v39, %v3144_v8  ;;  %10882 = vst [vmem:[#allocation14_spill] sm:$0xff] %v9922_v48  ;;  %v9927_v39 = vld [vmem:[%s10800_s6 + $0x10] sm:$0xff] }
 0x546   :  { %v3155_v47 = vadd.f32 %v3124_v9, %v2940_v7  ;;  %v2942_v35 = vpop.f32.mrb[59].mxu1  ;;  %6892 = vmatprep.subr.msk.bf16.mxu0 %vm8864_vm7, %v10878_v49  ;;  %v3178_v4 = vmax.f32 %v3154_v62, 0.0  ;;  %v3187_v58 = vmax.f32 %v3163_v63, 0.0  ;;  %v3190_v0 = vmax.f32 %v3166_v45, 0.0  ;;  %10883 = vst [vmem:[#allocation15_spill] sm:$0xff] %v9927_v39  ;;  %v9937_v34 = vld [vmem:[%s10800_s6 + $0x20] sm:$0xff] }
 0x547   :  { %v3156_v41 = vadd.f32 %v3124_v9, %v2942_v35  ;;  %3294 = vmatprep.mubr.f32.mxu0 %v3177_v19  ;;  %v3193_v12 = vmax.f32 %v3169_v32, 0.0  ;;  %10884 = vst [vmem:[#allocation16_spill] sm:$0xff] %v9937_v34  ;;  %v9942_v9 = vld [vmem:[%s10800_s6 + $0x28] sm:$0xff]  ;;  %v9947_v19 = vld [vmem:[%s10800_s6 + $0x30] sm:$0xff]  ;;  %v9952_v7 = vld [vmem:[%s10800_s6 + $0x38] sm:$0xff] }
 0x548   :  { %3295 = vmatmul.mubr.f32.gmra.mrb[64].mxu0 %v3176_v43  ;;  %v3179_v42 = vmax.f32 %v3155_v47, 0.0  ;;  %10885 = vst [vmem:[#allocation17_spill] sm:$0xff] %v9942_v9  ;;  %10886 = vst [vmem:[#allocation18_spill] sm:$0xff] %v9947_v19  ;;  %v9957_v57 = vld [vmem:[%s10800_s6 + $0x40] sm:$0xff]  ;;  %v9962_v43 = vld [vmem:[%s10800_s6 + $0x48] sm:$0xff] }
 0x549   :  { %v3180_v59 = vmax.f32 %v3156_v41, 0.0  ;;  %v2946_v1 = vpop.f32.mrb[60].mxu1  ;;  %6895 = vmatpush1.bf16.msk.msra.mxu0 %vm8864_vm7, %v10880_v44  ;;  %10887 = vst [vmem:[#allocation19_spill] sm:$0xff] %v9952_v7  ;;  %10888 = vst [vmem:[#allocation6_spill] sm:$0xff] %v9962_v43  ;;  %v9967_v47 = vld [vmem:[%s10800_s6 + $0x50] sm:$0xff]  ;;  %v9972_v35 = vld [vmem:[%s10800_s6 + $0x58] sm:$0xff] }
 0x54a   :  { %v3158_v2 = vadd.f32 %v3129_v5, %v2946_v1  ;;  %v2948_v26 = vpop.f32.mrb[61].mxu1  ;;  %10889 = vst [vmem:[#allocation7_spill] sm:$0xff] %v9967_v47  ;;  %10890 = vst [vmem:[#allocation8_spill] sm:$0xff] %v9972_v35  ;;  %v9977_v49 = vld [vmem:[%s10800_s6 + $0x60] sm:$0xff]  ;;  %v9987_v41 = vld [vmem:[%s10800_s6 + $0x70] sm:$0xff] }
 0x54b   :  { %v3159_v28 = vadd.f32 %v3129_v5, %v2948_v26  ;;  %3300 = vmatprep.mubr.f32.mxu0 %v3180_v59  ;;  %10892 = vst [vmem:[#allocation10_spill] sm:$0xff] %v9987_v41  ;;  %v9992_v5 = vld [vmem:[%s10800_s6 + $0x78] sm:$0xff]  ;;  %v9997_v59 = vld [vmem:[%s10802_s8] sm:$0xff]  ;;  %v10002_v1 = vld [vmem:[%s10802_s8 + $0x8] sm:$0xff] }
 0x54c   :  { %3301 = vmatmul.mubr.f32.gmra.mrb[66].mxu0 %v3179_v42  ;;  %v3182_v53 = vmax.f32 %v3158_v2, 0.0  ;;  %10893 = vst [vmem:[#allocation11_spill] sm:$0xff] %v9992_v5  ;;  %10894 = vst [vmem:[#allocation12_spill] sm:$0xff] %v10002_v1  ;;  %v10007_v44 = vld [vmem:[%s10802_s8 + $0x10] sm:$0xff]  ;;  %v10012_v42 = vld [vmem:[%s10802_s8 + $0x18] sm:$0xff] }
 0x54d   :  { %v3183_v14 = vmax.f32 %v3159_v28, 0.0  ;;  %v2952_v33 = vpop.f32.mrb[62].mxu1  ;;  %10895 = vst [vmem:[#allocation21_spill] sm:$0xff] %v10012_v42  ;;  %v10017_v2 = vld [vmem:[%s10802_s8 + $0x20] sm:$0xff]  ;;  %v10022_v26 = vld [vmem:[%s10802_s8 + $0x28] sm:$0xff]  ;;  %v10027_v28 = vld [vmem:[%s10802_s8 + $0x30] sm:$0xff] }
 0x54e   :  { %v3161_v20 = vadd.f32 %v3134_v37, %v2952_v33  ;;  %v2954_v51 = vpop.f32.mrb[63].mxu1  ;;  %10896 = vst [vmem:[#allocation22_spill] sm:$0xff] %v10017_v2  ;;  %10897 = vst [vmem:[#allocation23_spill] sm:$0xff] %v10022_v26  ;;  %v10042_v33 = vld [vmem:[%s10802_s8 + $0x48] sm:$0xff]  ;;  %v10152_v25 = vld [vmem:[%s10803_s9 + $0x78] sm:$0xff] }
 0x54f   :  { %v3162_v3 = vadd.f32 %v3134_v37, %v2954_v51  ;;  %3306 = vmatprep.mubr.f32.mxu0 %v3183_v14  ;;  %10898 = vst [vmem:[#allocation24_spill] sm:$0xff] %v10027_v28  ;;  %v10032_v37 = vld [vmem:[%s10802_s8 + $0x38] sm:$0xff]  ;;  %v10037_v14 = vld [vmem:[%s10802_s8 + $0x40] sm:$0xff]  ;;  %10901 = vst [vmem:[#allocation27_spill] sm:$0xff] %v10042_v33 }
 0x550   :  { %3307 = vmatmul.mubr.f32.gmra.mrb[68].mxu0 %v3182_v53  ;;  %v3185_v27 = vmax.f32 %v3161_v20, 0.0  ;;  %10899 = vst [vmem:[#allocation25_spill] sm:$0xff] %v10032_v37  ;;  %10900 = vst [vmem:[#allocation26_spill] sm:$0xff] %v10037_v14  ;;  %v10047_v53 = vld [vmem:[%s10802_s8 + $0x50] sm:$0xff]  ;;  %v10052_v20 = vld [vmem:[%s10802_s8 + $0x58] sm:$0xff] }
 0x551   :  { %v3186_v13 = vmax.f32 %v3162_v3, 0.0  ;;  %v2958_v24 = vpop.f32.mrb[64].mxu1  ;;  %10902 = vst [vmem:[#allocation28_spill] sm:$0xff] %v10052_v20  ;;  %v10057_v51 = vld [vmem:[%s10802_s8 + $0x60] sm:$0xff]  ;;  %v10062_v3 = vld [vmem:[%s10802_s8 + $0x68] sm:$0xff]  ;;  %10918 = vst [vmem:[#allocation44_spill] sm:$0xff] %v10152_v25 }
 0x552   :  { %v3164_v38 = vadd.f32 %v3139_v11, %v2958_v24  ;;  %v2960_v56 = vpop.f32.mrb[65].mxu1  ;;  %10903 = vst [vmem:[#allocation29_spill] sm:$0xff] %v10062_v3  ;;  %v10077_v24 = vld [vmem:[%s10803_s9] sm:$0xff] }
 0x553   :  { %v3165_v15 = vadd.f32 %v3139_v11, %v2960_v56  ;;  %3312 = vmatprep.mubr.f32.mxu0 %v3186_v13  ;;  %v10067_v11 = vld [vmem:[%s10802_s8 + $0x70] sm:$0xff]  ;;  %v10072_v13 = vld [vmem:[%s10802_s8 + $0x78] sm:$0xff]  ;;  %10906 = vst [vmem:[#allocation32_spill] sm:$0xff] %v10077_v24 }
 0x554   :  { %3313 = vmatmul.mubr.f32.gmra.mrb[70].mxu0 %v3185_v27  ;;  %v3188_v61 = vmax.f32 %v3164_v38, 0.0  ;;  %10904 = vst [vmem:[#allocation30_spill] sm:$0xff] %v10067_v11  ;;  %10905 = vst [vmem:[#allocation31_spill] sm:$0xff] %v10072_v13  ;;  %v10082_v27 = vld [vmem:[%s10803_s9 + $0x8] sm:$0xff]  ;;  %v10087_v38 = vld [vmem:[%s10803_s9 + $0x10] sm:$0xff] }
 0x555   :  { %v3189_v22 = vmax.f32 %v3165_v15, 0.0  ;;  %v2964_v36 = vpop.f32.mrb[66].mxu1  ;;  %10907 = vst [vmem:[#allocation33_spill] sm:$0xff] %v10082_v27  ;;  %10908 = vst [vmem:[#allocation34_spill] sm:$0xff] %v10087_v38  ;;  %v10092_v56 = vld [vmem:[%s10803_s9 + $0x18] sm:$0xff]  ;;  %v10097_v15 = vld [vmem:[%s10803_s9 + $0x20] sm:$0xff] }
 0x556   :  { %v3167_v46 = vadd.f32 %v3144_v8, %v2964_v36  ;;  %v2966_v29 = vpop.f32.mrb[67].mxu1  ;;  %10909 = vst [vmem:[#allocation35_spill] sm:$0xff] %v10097_v15  ;;  %v10112_v36 = vld [vmem:[%s10803_s9 + $0x38] sm:$0xff] }
 0x557   :  { %v3168_v30 = vadd.f32 %v3144_v8, %v2966_v29  ;;  %3318 = vmatprep.mubr.f32.mxu0 %v3189_v22  ;;  %v10102_v8 = vld [vmem:[%s10803_s9 + $0x28] sm:$0xff]  ;;  %v10107_v22 = vld [vmem:[%s10803_s9 + $0x30] sm:$0xff]  ;;  %10912 = vst [vmem:[#allocation38_spill] sm:$0xff] %v10112_v36 }
 0x558   :  { %3319 = vmatmul.mubr.f32.gmra.mrb[72].mxu0 %v3188_v61  ;;  %v3191_v17 = vmax.f32 %v3167_v46, 0.0  ;;  %10910 = vst [vmem:[#allocation36_spill] sm:$0xff] %v10102_v8  ;;  %10911 = vst [vmem:[#allocation37_spill] sm:$0xff] %v10107_v22  ;;  %v10117_v61 = vld [vmem:[%s10803_s9 + $0x40] sm:$0xff]  ;;  %v10122_v46 = vld [vmem:[%s10803_s9 + $0x48] sm:$0xff] }
 0x559   :  { %v3192_v21 = vmax.f32 %v3168_v30, 0.0  ;;  %v10127_v29 = vld [vmem:[%s10803_s9 + $0x50] sm:$0xff]  ;;  %v10132_v30 = vld [vmem:[%s10803_s9 + $0x58] sm:$0xff] }
 0x55a   :  { %10913 = vst [vmem:[#allocation39_spill] sm:$0xff] %v10127_v29  ;;  %10914 = vst [vmem:[#allocation40_spill] sm:$0xff] %v10132_v30 }
 0x55b   :  { %3324 = vmatprep.mubr.f32.mxu0 %v3192_v21  ;;  %v10137_v21 = vld [vmem:[%s10803_s9 + $0x60] sm:$0xff] }
 0x55c   :  { %3325 = vmatmul.mubr.f32.gmra.mrb[74].mxu0 %v3191_v17  ;;  %10915 = vst [vmem:[#allocation41_spill] sm:$0xff] %v10137_v21  ;;  %v10147_v17 = vld [vmem:[%s10803_s9 + $0x70] sm:$0xff]  ;;  %s10183_s9 = smov 0  }
 0x55d   :  { %3395 = vmatprep.mubr.f32.mxu0 %v10864_v60  ;;  %10917 = vst [vmem:[#allocation43_spill] sm:$0xff] %v10147_v17 }
 0x560   :  { %6142 = vmatmul.mubr.msk.f32.vlgmr.msra.gmra.mrb[60].mxu0 %vm1526_vm8, %v3172_v6  ;;  %v10157_v6 = vld [vmem:[%s10804_s10] sm:$0x3] }
 0x561   :  { %3401 = vmatprep.mubr.f32.mxu0 %v10864_v60  ;;  %10919 = vst [vmem:[#allocation45_spill] sm:$0xff] %v10157_v6 }
 0x564   :  { %6143 = vmatmul.mubr.msk.f32.gmra.mrb[62].mxu0 %vm1526_vm8, %v3175_v40 }
 0x565   :  { %3407 = vmatprep.mubr.f32.mxu0 %v10864_v60 }
 0x568   :  { %6144 = vmatmul.mubr.msk.f32.gmra.mrb[64].mxu0 %vm1526_vm8, %v3178_v4 }
 0x569   :  { %3413 = vmatprep.mubr.f32.mxu0 %v10864_v60 }
 0x56c   :  { %6145 = vmatmul.mubr.msk.f32.gmra.mrb[66].mxu0 %vm1526_vm8, %v3181_v52 }
 0x56d   :  { %3419 = vmatprep.mubr.f32.mxu0 %v10864_v60 }
 0x570   :  { %6146 = vmatmul.mubr.msk.f32.gmra.mrb[68].mxu0 %vm1526_vm8, %v3184_v10 }
 0x571   :  { %3425 = vmatprep.mubr.f32.mxu0 %v10864_v60 }
 0x574   :  { %6147 = vmatmul.mubr.msk.f32.gmra.mrb[70].mxu0 %vm1526_vm8, %v3187_v58 }
 0x575   :  { %3431 = vmatprep.mubr.f32.mxu0 %v10864_v60 }
 0x578   :  { %6148 = vmatmul.mubr.msk.f32.gmra.mrb[72].mxu0 %vm1526_vm8, %v3190_v0 }
 0x579   :  { %3437 = vmatprep.mubr.f32.mxu0 %v10864_v60  ;;  %v9932_v60 = vld [vmem:[%s10800_s6 + $0x18] sm:$0xff] }
 0x57c   :  { %6149 = vmatmul.mubr.msk.f32.gmra.mrb[74].mxu0 %vm1526_vm8, %v3193_v12 }
 0x633   :  { %v3397_v40 = vpop.f32.mrb[60].mxu0 }
 0x634   :  { %v7328_v62 = vadd.f32 %v3397_v40, %v9234_v31  ;;  %v3399_v55 = vpop.f32.mrb[61].mxu0 }
 0x635   :  { %v7329_v4 = vadd.f32 %v3399_v55, %v9241_v50 }
 0x636   :  { %3445 = vst [vmem:[#allocation2 + $0x80] sm:$0xff] %v7328_v62 }
 0x637   :  { %3446 = vst [vmem:[#allocation2 + $0x88] sm:$0xff] %v7329_v4  ;;  %v3403_v52 = vpop.f32.mrb[62].mxu0 }
 0x638   :  { %v7330_v54 = vadd.f32 %v3403_v52, %v9234_v31  ;;  %v3405_v63 = vpop.f32.mrb[63].mxu0 }
 0x639   :  { %v7331_v10 = vadd.f32 %v3405_v63, %v9241_v50 }
 0x63a   :  { %3448 = vst [vmem:[#allocation2 + $0x90] sm:$0xff] %v7330_v54 }
 0x63b   :  { %3449 = vst [vmem:[#allocation2 + $0x98] sm:$0xff] %v7331_v10  ;;  %v3409_v58 = vpop.f32.mrb[64].mxu0 }
 0x63c   :  { %v7332_v45 = vadd.f32 %v3409_v58, %v9234_v31  ;;  %v3411_v32 = vpop.f32.mrb[65].mxu0 }
 0x63d   :  { %v7333_v0 = vadd.f32 %v3411_v32, %v9241_v50 }
 0x63e   :  { %3451 = vst [vmem:[#allocation2 + $0xa0] sm:$0xff] %v7332_v45 }
 0x63f   :  { %3452 = vst [vmem:[#allocation2 + $0xa8] sm:$0xff] %v7333_v0  ;;  %v3415_v12 = vpop.f32.mrb[66].mxu0 }
 0x640   :  { %v7334_v40 = vadd.f32 %v3415_v12, %v9234_v31  ;;  %v3417_v62 = vpop.f32.mrb[67].mxu0 }
 0x641   :  { %v7335_v55 = vadd.f32 %v3417_v62, %v9241_v50 }
 0x642   :  { %3454 = vst [vmem:[#allocation2 + $0xb0] sm:$0xff] %v7334_v40 }
 0x643   :  { %3455 = vst [vmem:[#allocation2 + $0xb8] sm:$0xff] %v7335_v55  ;;  %v3421_v4 = vpop.f32.mrb[68].mxu0 }
 0x644   :  { %v7336_v52 = vadd.f32 %v3421_v4, %v9234_v31  ;;  %v3423_v54 = vpop.f32.mrb[69].mxu0 }
 0x645   :  { %v7337_v63 = vadd.f32 %v3423_v54, %v9241_v50 }
 0x646   :  { %3457 = vst [vmem:[#allocation2 + $0xc0] sm:$0xff] %v7336_v52 }
 0x647   :  { %3458 = vst [vmem:[#allocation2 + $0xc8] sm:$0xff] %v7337_v63  ;;  %v3427_v10 = vpop.f32.mrb[70].mxu0  ;;  %v10175_v63 = vmov 0.0  }
 0x648   :  { %v7338_v58 = vadd.f32 %v3427_v10, %v9234_v31  ;;  %v3429_v45 = vpop.f32.mrb[71].mxu0  ;;  %v10177_v10 = vmov 0.0  }
 0x649   :  { %v7339_v32 = vadd.f32 %v3429_v45, %v9241_v50  ;;  %v10181_v45 = vmov 0.0  }
 0x64a   :  { %3460 = vst [vmem:[#allocation2 + $0xd0] sm:$0xff] %v7338_v58  ;;  %v10179_v58 = vmov 0.0  }
 0x64b   :  { %3461 = vst [vmem:[#allocation2 + $0xd8] sm:$0xff] %v7339_v32  ;;  %v3433_v0 = vpop.f32.mrb[72].mxu0 }
 0x64c   :  { %v7340_v12 = vadd.f32 %v3433_v0, %v9234_v31  ;;  %v3435_v40 = vpop.f32.mrb[73].mxu0 }
 0x64d   :  { %v7341_v62 = vadd.f32 %v3435_v40, %v9241_v50 }
 0x64e   :  { %3463 = vst [vmem:[#allocation2 + $0xe0] sm:$0xff] %v7340_v12 }
 0x64f   :  { %3464 = vst [vmem:[#allocation2 + $0xe8] sm:$0xff] %v7341_v62  ;;  %v3439_v55 = vpop.f32.mrb[74].mxu0 }
 0x650   :  { %v7342_v4 = vadd.f32 %v3439_v55, %v9234_v31  ;;  %v3441_v52 = vpop.f32.mrb[75].mxu0 }
 0x651   :  { %v7343_v54 = vadd.f32 %v3441_v52, %v9241_v50 }
 0x652   :  { %3466 = vst [vmem:[#allocation2 + $0xf0] sm:$0xff] %v7342_v4 }
 0x653   :  { %3467 = vst [vmem:[#allocation2 + $0xf8] sm:$0xff] %v7343_v54 }
 0x654 LB: > { %v10920_v6 = vld [vmem:[#allocation45_spill] sm:$0xff]  ;;  %v10921_v48 = vld [vmem:[#allocation14_spill] sm:$0xff]  ;;  %v10923_v39 = vld [vmem:[#allocation15_spill] sm:$0xff]  ;;  %v10837_v12 = vmov 0.0   ;;  %s6181_s10 = sshll.u32 %s7958_s9, 4  ;;  %vm3544_vm9 = vcmask 1040384   ;;  %v7942_v63 = vphi %v10175_v63, %v5822_v63   ;;  %s7958_s9 = sphi %s10183_s9, %s3522_s9   ;;  %v7954_v45 = vphi %v10181_v45, %v5652_v45   ;;  %v7950_v58 = vphi %v10179_v58, %v10720_v58   ;;  %v7946_v10 = vphi %v10177_v10, %v10963_v10  }
 0x655   : > { %v10200_v31 = vpack.c.bf16 %v9932_v60, %v10921_v48  ;;  %v10922_v16 = vld [vmem:[#allocation13_spill] sm:$0xff]  ;;  %v10925_v7 = vld [vmem:[#allocation19_spill] sm:$0xff]  ;;  %v10926_v34 = vld [vmem:[#allocation16_spill] sm:$0xff]  ;;  %3614 = vmatprep.mubr.f32.mxu1 %v10837_v12  ;;  %3908 = vmatprep.mubr.f32.mxu0 %v10837_v12  ;;  %s10251_s8 = scalar_lea.vmem [#allocation2], %s6181_s10  ;;  %s7966_s7 = smov 64  }
 0x656   : > { %v10204_v50 = vpack.c.bf16 %v10923_v39, %v10922_v16  ;;  %v10924_v9 = vld [vmem:[#allocation17_spill] sm:$0xff]  ;;  %v10927_v19 = vld [vmem:[#allocation18_spill] sm:$0xff]  ;;  %v10929_v35 = vld [vmem:[#allocation8_spill] sm:$0xff]  ;;  %s3522_s9 = sadd.s32 1, %s7958_s9  }
 0x657   : > { %v10208_v32 = vpack.c.bf16 %v10925_v7, %v10924_v9  ;;  %6897 = vmatprep.subr.bf16.mxu1 %v10200_v31  ;;  %6945 = vmatprep.subr.bf16.mxu0 %v10200_v31  ;;  %v10215_v0 = vpack.c.bf16 %v10927_v19, %v10926_v34  ;;  %v10928_v43 = vld [vmem:[#allocation6_spill] sm:$0xff]  ;;  %v10930_v47 = vld [vmem:[#allocation7_spill] sm:$0xff]  ;;  %v10931_v18 = vld [vmem:[#allocation9_spill] sm:$0xff]  ;;  %p3519_p0 = scmp.ge.s32.totalorder %s3522_s9, 8  }
 0x658   : > { %6899 = vmatpush1.bf16.msra.mxu1 %v10204_v50  ;;  %v10221_v40 = vpack.c.bf16 %v10929_v35, %v10928_v43  ;;  %6947 = vmatpush1.bf16.msra.mxu0 %v10204_v50  ;;  %v10229_v62 = vpack.c.bf16 %v10930_v47, %v9957_v57  ;;  %v10932_v5 = vld [vmem:[#allocation11_spill] sm:$0xff]  ;;  %v10933_v41 = vld [vmem:[#allocation10_spill] sm:$0xff]  ;;  %v10934_v27 = vld [vmem:[#allocation33_spill] sm:$0xff]  ;;  %vm7968_vm10 = vmmov (%p3519_p0), 0   ;;  %v10964_v60 = vmov (%p3519_p0), 0.0   ;;  %s7969_s1 = smov (%p3519_p0), [#allocation3]  }
 0x659   : > { %6901 = vmatprep.subr.bf16.mxu1 %v10208_v32  ;;  %6949 = vmatprep.subr.bf16.mxu0 %v10208_v32  ;;  %v10234_v55 = vpack.c.bf16 %v10932_v5, %v10931_v18  ;;  %v10241_v4 = vpack.c.bf16 %v10933_v41, %v9977_v49  ;;  %v10935_v24 = vld [vmem:[#allocation32_spill] sm:$0xff]  ;;  %v10936_v38 = vld [vmem:[#allocation34_spill] sm:$0xff]  ;;  %v10939_v15 = vld [vmem:[#allocation35_spill] sm:$0xff]  ;;  %s5925_s17 = sshll.u32 (%p3519_p0), %s7969_s1, 4  ;;  %vm5917_vm11 = vcmask (%p3519_p0), 41984   ;;  %s5926_s17 = int_to_ptr.vmem [resolvable:$true] %s5925_s17 }
 0x65a   : > { %v10254_v52 = vld [vmem:[%s10251_s8 + $0x88] sm:$0xff]  ;;  %v10264_v18 = vld [vmem:[%s10251_s8 + $0x80] sm:$0xff]  ;;  %v10279_v48 = vpack.c.bf16 %v10936_v38, %v10935_v24  ;;  %v10937_v8 = vld [vmem:[#allocation36_spill] sm:$0xff]  ;;  %s7896_s26 = scalar_lea.vmem (%p3519_p0), %s5926_s17, 32  ;;  %p7901_p2 = scmp.lt.s32.totalorder (%p3519_p0), %s5926_s17, %s5926_s17 }
 0x65b   : > { %v3541_v54 = vrot.slane %v10254_v52, 7  ;;  %v10258_v5 = vld [vmem:[%s10251_s8 + $0x8] sm:$0xff]  ;;  %v3540_v19 = vrot.slane %v10264_v18, 7  ;;  %v10268_v34 = vld [vmem:[%s10251_s8] sm:$0xff]  ;;  %v10941_v30 = vld [vmem:[#allocation40_spill] sm:$0xff]  ;;  %p7897_p1 = scmp.ne.s32.totalorder (%p3519_p0), %s5926_s17, %s7896_s26  ;;  %p7902_p3 = scmp.lt.s32.totalorder (%p3519_p0), %s7896_s26, %s7896_s26 }
 0x65c   : > { %6903 = vmatpush1.bf16.msra.mxu1 %v10215_v0  ;;  %6951 = vmatpush1.bf16.msra.mxu0 %v10215_v0  ;;  %v10938_v36 = vld [vmem:[#allocation38_spill] sm:$0xff]  ;;  %v10940_v22 = vld [vmem:[#allocation37_spill] sm:$0xff]  ;;  %v10942_v29 = vld [vmem:[#allocation39_spill] sm:$0xff] }
 0x65d   : > { %6905 = vmatprep.subr.bf16.mxu1 %v10221_v40  ;;  %6953 = vmatprep.subr.bf16.mxu0 %v10221_v40  ;;  %v3546_v7 = vsel %vm3544_vm9, %v10258_v5, %v3541_v54  ;;  %v3545_v35 = vsel %vm3544_vm9, %v10268_v34, %v3540_v19  ;;  %v10283_v19 = vpack.c.bf16 %v10938_v36, %v10937_v8  ;;  %v10943_v23 = vld [vmem:[#allocation42_spill] sm:$0xff]  ;;  %v10944_v25 = vld [vmem:[#allocation44_spill] sm:$0xff]  ;;  %v10945_v21 = vld [vmem:[#allocation41_spill] sm:$0xff]  ;;  %v10953_v8 = vmov 0.0   ;;  %p7903_p4 = por (%p3519_p0), %p7902_p3, %p7901_p2 }
 0x65e   : > { %v10946_v17 = vld [vmem:[#allocation43_spill] sm:$0xff]  ;;  %v10947_v1 = vld [vmem:[#allocation12_spill] sm:$0xff]  ;;  %v10948_v42 = vld [vmem:[#allocation21_spill] sm:$0xff] }
 0x65f   : > { %v10949_v26 = vld [vmem:[#allocation23_spill] sm:$0xff]  ;;  %v10950_v37 = vld [vmem:[#allocation25_spill] sm:$0xff]  ;;  %v10951_v2 = vld [vmem:[#allocation22_spill] sm:$0xff]  ;;  %p7904_p5 = pnand (%p3519_p0), %p7903_p4, %p7897_p1 }
 0x660   : > { %6907 = vmatpush1.bf16.msra.mxu1 %v10229_v62  ;;  %6955 = vmatpush1.bf16.msra.mxu0 %v10229_v62  ;;  %v10952_v28 = vld [vmem:[#allocation24_spill] sm:$0xff]  ;;  %v10954_v33 = vld [vmem:[#allocation27_spill] sm:$0xff]  ;;  %v10956_v14 = vld [vmem:[#allocation26_spill] sm:$0xff] }
 0x661   : > { %6909 = vmatprep.subr.bf16.mxu1 %v10234_v55  ;;  %6957 = vmatprep.subr.bf16.mxu0 %v10234_v55  ;;  %v10955_v20 = vld [vmem:[#allocation28_spill] sm:$0xff]  ;;  %v10957_v3 = vld [vmem:[#allocation29_spill] sm:$0xff]  ;;  %v10958_v13 = vld [vmem:[#allocation31_spill] sm:$0xff] }
 0x662   : > { %v10959_v11 = vld [vmem:[#allocation30_spill] sm:$0xff] }
 0x663   :  { %v5833_v49 = vld [vmem:[%s10805_s11 + $0x20] sm:$0xff] (%p3519_p0) }
 0x664   : > { %6911 = vmatpush1.bf16.msra.mxu1 %v10241_v4  ;;  %6959 = vmatpush1.bf16.msra.mxu0 %v10241_v4 }
 0x667   : > { %6155 = vmatmul.mubr.msk.f32.vlgmr.msra.gmra.mrb[0].mxu1 %vm570_vm2, %v7954_v45 }
 0x668   : > { %3716 = vmatprep.mubr.f32.mxu1 %v10837_v12 }
 0x73a   : > { %v3616_v45 = vpop.f32.mrb[0].mxu1 }
 0x73b   : > { %v3618_v9 = vpop.f32.mrb[1].mxu1  ;;  %v3621_v39 = vadd.f32 %v3616_v45, %v3545_v35  ;;  %v10305_v35 = vpack.c.bf16 %v10944_v25, %v10943_v23  ;;  %v10315_v45 = vpack.c.bf16 %v10948_v42, %v10947_v1  ;;  %v10332_v1 = vpack.c.bf16 %v10952_v28, %v10951_v2 }
 0x73c   : > { %v3622_v12 = vadd.f32 %v3618_v9, %v3546_v7  ;;  %v10354_v2 = vpack.c.bf16 %v10959_v11, %v10057_v51  ;;  %v3838_v28 = vrot.slane %v10268_v34, 1  ;;  %v5836_v51 = vld [vmem:[%s10805_s11 + $0x38] sm:$0xff] (%p3519_p0) }
 0x73d   : > { %v3623_v41 = vmul.f32 0.5, %v3621_v39  ;;  %v10290_v39 = vpack.c.bf16 %v10940_v22, %v10939_v15  ;;  %v10338_v15 = vpack.c.bf16 %v10955_v20, %v10954_v33 }
 0x73e   : > { %7764 = vtanh.f32 %v3622_v12 }
 0x73f   : > { %7766 = vtanh.f32 %v3623_v41  ;;  %v10310_v41 = vpack.c.bf16 %v10946_v17, %v10945_v21  ;;  %v10343_v17 = vpack.c.bf16 %v10047_v53, %v10956_v14  ;;  %v5835_v53 = vld [vmem:[%s10805_s11 + $0x30] sm:$0xff] (%p3519_p0) }
 0x748   : > { %v7765_v16 = vpop.eup %7764 }
 0x749   : > { %3634 = vrot.lane.b32.xlu0 %v7765_v16, %s7966_s7  ;;  %v7767_v54 = vpop.eup %7766  ;;  %v10275_v16 = vpack.c.bf16 %v10092_v56, %v10934_v27  ;;  %v7290_v56 = vpack.c.bf16 (%p3519_p0), %v5836_v51, %v5835_v53 }
 0x74a   : > { %v3627_v43 = vmul.f32 0.5, %v7767_v54  ;;  %v10320_v54 = vpack.c.bf16 %v10007_v44, %v9997_v59  ;;  %v5834_v59 = vld [vmem:[%s10805_s11 + $0x28] sm:$0xff] (%p3519_p0) }
 0x74b   : > { %6913 = vmatprep.subr.bf16.mxu1 %v10275_v16  ;;  %6961 = vmatprep.subr.bf16.mxu0 %v10275_v16  ;;  %v7287_v44 = vpack.c.bf16 (%p3519_p0), %v5834_v59, %v5833_v49 }
 0x74c   : > { %v3629_v9 = vadd.f32 0.5, %v3627_v43  ;;  %6915 = vmatpush1.bf16.msra.mxu1 %v10279_v48  ;;  %v10295_v43 = vpack.c.bf16 %v10941_v30, %v10122_v46 }
 0x74d   : > { %6917 = vmatprep.subr.bf16.mxu1 %v10283_v19 }
 0x74e   : > { %v3632_v20 = vmul.f32 %v7950_v58, %v3629_v9 }
 0x750   : > { %6919 = vmatpush1.bf16.msra.mxu1 %v10290_v39 }
 0x751   : > { %6921 = vmatprep.subr.bf16.mxu1 %v10295_v43 }
 0x7bb   : > { %v3635_v7 = vpop.permute.xlu0 %3634 }
 0x7bc   : > { %v3637_v47 = vmul.f32 %v3635_v7, %v3629_v9  ;;  %v10325_v7 = vpack.c.bf16 %v10950_v37, %v10949_v26 }
 0x7be   : > { %3639 = vrot.lane.b32.xlu0 %v3637_v47, %s7966_s7  ;;  %v10300_v47 = vpack.c.bf16 %v10942_v29, %v10117_v61  ;;  %v6179_v61 = vld [vmem:[%s10806_s12] ss:$0 sm:$0xff] (%p3519_p0) }
 0x7c0   : > { %6923 = vmatpush1.bf16.msra.mxu1 %v10300_v47 }
 0x7c1   : > { %6925 = vmatprep.subr.bf16.mxu1 %v10305_v35 }
 0x7c4   : > { %6927 = vmatpush1.bf16.msra.mxu1 %v10310_v41 }
 0x7c5   : > { %6929 = vmatprep.subr.bf16.mxu1 %v10315_v45 }
 0x7c7   : > { %6156 = vmatmul.mubr.msk.f32.vlgmr.msra.gmra.mrb[2].mxu1 %vm570_vm2, %v7946_v10  ;;  %v10348_v10 = vpack.c.bf16 %v10958_v13, %v10957_v3  ;;  %v3624_v13 = vmul.f32 0.5, %v3622_v12 }
 0x7c8   : > { %6931 = vmatpush1.bf16.msra.mxu1 %v10320_v54  ;;  %3790 = vmatprep.mubr.f32.mxu1 %v10953_v8 }
 0x7c9   : > { %6933 = vmatprep.subr.bf16.mxu1 %v10325_v7 }
 0x7cc   : > { %6935 = vmatpush1.bf16.msra.mxu1 %v10332_v1 }
 0x7cd   : > { %6937 = vmatprep.subr.bf16.mxu1 %v10338_v15 }
 0x7d0   : > { %6939 = vmatpush1.bf16.msra.mxu1 %v10343_v17 }
 0x7d1   : > { %6941 = vmatprep.subr.bf16.mxu1 %v10348_v10 }
 0x7d4   : > { %6943 = vmatpush1.bf16.msra.mxu1 %v10354_v2 }
 0x7d5   : > { %6993 = vmatprep.subr.bf16.mxu1 %v10200_v31 }
 0x830   : > { %v3640_v21 = vpop.permute.xlu0 %3639 }
 0x831   : > { %v10358_v14 = vadd.f32 %v3640_v21, %v3632_v20  ;;  %v10960_v20 = vld [vmem:[#allocation20_spill] sm:$0xff] }
 0x833   : > { %7768 = vtanh.f32 %v10358_v14 }
 0x834   : > { %7770 = vtanh.f32 %v3624_v13  ;;  %v3839_v13 = vrot.slane %v10258_v5, 1 }
 0x836   : > { %v3843_v58 = vsel %vm3544_vm9, %v3839_v13, %v10254_v52  ;;  %v3842_v13 = vsel %vm3544_vm9, %v3838_v28, %v10264_v18 }
 0x83d   : > { %v7769_v3 = vpop.eup %7768 }
 0x83e   : > { %3645 = vrot.lane.b32.xlu1 %v7769_v3, %s7966_s7  ;;  %v7771_v22 = vpop.eup %7770  ;;  %v10961_v3 = vsub.s32 1, %v10960_v20 }
 0x83f   : > { %v3628_v23 = vmul.f32 0.5, %v7771_v22 }
 0x841   : > { %v3630_v11 = vadd.f32 0.5, %v3628_v23 }
 0x8b0   : > { %v3646_v24 = vpop.permute.xlu1 %3645 }
 0x8b1   : > { %v3648_v25 = vmul.f32 %v3646_v24, %v3630_v11  ;;  %v10386_v11 = vrot.slane %v10920_v6, %v10961_v3  ;;  %v10962_v3 = vsub.s32 0, %v10960_v20 }
 0x8b3   : > { %6157 = vmatmul.mubr.msk.f32.vlgmr.msra.gmra.mrb[2].mxu1 %vm570_vm2, %v3648_v25  ;;  %6158 = vmatmul.mubr.msk.f32.vlgmr.msra.gmra.mrb[0].mxu0 %vm570_vm2, %v3648_v25  ;;  %v10397_v27 = vrot.slane %v10920_v6, %v10962_v3 }
 0x8b4   : > { %6963 = vmatpush1.bf16.msra.mxu0 %v10279_v48  ;;  %6995 = vmatpush1.bf16.msra.mxu1 %v10204_v50 }
 0x8b5   : > { %6965 = vmatprep.subr.bf16.mxu0 %v10283_v19  ;;  %6997 = vmatprep.subr.bf16.mxu1 %v10208_v32 }
 0x8b6   : > { %4010 = vmatprep.mubr.f32.mxu0 %v10953_v8  ;;  %4193 = vmatprep.mubr.f32.mxu1 %v10953_v8 }
 0x8b8   : > { %6967 = vmatpush1.bf16.msra.mxu0 %v10290_v39  ;;  %6999 = vmatpush1.bf16.msra.mxu1 %v10215_v0 }
 0x8b9   : > { %6969 = vmatprep.subr.bf16.mxu0 %v10295_v43  ;;  %7001 = vmatprep.subr.bf16.mxu1 %v10221_v40 }
 0x8bc   : > { %6971 = vmatpush1.bf16.msra.mxu0 %v10300_v47  ;;  %7003 = vmatpush1.bf16.msra.mxu1 %v10229_v62 }
 0x8bd   : > { %6973 = vmatprep.subr.bf16.mxu0 %v10305_v35  ;;  %7005 = vmatprep.subr.bf16.mxu1 %v10234_v55 }
 0x8c0   : > { %6975 = vmatpush1.bf16.msra.mxu0 %v10310_v41  ;;  %7007 = vmatpush1.bf16.msra.mxu1 %v10241_v4 }
 0x8c1   : > { %6977 = vmatprep.subr.bf16.mxu0 %v10315_v45  ;;  %7009 = vmatprep.subr.bf16.mxu1 %v10275_v16 }
 0x986   : > { %v3792_v24 = vpop.f32.mrb[2].mxu1  ;;  %v3910_v22 = vpop.f32.mrb[0].mxu0 }
 0x987   : > { %v3794_v21 = vpop.f32.mrb[3].mxu1  ;;  %v3912_v23 = vpop.f32.mrb[1].mxu0 }
 0x988   : > { %v3809_v25 = vadd.f32 %v10386_v11, %v3794_v21  ;;  %v3916_v12 = vadd.f32 %v3912_v23, %v3843_v58  ;;  %v3808_v21 = vadd.f32 %v10397_v27, %v3792_v24  ;;  %v3915_v58 = vadd.f32 %v3910_v22, %v3842_v13 }
 0x98a   : > { %7772 = vtanh.f32 %v3809_v25  ;;  %v3810_v23 = vmul.f32 0.5, %v3808_v21  ;;  %v3917_v29 = vmul.f32 0.5, %v3915_v58 }
 0x98b   : > { %7774 = vtanh.f32 %v3916_v12 }
 0x98c   : > { %7776 = vtanh.f32 %v3810_v23 }
 0x98d   : > { %7778 = vtanh.f32 %v3917_v29 }
 0x994   : > { %v7773_v9 = vpop.eup %7772 }
 0x995   : > { %3821 = vrot.lane.b32.xlu1 %v7773_v9, %s7966_s7  ;;  %v7775_v26 = vpop.eup %7774 }
 0x996   : > { %3928 = vrot.lane.b32.xlu0 %v7775_v26, %s7966_s7  ;;  %v7777_v9 = vpop.eup %7776 }
 0x997   : > { %v3814_v30 = vmul.f32 0.5, %v7777_v9  ;;  %v7779_v26 = vpop.eup %7778 }
 0x998   : > { %v3921_v20 = vmul.f32 0.5, %v7779_v26 }
 0x999   : > { %v3816_v33 = vadd.f32 0.5, %v3814_v30 }
 0x99a   : > { %v3923_v6 = vadd.f32 0.5, %v3921_v20  ;;  %v3811_v20 = vmul.f32 0.5, %v3809_v25 }
 0x99b   : > { %v3819_v28 = vmul.f32 %v7942_v63, %v3816_v33 }
 0x99c   : > { %v3926_v29 = vmul.f32 %v3923_v6, %v10358_v14 }
 0xa07   : > { %v3822_v36 = vpop.permute.xlu1 %3821 }
 0xa08   : > { %v3824_v3 = vmul.f32 %v3822_v36, %v3816_v33  ;;  %v3929_v37 = vpop.permute.xlu0 %3928  ;;  %v3918_v33 = vmul.f32 0.5, %v3916_v12  ;;  %v4120_v12 = vrot.slane %v10258_v5, 2 }
 0xa09   : > { %v3931_v24 = vmul.f32 %v3929_v37, %v3923_v6 }
 0xa0a   : > { %3826 = vrot.lane.b32.xlu1 %v3824_v3, %s7966_s7 }
 0xa0b   : > { %3933 = vrot.lane.b32.xlu0 %v3931_v24, %s7966_s7 }
 0xa7c   : > { %v3827_v22 = vpop.permute.xlu1 %3826 }
 0xa7d   : > { %v10406_v21 = vadd.f32 %v3827_v22, %v3819_v28  ;;  %v3934_v30 = vpop.permute.xlu0 %3933  ;;  %v4124_v28 = vrot.slane %v10254_v52, 1 }
 0xa7e   : > { %v10410_v13 = vadd.f32 %v3934_v30, %v3926_v29 }
 0xa7f   : > { %7780 = vtanh.f32 %v10406_v21  ;;  %v4128_v22 = vsel %vm3544_vm9, %v4120_v12, %v4124_v28 }
 0xa80   : > { %7782 = vtanh.f32 %v10410_v13 }
 0xa81   : > { %7784 = vtanh.f32 %v3811_v20 }
 0xa82   : > { %7786 = vtanh.f32 %v3918_v33 }
 0xa89   : > { %v7781_v36 = vpop.eup %7780 }
 0xa8a   : > { %3832 = vrot.lane.b32.xlu1 %v7781_v36, %s7966_s7  ;;  %v7783_v37 = vpop.eup %7782 }
 0xa8b   : > { %3939 = vrot.lane.b32.xlu0 %v7783_v37, %s7966_s7  ;;  %v7785_v63 = vpop.eup %7784 }
 0xa8c   : > { %v3815_v23 = vmul.f32 0.5, %v7785_v63  ;;  %v7787_v58 = vpop.eup %7786 }
 0xa8d   : > { %v3922_v14 = vmul.f32 0.5, %v7787_v58  ;;  %v4119_v58 = vrot.slane %v10268_v34, 2 }
 0xa8e   : > { %v3817_v9 = vadd.f32 0.5, %v3815_v23 }
 0xa8f   : > { %v3924_v3 = vadd.f32 0.5, %v3922_v14 }
 0xafc   : > { %v3833_v6 = vpop.permute.xlu1 %3832 }
 0xafd   : > { %v3835_v26 = vmul.f32 %v3833_v6, %v3817_v9  ;;  %v3940_v24 = vpop.permute.xlu0 %3939  ;;  %v4123_v9 = vrot.slane %v10264_v18, 1 }
 0xafe   : > { %v3942_v25 = vmul.f32 %v3940_v24, %v3924_v3 }
 0xaff   : > { %6159 = vmatmul.mubr.msk.f32.vlgmr.msra.gmra.mrb[2].mxu0 %vm570_vm2, %v3835_v26  ;;  %v4127_v14 = vsel %vm3544_vm9, %v4119_v58, %v4123_v9 }
 0xb00   : > { %6979 = vmatpush1.bf16.msra.mxu0 %v10320_v54  ;;  %4084 = vmatprep.mubr.f32.mxu0 %v10953_v8 }
 0xb01   : > { %6981 = vmatprep.subr.bf16.mxu0 %v10325_v7  ;;  %6161 = vmatmul.mubr.msk.f32.vlgmr.msra.gmra.mrb[4].mxu1 %vm570_vm2, %v3942_v25 }
 0xb02   : > { %7011 = vmatpush1.bf16.msra.mxu1 %v10279_v48  ;;  %4295 = vmatprep.mubr.f32.mxu1 %v10953_v8 }
 0xb03   : > { %7013 = vmatprep.subr.bf16.mxu1 %v10283_v19 }
 0xb04   : > { %6983 = vmatpush1.bf16.msra.mxu0 %v10332_v1 }
 0xb05   : > { %6985 = vmatprep.subr.bf16.mxu0 %v10338_v15 }
 0xb06   : > { %7015 = vmatpush1.bf16.msra.mxu1 %v10290_v39 }
 0xb07   : > { %7017 = vmatprep.subr.bf16.mxu1 %v10295_v43 }
 0xb08   : > { %6987 = vmatpush1.bf16.msra.mxu0 %v10343_v17 }
 0xb09   : > { %6989 = vmatprep.subr.bf16.mxu0 %v10348_v10 }
 0xb0a   : > { %7019 = vmatpush1.bf16.msra.mxu1 %v10300_v47 }
 0xb0b   : > { %7021 = vmatprep.subr.bf16.mxu1 %v10305_v35 }
 0xb0c   : > { %6991 = vmatpush1.bf16.msra.mxu0 %v10354_v2 }
 0xb0d   : > { %7041 = vmatprep.subr.bf16.mxu0 %v10200_v31 }
 0xb0e   : > { %7023 = vmatpush1.bf16.msra.mxu1 %v10310_v41 }
 0xb0f   : > { %6160 = vmatmul.mubr.msk.f32.vlgmr.msra.gmra.mrb[2].mxu0 %vm570_vm2, %v3942_v25  ;;  %7025 = vmatprep.subr.bf16.mxu1 %v10315_v45 }
 0xb10   : > { %7043 = vmatpush1.bf16.msra.mxu0 %v10204_v50  ;;  %4478 = vmatprep.mubr.f32.mxu0 %v10953_v8 }
 0xb11   : > { %7045 = vmatprep.subr.bf16.mxu0 %v10208_v32 }
 0xb14   : > { %7047 = vmatpush1.bf16.msra.mxu0 %v10215_v0 }
 0xb15   : > { %7049 = vmatprep.subr.bf16.mxu0 %v10221_v40 }
 0xb18   : > { %7051 = vmatpush1.bf16.msra.mxu0 %v10229_v62 }
 0xb19   : > { %7053 = vmatprep.subr.bf16.mxu0 %v10234_v55 }
 0xb1c   : > { %7055 = vmatpush1.bf16.msra.mxu0 %v10241_v4 }
 0xb1d   : > { %7057 = vmatprep.subr.bf16.mxu0 %v10275_v16 }
 0xbd4   : > { %v4195_v29 = vpop.f32.mrb[4].mxu1 }
 0xbd5   : > { %v4197_v30 = vpop.f32.mrb[5].mxu1  ;;  %v4200_v6 = vadd.f32 %v4195_v29, %v4127_v14 }
 0xbd6   : > { %v4201_v36 = vadd.f32 %v4197_v30, %v4128_v22 }
 0xbd7   : > { %v4202_v26 = vmul.f32 0.5, %v4200_v6 }
 0xbd8   : > { %7788 = vtanh.f32 %v4201_v36 }
 0xbe2   : > { %v4086_v37 = vpop.f32.mrb[2].mxu0  ;;  %v7789_v63 = vpop.eup %7788 }
 0xbe3   : > { %v4088_v20 = vpop.f32.mrb[3].mxu0  ;;  %4213 = vrot.lane.b32.xlu0 %v7789_v63, %s7966_s7  ;;  %v4091_v3 = vadd.f32 %v4086_v37, %v10397_v27 }
 0xbe4   : > { %v4092_v33 = vadd.f32 %v4088_v20, %v10386_v11 }
 0xbe5   : > { %v4093_v24 = vmul.f32 0.5, %v4091_v3 }
 0xbe6   : > { %7790 = vtanh.f32 %v4092_v33 }
 0xbe7   : > { %7792 = vtanh.f32 %v4202_v26 }
 0xbe8   : > { %7794 = vtanh.f32 %v4093_v24 }
 0xbf0   : > { %v7791_v23 = vpop.eup %7790 }
 0xbf1   : > { %4104 = vrot.lane.b32.xlu1 %v7791_v23, %s7966_s7  ;;  %v7793_v25 = vpop.eup %7792 }
 0xbf2   : > { %v4206_v12 = vmul.f32 0.5, %v7793_v25  ;;  %v7795_v20 = vpop.eup %7794 }
 0xbf3   : > { %v4097_v63 = vmul.f32 0.5, %v7795_v20  ;;  %v4405_v20 = vrot.slane %v10258_v5, 3 }
 0xbf4   : > { %v4208_v28 = vadd.f32 0.5, %v4206_v12 }
 0xbf5   : > { %v4099_v23 = vadd.f32 0.5, %v4097_v63  ;;  %v4409_v63 = vrot.slane %v10254_v52, 2 }
 0xbf6   : > { %v4211_v29 = vmul.f32 %v4208_v28, %v10410_v13  ;;  %v4094_v13 = vmul.f32 0.5, %v4092_v33 }
 0xbf7   : > { %v4102_v9 = vmul.f32 %v4099_v23, %v10406_v21 }
 0xc55   : > { %v4214_v22 = vpop.permute.xlu0 %4213 }
 0xc56   : > { %v4216_v30 = vmul.f32 %v4214_v22, %v4208_v28 }
 0xc58   : > { %4218 = vrot.lane.b32.xlu0 %v4216_v30, %s7966_s7 }
 0xc63   : > { %v4105_v38 = vpop.permute.xlu1 %4104 }
 0xc64   : > { %v4107_v42 = vmul.f32 %v4105_v38, %v4099_v23  ;;  %v4413_v23 = vsel %vm3544_vm9, %v4405_v20, %v4409_v63 }
 0xc66   : > { %4109 = vrot.lane.b32.xlu1 %v4107_v42, %s7966_s7  ;;  %v4203_v42 = vmul.f32 0.5, %v4201_v36 }
 0xcca   : > { %v4219_v58 = vpop.permute.xlu0 %4218 }
 0xccb   : > { %v10458_v37 = vadd.f32 %v4219_v58, %v4211_v29 }
 0xccd   : > { %7796 = vtanh.f32 %v10458_v37 }
 0xcd7   : > { %v7797_v26 = vpop.eup %7796 }
 0xcd8   : > { %v4110_v14 = vpop.permute.xlu1 %4109  ;;  %4224 = vrot.lane.b32.xlu0 %v7797_v26, %s7966_s7 }
 0xcd9   : > { %v10462_v6 = vadd.f32 %v4110_v14, %v4102_v9 }
 0xcdb   : > { %7798 = vtanh.f32 %v10462_v6 }
 0xcdc   : > { %7800 = vtanh.f32 %v4203_v42 }
 0xcdd   : > { %7802 = vtanh.f32 %v4094_v13 }
 0xce5   : > { %v7799_v38 = vpop.eup %7798 }
 0xce6   : > { %4115 = vrot.lane.b32.xlu1 %v7799_v38, %s7966_s7  ;;  %v7801_v3 = vpop.eup %7800 }
 0xce7   : > { %v4207_v24 = vmul.f32 0.5, %v7801_v3  ;;  %v7803_v28 = vpop.eup %7802  ;;  %v4404_v3 = vrot.slane %v10268_v34, 3 }
 0xce8   : > { %v4098_v22 = vmul.f32 0.5, %v7803_v28 }
 0xce9   : > { %v4209_v25 = vadd.f32 0.5, %v4207_v24  ;;  %v4408_v24 = vrot.slane %v10264_v18, 2 }
 0xcea   : > { %v4100_v36 = vadd.f32 0.5, %v4098_v22 }
 0xd4a   : > { %v4225_v12 = vpop.permute.xlu0 %4224 }
 0xd4b   : > { %v4227_v21 = vmul.f32 %v4225_v12, %v4209_v25  ;;  %v4412_v25 = vsel %vm3544_vm9, %v4404_v3, %v4408_v24 }
 0xd4d   : > { %6164 = vmatmul.mubr.msk.f32.vlgmr.msra.gmra.mrb[4].mxu0 %vm570_vm2, %v4227_v21 }
 0xd4e   : > { %7059 = vmatpush1.bf16.msra.mxu0 %v10279_v48  ;;  %4580 = vmatprep.mubr.f32.mxu0 %v10953_v8 }
 0xd4f   : > { %7061 = vmatprep.subr.bf16.mxu0 %v10283_v19 }
 0xd52   : > { %7063 = vmatpush1.bf16.msra.mxu0 %v10290_v39 }
 0xd53   : > { %7065 = vmatprep.subr.bf16.mxu0 %v10295_v43 }
 0xd56   : > { %7067 = vmatpush1.bf16.msra.mxu0 %v10300_v47 }
 0xd57   : > { %7069 = vmatprep.subr.bf16.mxu0 %v10305_v35 }
 0xd58   : > { %v4116_v33 = vpop.permute.xlu1 %4115 }
 0xd59   : > { %v4118_v30 = vmul.f32 %v4116_v33, %v4100_v36 }
 0xd5a   : > { %7071 = vmatpush1.bf16.msra.mxu0 %v10310_v41 }
 0xd5b   : > { %6162 = vmatmul.mubr.msk.f32.vlgmr.msra.gmra.mrb[6].mxu1 %vm570_vm2, %v4118_v30  ;;  %7073 = vmatprep.subr.bf16.mxu0 %v10315_v45 }
 0xd5c   : > { %7027 = vmatpush1.bf16.msra.mxu1 %v10320_v54  ;;  %4369 = vmatprep.mubr.f32.mxu1 %v10953_v8 }
 0xd5d   : > { %7029 = vmatprep.subr.bf16.mxu1 %v10325_v7 }
 0xd60   : > { %7031 = vmatpush1.bf16.msra.mxu1 %v10332_v1 }
 0xd61   : > { %7033 = vmatprep.subr.bf16.mxu1 %v10338_v15 }
 0xd64   : > { %7035 = vmatpush1.bf16.msra.mxu1 %v10343_v17 }
 0xd65   : > { %7037 = vmatprep.subr.bf16.mxu1 %v10348_v10 }
 0xd68   : > { %7039 = vmatpush1.bf16.msra.mxu1 %v10354_v2 }
 0xd69   : > { %7089 = vmatprep.subr.bf16.mxu1 %v10200_v31 }
 0xd6b   : > { %6163 = vmatmul.mubr.msk.f32.vlgmr.msra.gmra.mrb[6].mxu1 %vm570_vm2, %v4227_v21 }
 0xd6c   : > { %7091 = vmatpush1.bf16.msra.mxu1 %v10204_v50  ;;  %4763 = vmatprep.mubr.f32.mxu1 %v10953_v8 }
 0xd6d   : > { %7093 = vmatprep.subr.bf16.mxu1 %v10208_v32 }
 0xd70   : > { %7095 = vmatpush1.bf16.msra.mxu1 %v10215_v0 }
 0xd71   : > { %7097 = vmatprep.subr.bf16.mxu1 %v10221_v40 }
 0xd74   : > { %7099 = vmatpush1.bf16.msra.mxu1 %v10229_v62 }
 0xd75   : > { %7101 = vmatprep.subr.bf16.mxu1 %v10234_v55 }
 0xd78   : > { %7103 = vmatpush1.bf16.msra.mxu1 %v10241_v4 }
 0xd79   : > { %7105 = vmatprep.subr.bf16.mxu1 %v10275_v16 }
 0xe20   : > { %v4480_v29 = vpop.f32.mrb[4].mxu0 }
 0xe21   : > { %v4482_v58 = vpop.f32.mrb[5].mxu0  ;;  %v4485_v12 = vadd.f32 %v4480_v29, %v4412_v25 }
 0xe22   : > { %v4486_v9 = vadd.f32 %v4482_v58, %v4413_v23 }
 0xe23   : > { %v4487_v21 = vmul.f32 0.5, %v4485_v12 }
 0xe24   : > { %7804 = vtanh.f32 %v4486_v9 }
 0xe2e   : > { %v7805_v14 = vpop.eup %7804 }
 0xe2f   : > { %4498 = vrot.lane.b32.xlu0 %v7805_v14, %s7966_s7 }
 0xe3e   : > { %v4371_v26 = vpop.f32.mrb[6].mxu1 }
 0xe3f   : > { %v4373_v38 = vpop.f32.mrb[7].mxu1  ;;  %v4376_v30 = vadd.f32 %v4371_v26, %v10397_v27 }
 0xe40   : > { %v4377_v42 = vadd.f32 %v4373_v38, %v10386_v11 }
 0xe41   : > { %v4378_v63 = vmul.f32 0.5, %v4376_v30 }
 0xe42   : > { %7806 = vtanh.f32 %v4377_v42 }
 0xe43   : > { %7808 = vtanh.f32 %v4487_v21 }
 0xe44   : > { %7810 = vtanh.f32 %v4378_v63 }
 0xe4c   : > { %v7807_v13 = vpop.eup %7806 }
 0xe4d   : > { %4389 = vrot.lane.b32.xlu1 %v7807_v13, %s7966_s7  ;;  %v7809_v28 = vpop.eup %7808 }
 0xe4e   : > { %v4491_v22 = vmul.f32 0.5, %v7809_v28  ;;  %v7811_v23 = vpop.eup %7810 }
 0xe4f   : > { %v4382_v58 = vmul.f32 0.5, %v7811_v23 }
 0xe50   : > { %v4493_v36 = vadd.f32 0.5, %v4491_v22  ;;  %v4488_v22 = vmul.f32 0.5, %v4486_v9 }
 0xe51   : > { %v4384_v14 = vadd.f32 0.5, %v4382_v58 }
 0xe52   : > { %v4496_v29 = vmul.f32 %v4493_v36, %v10458_v37 }
 0xe53   : > { %v4387_v25 = vmul.f32 %v4384_v14, %v10462_v6  ;;  %v4379_v6 = vmul.f32 0.5, %v4377_v42 }
 0xea1   : > { %v4499_v33 = vpop.permute.xlu0 %4498 }
 0xea2   : > { %v4501_v20 = vmul.f32 %v4499_v33, %v4493_v36 }
 0xea4   : > { %4503 = vrot.lane.b32.xlu0 %v4501_v20, %s7966_s7 }
 0xebf   : > { %v4390_v38 = vpop.permute.xlu1 %4389 }
 0xec0   : > { %v4392_v13 = vmul.f32 %v4390_v38, %v4384_v14  ;;  %v4690_v14 = vrot.slane %v10258_v5, 4  ;;  %v4694_v38 = vrot.slane %v10254_v52, 3 }
 0xec2   : > { %4394 = vrot.lane.b32.xlu1 %v4392_v13, %s7966_s7  ;;  %v4698_v13 = vsel %vm3544_vm9, %v4690_v14, %v4694_v38 }
 0xf16   : > { %v4504_v3 = vpop.permute.xlu0 %4503 }
 0xf17   : > { %v10510_v24 = vadd.f32 %v4504_v3, %v4496_v29 }
 0xf19   : > { %7812 = vtanh.f32 %v10510_v24 }
 0xf23   : > { %v7813_v26 = vpop.eup %7812 }
 0xf24   : > { %4509 = vrot.lane.b32.xlu0 %v7813_v26, %s7966_s7 }
 0xf34   : > { %v4395_v12 = vpop.permute.xlu1 %4394 }
 0xf35   : > { %v10515_v21 = vadd.f32 %v4395_v12, %v4387_v25 }
 0xf37   : > { %7814 = vtanh.f32 %v10515_v21 }
 0xf38   : > { %7816 = vtanh.f32 %v4488_v22 }
 0xf39   : > { %7818 = vtanh.f32 %v4379_v6 }
 0xf41   : > { %v7815_v28 = vpop.eup %7814 }
 0xf42   : > { %4400 = vrot.lane.b32.xlu1 %v7815_v28, %s7966_s7  ;;  %v7817_v37 = vpop.eup %7816 }
 0xf43   : > { %v4492_v36 = vmul.f32 0.5, %v7817_v37  ;;  %v7819_v9 = vpop.eup %7818 }
 0xf44   : > { %v4383_v63 = vmul.f32 0.5, %v7819_v9 }
 0xf45   : > { %v4494_v33 = vadd.f32 0.5, %v4492_v36  ;;  %v4689_v36 = vrot.slane %v10268_v34, 4 }
 0xf46   : > { %v4385_v23 = vadd.f32 0.5, %v4383_v63 }
 0xf96   : > { %v4510_v30 = vpop.permute.xlu0 %4509 }
 0xf97   : > { %v4512_v20 = vmul.f32 %v4510_v30, %v4494_v33  ;;  %v4693_v33 = vrot.slane %v10264_v18, 3 }
 0xf99   : > { %6167 = vmatmul.mubr.msk.f32.vlgmr.msra.gmra.mrb[8].mxu1 %vm570_vm2, %v4512_v20  ;;  %v4697_v30 = vsel %vm3544_vm9, %v4689_v36, %v4693_v33 }
 0xf9a   : > { %7107 = vmatpush1.bf16.msra.mxu1 %v10279_v48  ;;  %4865 = vmatprep.mubr.f32.mxu1 %v10953_v8 }
 0xf9b   : > { %7109 = vmatprep.subr.bf16.mxu1 %v10283_v19 }
 0xf9e   : > { %7111 = vmatpush1.bf16.msra.mxu1 %v10290_v39 }
 0xf9f   : > { %7113 = vmatprep.subr.bf16.mxu1 %v10295_v43 }
 0xfa2   : > { %7115 = vmatpush1.bf16.msra.mxu1 %v10300_v47 }
 0xfa3   : > { %7117 = vmatprep.subr.bf16.mxu1 %v10305_v35 }
 0xfa6   : > { %7119 = vmatpush1.bf16.msra.mxu1 %v10310_v41 }
 0xfa7   : > { %7121 = vmatprep.subr.bf16.mxu1 %v10315_v45 }
 0xfb4   : > { %v4401_v58 = vpop.permute.xlu1 %4400 }
 0xfb5   : > { %v4403_v42 = vmul.f32 %v4401_v58, %v4385_v23 }
 0xfb7   : > { %6165 = vmatmul.mubr.msk.f32.vlgmr.msra.gmra.mrb[6].mxu0 %vm570_vm2, %v4403_v42 }
 0xfb8   : > { %7075 = vmatpush1.bf16.msra.mxu0 %v10320_v54  ;;  %4654 = vmatprep.mubr.f32.mxu0 %v10953_v8 }
 0xfb9   : > { %7077 = vmatprep.subr.bf16.mxu0 %v10325_v7 }
 0xfbc   : > { %7079 = vmatpush1.bf16.msra.mxu0 %v10332_v1 }
 0xfbd   : > { %7081 = vmatprep.subr.bf16.mxu0 %v10338_v15 }
 0xfc0   : > { %7083 = vmatpush1.bf16.msra.mxu0 %v10343_v17 }
 0xfc1   : > { %7085 = vmatprep.subr.bf16.mxu0 %v10348_v10 }
 0xfc4   : > { %7087 = vmatpush1.bf16.msra.mxu0 %v10354_v2 }
 0xfc5   : > { %7137 = vmatprep.subr.bf16.mxu0 %v10200_v31 }
 0xfc7   : > { %6166 = vmatmul.mubr.msk.f32.vlgmr.msra.gmra.mrb[6].mxu0 %vm570_vm2, %v4512_v20 }
 0xfc8   : > { %7139 = vmatpush1.bf16.msra.mxu0 %v10204_v50  ;;  %5048 = vmatprep.mubr.f32.mxu0 %v10953_v8 }
 0xfc9   : > { %7141 = vmatprep.subr.bf16.mxu0 %v10208_v32 }
 0xfcc   : > { %7143 = vmatpush1.bf16.msra.mxu0 %v10215_v0 }
 0xfcd   : > { %7145 = vmatprep.subr.bf16.mxu0 %v10221_v40 }
 0xfd0   : > { %7147 = vmatpush1.bf16.msra.mxu0 %v10229_v62 }
 0xfd1   : > { %7149 = vmatprep.subr.bf16.mxu0 %v10234_v55 }
 0xfd4   : > { %7151 = vmatpush1.bf16.msra.mxu0 %v10241_v4 }
 0xfd5   : > { %7153 = vmatprep.subr.bf16.mxu0 %v10275_v16 }
0x106c   : > { %v4765_v29 = vpop.f32.mrb[8].mxu1 }
0x106d   : > { %v4767_v3 = vpop.f32.mrb[9].mxu1  ;;  %v4770_v20 = vadd.f32 %v4765_v29, %v4697_v30 }
0x106e   : > { %v4771_v26 = vadd.f32 %v4767_v3, %v4698_v13 }
0x106f   : > { %v4772_v6 = vmul.f32 0.5, %v4770_v20 }
0x1070   : > { %7820 = vtanh.f32 %v4771_v26 }
0x107a   : > { %v7821_v25 = vpop.eup %7820 }
0x107b   : > { %4783 = vrot.lane.b32.xlu0 %v7821_v25, %s7966_s7 }
0x109a   : > { %v4656_v12 = vpop.f32.mrb[6].mxu0 }
0x109b   : > { %v4658_v28 = vpop.f32.mrb[7].mxu0  ;;  %v4661_v14 = vadd.f32 %v4656_v12, %v10397_v27 }
0x109c   : > { %v4662_v22 = vadd.f32 %v4658_v28, %v10386_v11 }
0x109d   : > { %v4663_v38 = vmul.f32 0.5, %v4661_v14 }
0x109e   : > { %7822 = vtanh.f32 %v4662_v22 }
0x109f   : > { %7824 = vtanh.f32 %v4772_v6 }
0x10a0   : > { %7826 = vtanh.f32 %v4663_v38 }
0x10a8   : > { %v7823_v37 = vpop.eup %7822 }
0x10a9   : > { %4674 = vrot.lane.b32.xlu1 %v7823_v37, %s7966_s7  ;;  %v7825_v9 = vpop.eup %7824 }
0x10aa   : > { %v4776_v63 = vmul.f32 0.5, %v7825_v9  ;;  %v7827_v13 = vpop.eup %7826 }
0x10ab   : > { %v4667_v3 = vmul.f32 0.5, %v7827_v13 }
0x10ac   : > { %v4778_v23 = vadd.f32 0.5, %v4776_v63  ;;  %v4773_v63 = vmul.f32 0.5, %v4771_v26 }
0x10ad   : > { %v4669_v25 = vadd.f32 0.5, %v4667_v3 }
0x10ae   : > { %v4781_v29 = vmul.f32 %v4778_v23, %v10510_v24 }
0x10af   : > { %v4672_v12 = vmul.f32 %v4669_v25, %v10515_v21  ;;  %v4664_v21 = vmul.f32 0.5, %v4662_v22  ;;  %v4975_v22 = vrot.slane %v10258_v5, 5  ;;  %v4974_v5 = vrot.slane %v10268_v34, 5 }
0x10ed   : > { %v4784_v58 = vpop.permute.xlu0 %4783 }
0x10ee   : > { %v4786_v42 = vmul.f32 %v4784_v58, %v4778_v23 }
0x10f0   : > { %4788 = vrot.lane.b32.xlu0 %v4786_v42, %s7966_s7 }
0x111b   : > { %v4675_v28 = vpop.permute.xlu1 %4674 }
0x111c   : > { %v4677_v37 = vmul.f32 %v4675_v28, %v4669_v25  ;;  %v4979_v28 = vrot.slane %v10254_v52, 4  ;;  %v4978_v52 = vrot.slane %v10264_v18, 4 }
0x111e   : > { %4679 = vrot.lane.b32.xlu1 %v4677_v37, %s7966_s7  ;;  %v4983_v37 = vsel %vm3544_vm9, %v4975_v22, %v4979_v28 }
0x1162   : > { %v4789_v36 = vpop.permute.xlu0 %4788 }
0x1163   : > { %v10562_v33 = vadd.f32 %v4789_v36, %v4781_v29 }
0x1165   : > { %7828 = vtanh.f32 %v10562_v33 }
0x116f   : > { %v7829_v30 = vpop.eup %7828 }
0x1170   : > { %4794 = vrot.lane.b32.xlu0 %v7829_v30, %s7966_s7 }
0x1190   : > { %v4680_v20 = vpop.permute.xlu1 %4679 }
0x1191   : > { %v10567_v6 = vadd.f32 %v4680_v20, %v4672_v12 }
0x1193   : > { %7830 = vtanh.f32 %v10567_v6 }
0x1194   : > { %7832 = vtanh.f32 %v4773_v63 }
0x1195   : > { %7834 = vtanh.f32 %v4664_v21 }
0x119d   : > { %v7831_v9 = vpop.eup %7830 }
0x119e   : > { %4685 = vrot.lane.b32.xlu1 %v7831_v9, %s7966_s7  ;;  %v7833_v24 = vpop.eup %7832 }
0x119f   : > { %v4777_v23 = vmul.f32 0.5, %v7833_v24  ;;  %v7835_v26 = vpop.eup %7834 }
0x11a0   : > { %v4668_v38 = vmul.f32 0.5, %v7835_v26 }
0x11a1   : > { %v4779_v58 = vadd.f32 0.5, %v4777_v23  ;;  %v4982_v23 = vsel %vm3544_vm9, %v4974_v5, %v4978_v52 }
0x11a2   : > { %v4670_v13 = vadd.f32 0.5, %v4668_v38 }
0x11e2   : > { %v4795_v42 = vpop.permute.xlu0 %4794 }
0x11e3   : > { %v4797_v14 = vmul.f32 %v4795_v42, %v4779_v58 }
0x11e5   : > { %6170 = vmatmul.mubr.msk.f32.vlgmr.msra.gmra.mrb[8].mxu0 %vm570_vm2, %v4797_v14 }
0x11e6   : > { %7155 = vmatpush1.bf16.msra.mxu0 %v10279_v48  ;;  %5150 = vmatprep.mubr.f32.mxu0 %v10953_v8 }
0x11e7   : > { %7157 = vmatprep.subr.bf16.mxu0 %v10283_v19 }
0x11ea   : > { %7159 = vmatpush1.bf16.msra.mxu0 %v10290_v39 }
0x11eb   : > { %7161 = vmatprep.subr.bf16.mxu0 %v10295_v43 }
0x11ee   : > { %7163 = vmatpush1.bf16.msra.mxu0 %v10300_v47 }
0x11ef   : > { %7165 = vmatprep.subr.bf16.mxu0 %v10305_v35 }
0x11f2   : > { %7167 = vmatpush1.bf16.msra.mxu0 %v10310_v41 }
0x11f3   : > { %7169 = vmatprep.subr.bf16.mxu0 %v10315_v45 }
0x1210   : > { %v4686_v3 = vpop.permute.xlu1 %4685 }
0x1211   : > { %v4688_v25 = vmul.f32 %v4686_v3, %v4670_v13 }
0x1213   : > { %6168 = vmatmul.mubr.msk.f32.vlgmr.msra.gmra.mrb[10].mxu1 %vm570_vm2, %v4688_v25 }
0x1214   : > { %7123 = vmatpush1.bf16.msra.mxu1 %v10320_v54  ;;  %4939 = vmatprep.mubr.f32.mxu1 %v10953_v8 }
0x1215   : > { %7125 = vmatprep.subr.bf16.mxu1 %v10325_v7 }
0x1218   : > { %7127 = vmatpush1.bf16.msra.mxu1 %v10332_v1 }
0x1219   : > { %7129 = vmatprep.subr.bf16.mxu1 %v10338_v15 }
0x121c   : > { %7131 = vmatpush1.bf16.msra.mxu1 %v10343_v17 }
0x121d   : > { %7133 = vmatprep.subr.bf16.mxu1 %v10348_v10 }
0x1220   : > { %7135 = vmatpush1.bf16.msra.mxu1 %v10354_v2 }
0x1221   : > { %7185 = vmatprep.subr.bf16.mxu1 %v10200_v31 }
0x1223   : > { %6169 = vmatmul.mubr.msk.f32.vlgmr.msra.gmra.mrb[10].mxu1 %vm570_vm2, %v4797_v14 }
0x1224   : > { %7187 = vmatpush1.bf16.msra.mxu1 %v10204_v50  ;;  %5333 = vmatprep.mubr.f32.mxu1 %v10953_v8 }
0x1225   : > { %7189 = vmatprep.subr.bf16.mxu1 %v10208_v32 }
0x1228   : > { %7191 = vmatpush1.bf16.msra.mxu1 %v10215_v0 }
0x1229   : > { %7193 = vmatprep.subr.bf16.mxu1 %v10221_v40 }
0x122c   : > { %7195 = vmatpush1.bf16.msra.mxu1 %v10229_v62 }
0x122d   : > { %7197 = vmatprep.subr.bf16.mxu1 %v10234_v55 }
0x1230   : > { %7199 = vmatpush1.bf16.msra.mxu1 %v10241_v4 }
0x1231   : > { %7201 = vmatprep.subr.bf16.mxu1 %v10275_v16 }
0x12b8   : > { %v5050_v29 = vpop.f32.mrb[8].mxu0 }
0x12b9   : > { %v5052_v36 = vpop.f32.mrb[9].mxu0  ;;  %v5055_v58 = vadd.f32 %v5050_v29, %v4982_v23 }
0x12ba   : > { %v5056_v30 = vadd.f32 %v5052_v36, %v4983_v37 }
0x12bb   : > { %v5057_v42 = vmul.f32 0.5, %v5055_v58 }
0x12bc   : > { %7836 = vtanh.f32 %v5056_v30  ;;  %v5058_v23 = vmul.f32 0.5, %v5056_v30 }
0x12c6   : > { %v7837_v12 = vpop.eup %7836 }
0x12c7   : > { %5068 = vrot.lane.b32.xlu0 %v7837_v12, %s7966_s7 }
0x12f6   : > { %v4941_v20 = vpop.f32.mrb[10].mxu1 }
0x12f7   : > { %v4943_v9 = vpop.f32.mrb[11].mxu1  ;;  %v4946_v3 = vadd.f32 %v4941_v20, %v10397_v27 }
0x12f8   : > { %v4947_v63 = vadd.f32 %v4943_v9, %v10386_v11 }
0x12f9   : > { %v4948_v25 = vmul.f32 0.5, %v4946_v3 }
0x12fa   : > { %7838 = vtanh.f32 %v4947_v63 }
0x12fb   : > { %7840 = vtanh.f32 %v5057_v42 }
0x12fc   : > { %7842 = vtanh.f32 %v4948_v25 }
0x1304   : > { %v7839_v24 = vpop.eup %7838 }
0x1305   : > { %4959 = vrot.lane.b32.xlu1 %v7839_v24, %s7966_s7  ;;  %v7841_v14 = vpop.eup %7840 }
0x1306   : > { %v5061_v21 = vmul.f32 0.5, %v7841_v14  ;;  %v7843_v22 = vpop.eup %7842 }
0x1307   : > { %v4952_v34 = vmul.f32 0.5, %v7843_v22 }
0x1308   : > { %v5063_v26 = vadd.f32 0.5, %v5061_v21 }
0x1309   : > { %v4954_v28 = vadd.f32 0.5, %v4952_v34 }
0x130a   : > { %v5066_v29 = vmul.f32 %v5063_v26, %v10562_v33 }
0x130b   : > { %v4957_v20 = vmul.f32 %v4954_v28, %v10567_v6  ;;  %v4949_v6 = vmul.f32 0.5, %v4947_v63  ;;  %v10658_v63 = vld [vmem:[%s10251_s8 + $0x88] sm:$0xff] }
0x1339   : > { %v5069_v38 = vpop.permute.xlu0 %5068 }
0x133a   : > { %v5071_v13 = vmul.f32 %v5069_v38, %v5063_v26 }
0x133c   : > { %5073 = vrot.lane.b32.xlu0 %v5071_v13, %s7966_s7 }
0x1377   : > { %v4960_v18 = vpop.permute.xlu1 %4959 }
0x1378   : > { %v4962_v37 = vmul.f32 %v4960_v18, %v4954_v28  ;;  %v10666_v28 = vld [vmem:[%s10251_s8] sm:$0xff] }
0x1379   : > { %v5259_v18 = vrot.slane %v10666_v28, 6 }
0x137a   : > { %4964 = vrot.lane.b32.xlu1 %v4962_v37, %s7966_s7  ;;  %v10670_v37 = vld [vmem:[%s10251_s8 + $0x80] sm:$0xff] }
0x13ae   : > { %v5074_v36 = vpop.permute.xlu0 %5073 }
0x13af   : > { %v10614_v12 = vadd.f32 %v5074_v36, %v5066_v29  ;;  %v5263_v29 = vrot.slane %v10670_v37, 5 }
0x13b1   : > { %7844 = vtanh.f32 %v10614_v12  ;;  %v5267_v36 = vsel %vm3544_vm9, %v5259_v18, %v5263_v29 }
0x13bb   : > { %v7845_v9 = vpop.eup %7844 }
0x13bc   : > { %5079 = vrot.lane.b32.xlu0 %v7845_v9, %s7966_s7 }
0x13ec   : > { %v4965_v24 = vpop.permute.xlu1 %4964 }
0x13ed   : > { %v10619_v5 = vadd.f32 %v4965_v24, %v4957_v20 }
0x13ef   : > { %7846 = vtanh.f32 %v10619_v5 }
0x13f0   : > { %7848 = vtanh.f32 %v5058_v23 }
0x13f1   : > { %7850 = vtanh.f32 %v4949_v6 }
0x13f9   : > { %v7847_v52 = vpop.eup %7846 }
0x13fa   : > { %4970 = vrot.lane.b32.xlu1 %v7847_v52, %s7966_s7  ;;  %v7849_v33 = vpop.eup %7848 }
0x13fb   : > { %v5062_v58 = vmul.f32 0.5, %v7849_v33  ;;  %v7851_v30 = vpop.eup %7850 }
0x13fc   : > { %v4953_v26 = vmul.f32 0.5, %v7851_v30 }
0x13fd   : > { %v5064_v42 = vadd.f32 0.5, %v5062_v58 }
0x13fe   : > { %v4955_v38 = vadd.f32 0.5, %v4953_v26 }
0x142e   : > { %v5080_v14 = vpop.permute.xlu0 %5079 }
0x142f   : > { %v5082_v21 = vmul.f32 %v5080_v14, %v5064_v42 }
0x1431   : > { %6173 = vmatmul.mubr.msk.f32.vlgmr.msra.gmra.mrb[12].mxu1 %vm570_vm2, %v5082_v21 }
0x1432   : > { %7203 = vmatpush1.bf16.msra.mxu1 %v10279_v48  ;;  %5435 = vmatprep.mubr.f32.mxu1 %v10953_v8 }
0x1433   : > { %7205 = vmatprep.subr.bf16.mxu1 %v10283_v19 }
0x1436   : > { %7207 = vmatpush1.bf16.msra.mxu1 %v10290_v39 }
0x1437   : > { %7209 = vmatprep.subr.bf16.mxu1 %v10295_v43 }
0x143a   : > { %7211 = vmatpush1.bf16.msra.mxu1 %v10300_v47 }
0x143b   : > { %7213 = vmatprep.subr.bf16.mxu1 %v10305_v35 }
0x143e   : > { %7215 = vmatpush1.bf16.msra.mxu1 %v10310_v41 }
0x143f   : > { %7217 = vmatprep.subr.bf16.mxu1 %v10315_v45 }
0x146c   : > { %v4971_v13 = vpop.permute.xlu1 %4970 }
0x146d   : > { %v4973_v3 = vmul.f32 %v4971_v13, %v4955_v38 }
0x146f   : > { %6171 = vmatmul.mubr.msk.f32.vlgmr.msra.gmra.mrb[10].mxu0 %vm570_vm2, %v4973_v3 }
0x1470   : > { %7171 = vmatpush1.bf16.msra.mxu0 %v10320_v54  ;;  %5224 = vmatprep.mubr.f32.mxu0 %v10953_v8 }
0x1471   : > { %7173 = vmatprep.subr.bf16.mxu0 %v10325_v7 }
0x1474   : > { %7175 = vmatpush1.bf16.msra.mxu0 %v10332_v1 }
0x1475   : > { %7177 = vmatprep.subr.bf16.mxu0 %v10338_v15 }
0x1478   : > { %7179 = vmatpush1.bf16.msra.mxu0 %v10343_v17 }
0x1479   : > { %7181 = vmatprep.subr.bf16.mxu0 %v10348_v10 }
0x147c   : > { %7183 = vmatpush1.bf16.msra.mxu0 %v10354_v2 }
0x147d   : > { %7233 = vmatprep.subr.bf16.mxu0 %v10200_v31  ;;  %v10654_v31 = vld [vmem:[%s10251_s8 + $0x8] sm:$0xff] }
0x147f   : > { %6172 = vmatmul.mubr.msk.f32.vlgmr.msra.gmra.mrb[10].mxu0 %vm570_vm2, %v5082_v21 }
0x1480   : > { %7235 = vmatpush1.bf16.msra.mxu0 %v10204_v50  ;;  %5618 = vmatprep.mubr.f32.mxu0 %v10953_v8  ;;  %v5260_v50 = vrot.slane %v10654_v31, 6 }
0x1481   : > { %7237 = vmatprep.subr.bf16.mxu0 %v10208_v32  ;;  %v5264_v32 = vrot.slane %v10658_v63, 5 }
0x1484   : > { %7239 = vmatpush1.bf16.msra.mxu0 %v10215_v0  ;;  %v5268_v0 = vsel %vm3544_vm9, %v5260_v50, %v5264_v32 }
0x1485   : > { %7241 = vmatprep.subr.bf16.mxu0 %v10221_v40 }
0x1488   : > { %7243 = vmatpush1.bf16.msra.mxu0 %v10229_v62 }
0x1489   : > { %7245 = vmatprep.subr.bf16.mxu0 %v10234_v55 }
0x148c   : > { %7247 = vmatpush1.bf16.msra.mxu0 %v10241_v4 }
0x148d   : > { %7249 = vmatprep.subr.bf16.mxu0 %v10275_v16 }
0x1504   : > { %v5335_v40 = vpop.f32.mrb[12].mxu1 }
0x1505   : > { %v5337_v62 = vpop.f32.mrb[13].mxu1  ;;  %v5340_v9 = vadd.f32 %v5335_v40, %v5267_v36 }
0x1506   : > { %v5341_v25 = vadd.f32 %v5337_v62, %v5268_v0 }
0x1507   : > { %v5342_v20 = vmul.f32 0.5, %v5340_v9 }
0x1508   : > { %7852 = vtanh.f32 %v5341_v25 }
0x1512   : > { %v7853_v55 = vpop.eup %7852 }
0x1513   : > { %5353 = vrot.lane.b32.xlu0 %v7853_v55, %s7966_s7 }
0x1552   : > { %v5226_v4 = vpop.f32.mrb[10].mxu0 }
0x1553   : > { %v5228_v16 = vpop.f32.mrb[11].mxu0  ;;  %v5231_v42 = vadd.f32 %v5226_v4, %v10397_v27  ;;  %v5343_v4 = vmul.f32 0.5, %v5341_v25 }
0x1554   : > { %v5232_v22 = vadd.f32 %v5228_v16, %v10386_v11 }
0x1555   : > { %v5233_v14 = vmul.f32 0.5, %v5231_v42 }
0x1556   : > { %7854 = vtanh.f32 %v5232_v22 }
0x1557   : > { %7856 = vtanh.f32 %v5342_v20 }
0x1558   : > { %7858 = vtanh.f32 %v5233_v14 }
0x1560   : > { %v7855_v34 = vpop.eup %7854 }
0x1561   : > { %5244 = vrot.lane.b32.xlu1 %v7855_v34, %s7966_s7  ;;  %v7857_v24 = vpop.eup %7856 }
0x1562   : > { %v5346_v52 = vmul.f32 0.5, %v7857_v24  ;;  %v7859_v21 = vpop.eup %7858 }
0x1563   : > { %v5237_v6 = vmul.f32 0.5, %v7859_v21 }
0x1564   : > { %v5348_v23 = vadd.f32 0.5, %v5346_v52 }
0x1565   : > { %v5239_v30 = vadd.f32 0.5, %v5237_v6 }
0x1566   : > { %v5351_v13 = vmul.f32 %v5348_v23, %v10614_v12 }
0x1567   : > { %v5242_v0 = vmul.f32 %v5239_v30, %v10619_v5  ;;  %v5234_v5 = vmul.f32 0.5, %v5232_v22 }
0x1585   : > { %v5354_v33 = vpop.permute.xlu0 %5353 }
0x1586   : > { %v5356_v58 = vmul.f32 %v5354_v33, %v5348_v23  ;;  %v5544_v23 = vrot.slane %v10666_v28, 7 }
0x1588   : > { %5358 = vrot.lane.b32.xlu0 %v5356_v58, %s7966_s7 }
0x15d3   : > { %v5245_v26 = vpop.permute.xlu1 %5244 }
0x15d4   : > { %v5247_v38 = vmul.f32 %v5245_v26, %v5239_v30 }
0x15d6   : > { %5249 = vrot.lane.b32.xlu1 %v5247_v38, %s7966_s7 }
0x15fa   : > { %v5359_v3 = vpop.permute.xlu0 %5358 }
0x15fb   : > { %v10678_v50 = vadd.f32 %v5359_v3, %v5351_v13 }
0x15fd   : > { %7860 = vtanh.f32 %v10678_v50 }
0x1607   : > { %v7861_v32 = vpop.eup %7860 }
0x1608   : > { %5364 = vrot.lane.b32.xlu0 %v7861_v32, %s7966_s7 }
0x1648   : > { %v5250_v40 = vpop.permute.xlu1 %5249 }
0x1649   : > { %v10683_v62 = vadd.f32 %v5250_v40, %v5242_v0 }
0x164b   : > { %7862 = vtanh.f32 %v10683_v62 }
0x164c   : > { %7864 = vtanh.f32 %v5343_v4 }
0x164d   : > { %7866 = vtanh.f32 %v5234_v5 }
0x1655   : > { %v7863_v55 = vpop.eup %7862 }
0x1656   : > { %5255 = vrot.lane.b32.xlu1 %v7863_v55, %s7966_s7  ;;  %v7865_v12 = vpop.eup %7864 }
0x1657   : > { %v5347_v16 = vmul.f32 0.5, %v7865_v12  ;;  %v7867_v25 = vpop.eup %7866 }
0x1659   : > { %v5349_v34 = vadd.f32 0.5, %v5347_v16 }
0x167a   : > { %v5365_v18 = vpop.permute.xlu0 %5364 }
0x167b   : > { %v5367_v29 = vmul.f32 %v5365_v18, %v5349_v34 }
0x167d   : > { %6176 = vmatmul.mubr.msk.f32.vlgmr.msra.gmra.mrb[12].mxu0 %vm570_vm2, %v5367_v29 }
0x167e   : > { %7251 = vmatpush1.bf16.msra.mxu0 %v10279_v48  ;;  %5720 = vmatprep.mubr.f32.mxu0 %v10953_v8  ;;  %v5238_v48 = vmul.f32 0.5, %v7867_v25 }
0x167f   : > { %7253 = vmatprep.subr.bf16.mxu0 %v10283_v19  ;;  %v5545_v19 = vrot.slane %v10654_v31, 7  ;;  %v5548_v31 = vrot.slane %v10670_v37, 6 }
0x1680   : > { %v5240_v36 = vadd.f32 0.5, %v5238_v48 }
0x1682   : > { %7255 = vmatpush1.bf16.msra.mxu0 %v10290_v39  ;;  %v5549_v39 = vrot.slane %v10658_v63, 6  ;;  %v5552_v63 = vsel %vm3544_vm9, %v5544_v23, %v5548_v31 }
0x1683   : > { %7257 = vmatprep.subr.bf16.mxu0 %v10295_v43 }
0x1684   : > { %v5553_v43 = vsel %vm3544_vm9, %v5545_v19, %v5549_v39 }
0x1686   : > { %7259 = vmatpush1.bf16.msra.mxu0 %v10300_v47 }
0x1687   : > { %7261 = vmatprep.subr.bf16.mxu0 %v10305_v35 }
0x168a   : > { %7263 = vmatpush1.bf16.msra.mxu0 %v10310_v41 }
0x168b   : > { %7265 = vmatprep.subr.bf16.mxu0 %v10315_v45 }
0x16c8   : > { %v5256_v9 = vpop.permute.xlu1 %5255 }
0x16c9   : > { %v5258_v20 = vmul.f32 %v5256_v9, %v5240_v36 }
0x16cb   : > { %6174 = vmatmul.mubr.msk.f32.vlgmr.msra.gmra.mrb[14].mxu1 %vm570_vm2, %v5258_v20 }
0x16cc   : > { %7219 = vmatpush1.bf16.msra.mxu1 %v10320_v54  ;;  %5509 = vmatprep.mubr.f32.mxu1 %v10953_v8 }
0x16cd   : > { %7221 = vmatprep.subr.bf16.mxu1 %v10325_v7 }
0x16d0   : > { %7223 = vmatpush1.bf16.msra.mxu1 %v10332_v1 }
0x16d1   : > { %7225 = vmatprep.subr.bf16.mxu1 %v10338_v15 }
0x16d4   : > { %7227 = vmatpush1.bf16.msra.mxu1 %v10343_v17 }
0x16d5   : > { %7229 = vmatprep.subr.bf16.mxu1 %v10348_v10 }
0x16d8   : > { %7231 = vmatpush1.bf16.msra.mxu1 %v10354_v2 }
0x16db   : > { %6175 = vmatmul.mubr.msk.f32.vlgmr.msra.gmra.mrb[14].mxu1 %vm570_vm2, %v5367_v29 }
0x1750   : > { %v5620_v47 = vpop.f32.mrb[12].mxu0 }
0x1751   : > { %v5622_v35 = vpop.f32.mrb[13].mxu0  ;;  %v5625_v33 = vadd.f32 %v5620_v47, %v5552_v63 }
0x1752   : > { %v5626_v41 = vadd.f32 %v5622_v35, %v5553_v43 }
0x1753   : > { %v5627_v42 = vmul.f32 0.5, %v5625_v33 }
0x1754   : > { %7868 = vtanh.f32 %v5626_v41 }
0x175e   : > { %v7869_v45 = vpop.eup %7868 }
0x175f   : > { %5638 = vrot.lane.b32.xlu0 %v7869_v45, %s7966_s7 }
0x17ae   : > { %v5511_v22 = vpop.f32.mrb[14].mxu1 }
0x17af   : > { %v5513_v24 = vpop.f32.mrb[15].mxu1  ;;  %v5516_v38 = vadd.f32 %v5511_v22, %v10397_v27 }
0x17b0   : > { %v5517_v52 = vadd.f32 %v5513_v24, %v10386_v11 }
0x17b1   : > { %v5518_v28 = vmul.f32 0.5, %v5516_v38 }
0x17b2   : > { %7870 = vtanh.f32 %v5517_v52  ;;  %v5519_v29 = vmul.f32 0.5, %v5517_v52 }
0x17b3   : > { %7872 = vtanh.f32 %v5627_v42  ;;  %v5829_v42 = vld [vmem:[%s10805_s11] sm:$0xff] (%p3519_p0) }
0x17b4   : > { %7874 = vtanh.f32 %v5518_v28 }
0x17bc   : > { %v7871_v58 = vpop.eup %7870 }
0x17bd   : > { %5529 = vrot.lane.b32.xlu1 %v7871_v58, %s7966_s7  ;;  %v7873_v14 = vpop.eup %7872 }
0x17be   : > { %v5631_v21 = vmul.f32 0.5, %v7873_v14  ;;  %v7875_v37 = vpop.eup %7874  ;;  %v5830_v14 = vld [vmem:[%s10805_s11 + $0x8] sm:$0xff] (%p3519_p0) }
0x17bf   : > { %v5522_v13 = vmul.f32 0.5, %v7875_v37 }
0x17c0   : > { %v5633_v6 = vadd.f32 0.5, %v5631_v21  ;;  %v5831_v21 = vld [vmem:[%s10805_s11 + $0x10] sm:$0xff] (%p3519_p0) }
0x17c1   : > { %v5524_v3 = vadd.f32 0.5, %v5522_v13 }
0x17c2   : > { %v5636_v40 = vmul.f32 %v5633_v6, %v10678_v50  ;;  %v5628_v50 = vmul.f32 0.5, %v5626_v41 }
0x17c3   : > { %v5527_v12 = vmul.f32 %v5524_v3, %v10683_v62 }
0x17d1   : > { %v5639_v30 = vpop.permute.xlu0 %5638 }
0x17d2   : > { %v5641_v26 = vmul.f32 %v5639_v30, %v5633_v6  ;;  %v7967_v6 = vmov (%p3519_p0), 0.0|0.0   ;;  %v7281_v30 = vpack.c.bf16 (%p3519_p0), %v5830_v14, %v5829_v42 }
0x17d4   : > { %5643 = vrot.lane.b32.xlu0 %v5641_v26, %s7966_s7 }
0x182f   : > { %v5530_v32 = vpop.permute.xlu1 %5529 }
0x1830   : > { %v5532_v0 = vmul.f32 %v5530_v32, %v5524_v3 }
0x1832   : > { %5534 = vrot.lane.b32.xlu1 %v5532_v0, %s7966_s7 }
0x1846   : > { %v5644_v55 = vpop.permute.xlu0 %5643 }
0x1847   : > { %v10720_v58 = vadd.f32 %v5644_v55, %v5636_v40  }
0x1849   : > { %7876 = vtanh.f32 %v10720_v58 }
0x1853   : > { %v7877_v4 = vpop.eup %7876 }
0x1854   : > { %5649 = vrot.lane.b32.xlu0 %v7877_v4, %s7966_s7 }
0x18a4   : > { %v5535_v16 = vpop.permute.xlu1 %5534 }
0x18a5   : > { %v5537_v34 = vadd.f32 %v5535_v16, %v5527_v12 }
0x18a7   : > { %7878 = vtanh.f32 %v5537_v34 }
0x18a8   : > { %7880 = vtanh.f32 %v5519_v29 }
0x18a9   : > { %7882 = vtanh.f32 %v5628_v50 }
0x18b1   : > { %v7879_v18 = vpop.eup %7878 }
0x18b2   : > { %5540 = vrot.lane.b32.xlu1 %v7879_v18, %s7966_s7  ;;  %v7881_v5 = vpop.eup %7880 }
0x18b3   : > { %v5523_v25 = vmul.f32 0.5, %v7881_v5  ;;  %v7883_v62 = vpop.eup %7882 }
0x18b4   : > { %v5632_v20 = vmul.f32 0.5, %v7883_v62 }
0x18b5   : > { %v5525_v48 = vadd.f32 0.5, %v5523_v25 }
0x18b6   : > { %v5634_v39 = vadd.f32 0.5, %v5632_v20 }
0x18c6   : > { %v5650_v19 = vpop.permute.xlu0 %5649 }
0x18c7   : > { %v5652_v45 = vmul.f32 %v5650_v19, %v5634_v39  }
0x1924   : > { %v5541_v36 = vpop.permute.xlu1 %5540 }
0x1925   : > { %v5543_v9 = vmul.f32 %v5541_v36, %v5525_v48 }
0x1927   : > { %6177 = vmatmul.mubr.msk.f32.vlgmr.msra.gmra.mrb[14].mxu0 %vm570_vm2, %v5543_v9 }
0x1928   : > { %7267 = vmatpush1.bf16.msra.mxu0 %v10320_v54  ;;  %5794 = vmatprep.mubr.f32.mxu0 %v10953_v8 }
0x1929   : > { %7269 = vmatprep.subr.bf16.mxu0 %v10325_v7 }
0x192c   : > { %7271 = vmatpush1.bf16.msra.mxu0 %v10332_v1 }
0x192d   : > { %7273 = vmatprep.subr.bf16.mxu0 %v10338_v15 }
0x1930   : > { %7275 = vmatpush1.bf16.msra.mxu0 %v10343_v17 }
0x1931   : > { %7277 = vmatprep.subr.bf16.mxu0 %v10348_v10 }
0x1934   : > { %7279 = vmatpush1.bf16.msra.mxu0 %v10354_v2 }
0x1935   :  { %7280 = vmatprep.subr.bf16.mxu0 (%p3519_p0), %v7967_v6 }
0x1937   : > { %6178 = vmatmul.mubr.msk.f32.vlgmr.msra.gmra.mrb[14].mxu0 %vm570_vm2, %v5652_v45  ;;  %v5832_v45 = vld [vmem:[%s10805_s11 + $0x18] sm:$0xff] (%p3519_p0) }
0x1938   :  { %6529 = vmatprep.mubr.msk.f32.mxu0 (%p3519_p0), %vm7968_vm10, %v10964_v60  ;;  %7282 = vmatpush3.bf16.msra.mxu0 (%p3519_p0), %v7281_v30  ;;  %v7284_v57 = vpack.c.bf16 (%p3519_p0), %v5832_v45, %v5831_v21 }
0x1939   :  { %7283 = vmatprep.subr.bf16.mxu0 (%p3519_p0), %v7967_v6 }
0x193c   :  { %7285 = vmatpush3.bf16.msra.mxu0 (%p3519_p0), %v7284_v57 }
0x193d   :  { %7286 = vmatprep.subr.bf16.mxu0 (%p3519_p0), %v7967_v6 }
0x1940   :  { %7288 = vmatpush3.bf16.msra.mxu0 (%p3519_p0), %v7287_v44 }
0x1941   :  { %7289 = vmatprep.subr.bf16.mxu0 (%p3519_p0), %v7967_v6 }
0x1944   :  { %7291 = vmatpush3.bf16.msra.mxu0 (%p3519_p0), %v7290_v56 }
0x1a0a   : > { %v5796_v8 = vpop.f32.mrb[14].mxu0 }
0x1a0b   : > { %v5798_v54 = vpop.f32.mrb[15].mxu0  ;;  %v5801_v15 = vadd.f32 %v5796_v8, %v10397_v27 }
0x1a0c   : > { %v5802_v7 = vadd.f32 %v5798_v54, %v10386_v11 }
0x1a0d   : > { %v5803_v17 = vmul.f32 0.5, %v5801_v15 }
0x1a0e   : > { %7884 = vtanh.f32 %v5802_v7  ;;  %v5804_v24 = vmul.f32 0.5, %v5802_v7 }
0x1a0f   : > { %7886 = vtanh.f32 %v5803_v17 }
0x1a18   : > { %v7885_v1 = vpop.eup %7884 }
0x1a19   : > { %5814 = vrot.lane.b32.xlu1 %v7885_v1, %s7966_s7  ;;  %v7887_v10 = vpop.eup %7886 }
0x1a1a   : > { %v5807_v43 = vmul.f32 0.5, %v7887_v10 }
0x1a1c   : > { %v5809_v47 = vadd.f32 0.5, %v5807_v43 }
0x1a1e   : > { %v5812_v41 = vmul.f32 %v5809_v47, %v5537_v34 }
0x1a8b   : > { %v5815_v35 = vpop.permute.xlu1 %5814 }
0x1a8c   : > { %v5817_v2 = vmul.f32 %v5815_v35, %v5809_v47 }
0x1a8e   : > { %5819 = vrot.lane.b32.xlu0 %v5817_v2, %s7966_s7 }
0x1b00   : > { %v5820_v22 = vpop.permute.xlu0 %5819 }
0x1b01   : > { %v5822_v63 = vadd.f32 %v5820_v22, %v5812_v41  }
0x1b03   : > { %7888 = vtanh.f32 %v5822_v63 }
0x1b04   : > { %7890 = vtanh.f32 %v5804_v24 }
0x1b0d   : > { %v7889_v11 = vpop.eup %7888 }
0x1b0e   : > { %5825 = vrot.lane.b32.xlu1 %v7889_v11, %s7966_s7  ;;  %v7891_v52 = vpop.eup %7890 }
0x1b0f   : > { %v5808_v27 = vmul.f32 0.5, %v7891_v52 }
0x1b11   : > { %v5810_v23 = vadd.f32 0.5, %v5808_v27 }
0x1b7d   :  { %3521 = sbr.rel (!%p3519_p0) target bundleno = 1620 (0x654), region = 99 }
0x1b80   : > { %v5826_v31 = vpop.permute.xlu1 %5825 }
0x1b81   : > { %v5828_v33 = vmul.f32 %v5826_v31, %v5810_v23  }
0x1b83   : > { %v10963_v10 = vmov %v5828_v33  ;;  %6530 = vmatmul.mubr.msk.f32.vlgmr.msra.gmra.mrb[0].mxu0 (%p3519_p0), %vm570_vm2, %v5828_v33 }
0x1c56   :  { %v5913_v46 = vpop.f32.mrb[0].mxu0 }
0x1c57   :  { %v5914_v63 = vadd.f32 %v6179_v61, %v5913_v46  ;;  %v6531_v58 = vpop.f32.mrb[1].mxu0 }
0x1c59   :  { %5918 = vst.msk [vmem:[#allocation3] sm:$0x3] %vm5917_vm11, %v5914_v63 }
0x1c5a   :  { %7907 = shalt.err (!%p7904_p5)
}
0x1c5b   :  { %s7908_s19 = scalar_lea.hbm %s10807_s13, 32 }
0x1c5c   :  { %p7909_p6 = scmp.ne.s32.totalorder %s10807_s13, %s7908_s19  ;;  %p7912_p7 = scmp.lt.u32.totalorder %s7908_s19, %s10807_s13 }
0x1c5e   :  { %p7914_p8 = pnand %p7912_p7, %p7909_p6 }
0x1c60   :  { %7917 = shalt.err (!%p7914_p8)
}
0x1c61   :  { %5928 = dma.vmem_to_hbm [thread:$0]  %s5926_s17, 32, %s10807_s13, [#allocation4]  }
0x1c62   :  { %7938 = dma.done.wait [#allocation4], 32  }
0x1c63   :  { %7939 = vsyncadd [#allocation4], 4294967264 }
0x1c64   :  { %5932 = vsyncpa [#allocation4], 1 }

</bundles_post_ra>
